<compile_context>
chip_gen: v7x
topology: tpu7x:2x2x1
jax: 0.10.0
libtpu: 0.0.40
codegen_flags: <defaults>
</compile_context>

<pallas_src>
import jax
import jax.numpy as jnp
import numpy as np
from jax.experimental import pallas as pl
from jax.experimental.pallas import tpu as pltpu

KERNEL_SIZE = 7
PAD = KERNEL_SIZE // 2


def _round_up(v, m):
    return (v + m - 1) // m * m


def _buffer_len(H, W):
    # Flat row-padded buffer must cover the largest tap window:
    #   max read index = (H*W - 1) + (K-1)*W + (K-1)
    return _round_up(H * W + (KERNEL_SIZE - 1) * (W + 1), 128)


def _pick_batch_block(N, C, H, W, budget_bytes=8 << 20):
    """Largest divisor of N whose per-step VMEM footprint fits the budget."""
    HW = H * W
    buflen = _buffer_len(H, W)
    per = (2 * C * HW * 4          # x block (double-buffered)
           + 2 * 8 * HW * 4        # output block (double-buffered, tile-padded)
           + 2 * buflen * 4        # stacked padded buffer (2 rows / batch el.)
           + 6 * HW * 4)           # accumulator + temporaries slack
    fixed = 2 * KERNEL_SIZE * HW * 4   # column masks (+ headroom)
    nb = 1
    for cand in range(1, N + 1):
        if N % cand == 0 and fixed + cand * per <= budget_bytes:
            nb = cand
    return nb


def _make_kernel(NB, H, W):
    K = KERNEL_SIZE
    HW = H * W
    R = 2 * NB                      # stacked sublane rows: [sum maps | max maps]
    DATA_OFF = PAD * (W + 1)        # flat offset of x[0, 0] inside the buffer

    def kernel(w_ref, mask_ref, x_ref, o_ref, buf_ref):
        # w_ref    : SMEM (2*K*K,) conv weights; channel-0 block pre-scaled by 1/C
        # mask_ref : VMEM (K, HW)  per-kw column-validity masks (host-computed)
        # x_ref    : VMEM (NB, C, HW) input slab (lane-dense: H*W on lanes)
        # o_ref    : VMEM (NB, 1, HW) output (lane-dense rows)
        # buf_ref  : VMEM (2*NB, BUFLEN) zero-padded flat avg/max maps

        # Re-zero the padded buffer every step (cheap: a few vregs of vst).
        # Only the data region is overwritten below; the borders must stay 0.
        buf_ref[...] = jnp.zeros_like(buf_ref)

        # ---- channel reduction, fully lane-dense on (C, H*W) ----------------
        # mean is realized as a sum (the 1/C is folded into the conv weights).
        for b in range(NB):
            xb = x_ref[b]                                          # (C, HW)
            buf_ref[b, DATA_OFF:DATA_OFF + HW] = (
                jnp.sum(xb, axis=0).astype(jnp.float32))           # -> mean
            buf_ref[NB + b, DATA_OFF:DATA_OFF + HW] = (
                jnp.max(xb, axis=0).astype(jnp.float32))           # -> max

        # ---- hoist the 2*K*K SMEM weight reads out of the tap loops ---------
        wts = [[[w_ref[c * K * K + i * K + j] for j in range(K)]
                for i in range(K)] for c in range(2)]

        # Row selector: first NB sublanes carry the sum maps (channel-0
        # weights), the remaining NB sublanes carry the max maps (channel-1).
        row_id = jax.lax.broadcasted_iota(jnp.int32, (R, HW), 0)
        is_sum_row = row_id < NB

        # ---- 7x7 conv as 49 flat shifted multiply-accumulates ---------------
        # One static lane-offset window per tap covers both conv input
        # channels and the whole batch block.  Column padding is handled by
        # the per-kw lane masks; row padding by real zeros in the buffer.
        acc = jnp.zeros((R, HW), jnp.float32)
        for kw in range(K):
            col_mask = mask_ref[kw]                                # (HW,)
            for kh in range(K):
                off = kh * W + kw
                window = buf_ref[:, off:off + HW]                  # (R, HW)
                wv = jnp.where(is_sum_row, wts[0][kh][kw], wts[1][kh][kw])
                acc = acc + (window * col_mask) * wv

        # ---- combine channels + sigmoid (exp / reciprocal on the EUP) -------
        # Staged through the (now free) scratch buffer so every access is an
        # aligned or int-indexed ref slice and every output store is a full
        # 256-lane row store.
        buf_ref[:, 0:HW] = acc
        z = buf_ref[0:NB, 0:HW] + buf_ref[NB:R, 0:HW]              # (NB, HW)
        out = pl.reciprocal(1.0 + jnp.exp(-z), approx=True)
        buf_ref[0:NB, 0:HW] = out
        for b in range(NB):
            o_ref[b, 0, :] = buf_ref[b, 0:HW].astype(o_ref.dtype)

    return kernel


def spatial_attention(x, conv_weight):
    """x: (N, C, H, W). conv_weight: (1, 2, K, K) (no bias).
    Returns sigmoid(conv7x7([mean_c(x), max_c(x)])) with shape (N, 1, H, W)."""
    N, C, H, W = x.shape
    K = KERNEL_SIZE
    assert conv_weight.shape == (1, 2, K, K)
    HW = H * W
    BUFLEN = _buffer_len(H, W)

    # Fold the 1/C of the channel mean into the input-channel-0 weights so the
    # kernel only needs a channel sum.
    w = conv_weight.astype(jnp.float32)
    w = w.at[0, 0].multiply(1.0 / C)
    w_flat = w.reshape(-1)                         # (2*K*K,) -> SMEM

    # Per-kw column-validity masks over the flat H*W layout (host-computed).
    wpos = np.arange(HW) % W
    masks = np.stack(
        [((wpos + kw >= PAD) & (wpos + kw < W + PAD)).astype(np.float32)
         for kw in range(K)], axis=0)              # (K, HW)
    masks = jnp.asarray(masks)

    NB = _pick_batch_block(N, C, H, W)             # batch elems per grid step
    x_flat = x.reshape(N, C, HW)                   # free contiguous reshape

    kernel = _make_kernel(NB, H, W)
    out_flat = pl.pallas_call(
        kernel,
        out_shape=jax.ShapeDtypeStruct((N, 1, HW), x.dtype),
        grid=(N // NB,),
        in_specs=[
            pl.BlockSpec(memory_space=pltpu.MemorySpace.SMEM),      # weights
            pl.BlockSpec((K, HW), lambda n: (0, 0)),                # col masks
            pl.BlockSpec((NB, C, HW), lambda n: (n, 0, 0)),         # x slab
        ],
        out_specs=pl.BlockSpec((NB, 1, HW), lambda n: (n, 0, 0)),
        scratch_shapes=[pltpu.VMEM((2 * NB, BUFLEN), jnp.float32)],
        compiler_params=pltpu.CompilerParams(
            dimension_semantics=("parallel",),
        ),
    )(w_flat, masks, x_flat)

    return out_flat.reshape(N, 1, H, W)


def _reference(x, conv_weight):
    avg_out = jnp.mean(x, axis=1, keepdims=True)
    max_out = jnp.max(x, axis=1, keepdims=True)
    feat = jnp.concatenate([avg_out, max_out], axis=1)          # (N, 2, H, W)
    conv = jax.lax.conv_general_dilated(
        feat, conv_weight, window_strides=(1, 1),
        padding=((PAD, PAD), (PAD, PAD)),
        dimension_numbers=("NCHW", "OIHW", "NCHW"))
    return jax.nn.sigmoid(conv)


if __name__ == "__main__":
    key = jax.random.PRNGKey(0)
    kx, kw = jax.random.split(key)

    N, C, H, W = 2, 4, 16, 16
    x = jax.random.normal(kx, (N, C, H, W), dtype=jnp.float32)
    # Deterministic conv weight, shape (out=1, in=2, K, K) like nn.Conv2d(2, 1, 7).
    conv_weight = 0.1 * jax.random.normal(
        kw, (1, 2, KERNEL_SIZE, KERNEL_SIZE), dtype=jnp.float32)

    out = spatial_attention(x, conv_weight)
    out = jax.block_until_ready(out)

    ref = jax.block_until_ready(_reference(x, conv_weight))
    # Tolerance relaxed from 1e-5 because the sigmoid uses the EUP's
    # approximate reciprocal (pl.reciprocal(..., approx=True)).
    np.testing.assert_allclose(np.asarray(out), np.asarray(ref),
                               rtol=5e-3, atol=5e-3)
    print("KERNEL_OK")
</pallas_src>

<mosaic_0001>
module attributes {stable_mosaic.version = 11 : i64} {
  func.func @kernel(%arg0: i32, %arg1: memref<98xf32, #tpu.memory_space<smem>>, %arg2: memref<7x256xf32, #tpu.memory_space<vmem>>, %arg3: memref<2x4x256xf32, #tpu.memory_space<vmem>>, %arg4: memref<2x1x256xf32, #tpu.memory_space<vmem>>, %arg5: memref<4x384xf32, #tpu.memory_space<vmem>>) attributes {dimension_semantics = [#tpu.dimension_semantics<parallel>], iteration_bounds = array<i64: 1>, scalar_prefetch = 0 : i64, scratch_operands = 1 : i64, tpu.core_type = #tpu.core_type<tc>, window_params = [{transform_indices = @transform_0, window_bounds = array<i64: 98>}, {pipeline_mode = #tpu.pipeline_mode<synchronous>, transform_indices = @transform_1, window_bounds = array<i64: 7, 256>}, {transform_indices = @transform_2, window_bounds = array<i64: 2, 4, 256>}, {transform_indices = @transform_3, window_bounds = array<i64: 2, 1, 256>}]} {
    %cst = arith.constant 0.000000e+00 : f32
    %0 = vector.broadcast %cst : f32 to vector<4x384xf32>
    %c0 = arith.constant 0 : index
    %c0_0 = arith.constant 0 : index
    %1 = vector.load %arg5[%c0, %c0_0] : memref<4x384xf32, #tpu.memory_space<vmem>>, vector<4x384xf32>
    tpu.vector_store %arg5[%c0, %c0_0], %0 {strides = array<i32>} : memref<4x384xf32, #tpu.memory_space<vmem>>, vector<4x384xf32>,
    %c0_1 = arith.constant 0 : index
    %c0_2 = arith.constant 0 : index
    %c0_3 = arith.constant 0 : index
    %2 = vector.load %arg3[%c0_1, %c0_2, %c0_3] : memref<2x4x256xf32, #tpu.memory_space<vmem>>, vector<1x4x256xf32>
    %3 = vector.shape_cast %2 : vector<1x4x256xf32> to vector<4x256xf32>
    %cst_4 = arith.constant dense<0.000000e+00> : vector<256xf32>
    %4 = vector.multi_reduction <add>, %3, %cst_4 [0] : vector<4x256xf32> to vector<256xf32>
    %c0_5 = arith.constant 0 : index
    %c51 = arith.constant 51 : index
    %5 = vector.load %arg5[%c0_5, %c51] : memref<4x384xf32, #tpu.memory_space<vmem>>, vector<1x256xf32>
    %6 = vector.shape_cast %5 : vector<1x256xf32> to vector<256xf32>
    %7 = vector.shape_cast %4 : vector<256xf32> to vector<1x256xf32>
    tpu.vector_store %arg5[%c0_5, %c51], %7 {strides = array<i32>} : memref<4x384xf32, #tpu.memory_space<vmem>>, vector<1x256xf32>,
    %cst_6 = arith.constant dense<0xFF800000> : vector<256xf32>
    %8 = vector.multi_reduction <maximumf>, %3, %cst_6 [0] : vector<4x256xf32> to vector<256xf32>
    %c2 = arith.constant 2 : index
    %c51_7 = arith.constant 51 : index
    %9 = vector.load %arg5[%c2, %c51_7] : memref<4x384xf32, #tpu.memory_space<vmem>>, vector<1x256xf32>
    %10 = vector.shape_cast %9 : vector<1x256xf32> to vector<256xf32>
    %11 = vector.shape_cast %8 : vector<256xf32> to vector<1x256xf32>
    tpu.vector_store %arg5[%c2, %c51_7], %11 {strides = array<i32>} : memref<4x384xf32, #tpu.memory_space<vmem>>, vector<1x256xf32>,
    %c1 = arith.constant 1 : index
    %c0_8 = arith.constant 0 : index
    %c0_9 = arith.constant 0 : index
    %12 = vector.load %arg3[%c1, %c0_8, %c0_9] : memref<2x4x256xf32, #tpu.memory_space<vmem>>, vector<1x4x256xf32>
    %13 = vector.shape_cast %12 : vector<1x4x256xf32> to vector<4x256xf32>
    %cst_10 = arith.constant dense<0.000000e+00> : vector<256xf32>
    %14 = vector.multi_reduction <add>, %13, %cst_10 [0] : vector<4x256xf32> to vector<256xf32>
    %c1_11 = arith.constant 1 : index
    %c51_12 = arith.constant 51 : index
    %15 = vector.load %arg5[%c1_11, %c51_12] : memref<4x384xf32, #tpu.memory_space<vmem>>, vector<1x256xf32>
    %16 = vector.shape_cast %15 : vector<1x256xf32> to vector<256xf32>
    %17 = vector.shape_cast %14 : vector<256xf32> to vector<1x256xf32>
    tpu.vector_store %arg5[%c1_11, %c51_12], %17 {strides = array<i32>} : memref<4x384xf32, #tpu.memory_space<vmem>>, vector<1x256xf32>,
    %cst_13 = arith.constant dense<0xFF800000> : vector<256xf32>
    %18 = vector.multi_reduction <maximumf>, %13, %cst_13 [0] : vector<4x256xf32> to vector<256xf32>
    %c3 = arith.constant 3 : index
    %c51_14 = arith.constant 51 : index
    %19 = vector.load %arg5[%c3, %c51_14] : memref<4x384xf32, #tpu.memory_space<vmem>>, vector<1x256xf32>
    %20 = vector.shape_cast %19 : vector<1x256xf32> to vector<256xf32>
    %21 = vector.shape_cast %18 : vector<256xf32> to vector<1x256xf32>
    tpu.vector_store %arg5[%c3, %c51_14], %21 {strides = array<i32>} : memref<4x384xf32, #tpu.memory_space<vmem>>, vector<1x256xf32>,
    %c0_15 = arith.constant 0 : index
    %22 = memref.load %arg1[%c0_15] : memref<98xf32, #tpu.memory_space<smem>>
    %c1_16 = arith.constant 1 : index
    %23 = memref.load %arg1[%c1_16] : memref<98xf32, #tpu.memory_space<smem>>
    %c2_17 = arith.constant 2 : index
    %24 = memref.load %arg1[%c2_17] : memref<98xf32, #tpu.memory_space<smem>>
    %c3_18 = arith.constant 3 : index
    %25 = memref.load %arg1[%c3_18] : memref<98xf32, #tpu.memory_space<smem>>
    %c4 = arith.constant 4 : index
    %26 = memref.load %arg1[%c4] : memref<98xf32, #tpu.memory_space<smem>>
    %c5 = arith.constant 5 : index
    %27 = memref.load %arg1[%c5] : memref<98xf32, #tpu.memory_space<smem>>
    %c6 = arith.constant 6 : index
    %28 = memref.load %arg1[%c6] : memref<98xf32, #tpu.memory_space<smem>>
    %c7 = arith.constant 7 : index
    %29 = memref.load %arg1[%c7] : memref<98xf32, #tpu.memory_space<smem>>
    %c8 = arith.constant 8 : index
    %30 = memref.load %arg1[%c8] : memref<98xf32, #tpu.memory_space<smem>>
    %c9 = arith.constant 9 : index
    %31 = memref.load %arg1[%c9] : memref<98xf32, #tpu.memory_space<smem>>
    %c10 = arith.constant 10 : index
    %32 = memref.load %arg1[%c10] : memref<98xf32, #tpu.memory_space<smem>>
    %c11 = arith.constant 11 : index
    %33 = memref.load %arg1[%c11] : memref<98xf32, #tpu.memory_space<smem>>
    %c12 = arith.constant 12 : index
    %34 = memref.load %arg1[%c12] : memref<98xf32, #tpu.memory_space<smem>>
    %c13 = arith.constant 13 : index
    %35 = memref.load %arg1[%c13] : memref<98xf32, #tpu.memory_space<smem>>
    %c14 = arith.constant 14 : index
    %36 = memref.load %arg1[%c14] : memref<98xf32, #tpu.memory_space<smem>>
    %c15 = arith.constant 15 : index
    %37 = memref.load %arg1[%c15] : memref<98xf32, #tpu.memory_space<smem>>
    %c16 = arith.constant 16 : index
    %38 = memref.load %arg1[%c16] : memref<98xf32, #tpu.memory_space<smem>>
    %c17 = arith.constant 17 : index
    %39 = memref.load %arg1[%c17] : memref<98xf32, #tpu.memory_space<smem>>
    %c18 = arith.constant 18 : index
    %40 = memref.load %arg1[%c18] : memref<98xf32, #tpu.memory_space<smem>>
    %c19 = arith.constant 19 : index
    %41 = memref.load %arg1[%c19] : memref<98xf32, #tpu.memory_space<smem>>
    %c20 = arith.constant 20 : index
    %42 = memref.load %arg1[%c20] : memref<98xf32, #tpu.memory_space<smem>>
    %c21 = arith.constant 21 : index
    %43 = memref.load %arg1[%c21] : memref<98xf32, #tpu.memory_space<smem>>
    %c22 = arith.constant 22 : index
    %44 = memref.load %arg1[%c22] : memref<98xf32, #tpu.memory_space<smem>>
    %c23 = arith.constant 23 : index
    %45 = memref.load %arg1[%c23] : memref<98xf32, #tpu.memory_space<smem>>
    %c24 = arith.constant 24 : index
    %46 = memref.load %arg1[%c24] : memref<98xf32, #tpu.memory_space<smem>>
    %c25 = arith.constant 25 : index
    %47 = memref.load %arg1[%c25] : memref<98xf32, #tpu.memory_space<smem>>
    %c26 = arith.constant 26 : index
    %48 = memref.load %arg1[%c26] : memref<98xf32, #tpu.memory_space<smem>>
    %c27 = arith.constant 27 : index
    %49 = memref.load %arg1[%c27] : memref<98xf32, #tpu.memory_space<smem>>
    %c28 = arith.constant 28 : index
    %50 = memref.load %arg1[%c28] : memref<98xf32, #tpu.memory_space<smem>>
    %c29 = arith.constant 29 : index
    %51 = memref.load %arg1[%c29] : memref<98xf32, #tpu.memory_space<smem>>
    %c30 = arith.constant 30 : index
    %52 = memref.load %arg1[%c30] : memref<98xf32, #tpu.memory_space<smem>>
    %c31 = arith.constant 31 : index
    %53 = memref.load %arg1[%c31] : memref<98xf32, #tpu.memory_space<smem>>
    %c32 = arith.constant 32 : index
    %54 = memref.load %arg1[%c32] : memref<98xf32, #tpu.memory_space<smem>>
    %c33 = arith.constant 33 : index
    %55 = memref.load %arg1[%c33] : memref<98xf32, #tpu.memory_space<smem>>
    %c34 = arith.constant 34 : index
    %56 = memref.load %arg1[%c34] : memref<98xf32, #tpu.memory_space<smem>>
    %c35 = arith.constant 35 : index
    %57 = memref.load %arg1[%c35] : memref<98xf32, #tpu.memory_space<smem>>
    %c36 = arith.constant 36 : index
    %58 = memref.load %arg1[%c36] : memref<98xf32, #tpu.memory_space<smem>>
    %c37 = arith.constant 37 : index
    %59 = memref.load %arg1[%c37] : memref<98xf32, #tpu.memory_space<smem>>
    %c38 = arith.constant 38 : index
    %60 = memref.load %arg1[%c38] : memref<98xf32, #tpu.memory_space<smem>>
    %c39 = arith.constant 39 : index
    %61 = memref.load %arg1[%c39] : memref<98xf32, #tpu.memory_space<smem>>
    %c40 = arith.constant 40 : index
    %62 = memref.load %arg1[%c40] : memref<98xf32, #tpu.memory_space<smem>>
    %c41 = arith.constant 41 : index
    %63 = memref.load %arg1[%c41] : memref<98xf32, #tpu.memory_space<smem>>
    %c42 = arith.constant 42 : index
    %64 = memref.load %arg1[%c42] : memref<98xf32, #tpu.memory_space<smem>>
    %c43 = arith.constant 43 : index
    %65 = memref.load %arg1[%c43] : memref<98xf32, #tpu.memory_space<smem>>
    %c44 = arith.constant 44 : index
    %66 = memref.load %arg1[%c44] : memref<98xf32, #tpu.memory_space<smem>>
    %c45 = arith.constant 45 : index
    %67 = memref.load %arg1[%c45] : memref<98xf32, #tpu.memory_space<smem>>
    %c46 = arith.constant 46 : index
    %68 = memref.load %arg1[%c46] : memref<98xf32, #tpu.memory_space<smem>>
    %c47 = arith.constant 47 : index
    %69 = memref.load %arg1[%c47] : memref<98xf32, #tpu.memory_space<smem>>
    %c48 = arith.constant 48 : index
    %70 = memref.load %arg1[%c48] : memref<98xf32, #tpu.memory_space<smem>>
    %c49 = arith.constant 49 : index
    %71 = memref.load %arg1[%c49] : memref<98xf32, #tpu.memory_space<smem>>
    %c50 = arith.constant 50 : index
    %72 = memref.load %arg1[%c50] : memref<98xf32, #tpu.memory_space<smem>>
    %c51_19 = arith.constant 51 : index
    %73 = memref.load %arg1[%c51_19] : memref<98xf32, #tpu.memory_space<smem>>
    %c52 = arith.constant 52 : index
    %74 = memref.load %arg1[%c52] : memref<98xf32, #tpu.memory_space<smem>>
    %c53 = arith.constant 53 : index
    %75 = memref.load %arg1[%c53] : memref<98xf32, #tpu.memory_space<smem>>
    %c54 = arith.constant 54 : index
    %76 = memref.load %arg1[%c54] : memref<98xf32, #tpu.memory_space<smem>>
    %c55 = arith.constant 55 : index
    %77 = memref.load %arg1[%c55] : memref<98xf32, #tpu.memory_space<smem>>
    %c56 = arith.constant 56 : index
    %78 = memref.load %arg1[%c56] : memref<98xf32, #tpu.memory_space<smem>>
    %c57 = arith.constant 57 : index
    %79 = memref.load %arg1[%c57] : memref<98xf32, #tpu.memory_space<smem>>
    %c58 = arith.constant 58 : index
    %80 = memref.load %arg1[%c58] : memref<98xf32, #tpu.memory_space<smem>>
    %c59 = arith.constant 59 : index
    %81 = memref.load %arg1[%c59] : memref<98xf32, #tpu.memory_space<smem>>
    %c60 = arith.constant 60 : index
    %82 = memref.load %arg1[%c60] : memref<98xf32, #tpu.memory_space<smem>>
    %c61 = arith.constant 61 : index
    %83 = memref.load %arg1[%c61] : memref<98xf32, #tpu.memory_space<smem>>
    %c62 = arith.constant 62 : index
    %84 = memref.load %arg1[%c62] : memref<98xf32, #tpu.memory_space<smem>>
    %c63 = arith.constant 63 : index
    %85 = memref.load %arg1[%c63] : memref<98xf32, #tpu.memory_space<smem>>
    %c64 = arith.constant 64 : index
    %86 = memref.load %arg1[%c64] : memref<98xf32, #tpu.memory_space<smem>>
    %c65 = arith.constant 65 : index
    %87 = memref.load %arg1[%c65] : memref<98xf32, #tpu.memory_space<smem>>
    %c66 = arith.constant 66 : index
    %88 = memref.load %arg1[%c66] : memref<98xf32, #tpu.memory_space<smem>>
    %c67 = arith.constant 67 : index
    %89 = memref.load %arg1[%c67] : memref<98xf32, #tpu.memory_space<smem>>
    %c68 = arith.constant 68 : index
    %90 = memref.load %arg1[%c68] : memref<98xf32, #tpu.memory_space<smem>>
    %c69 = arith.constant 69 : index
    %91 = memref.load %arg1[%c69] : memref<98xf32, #tpu.memory_space<smem>>
    %c70 = arith.constant 70 : index
    %92 = memref.load %arg1[%c70] : memref<98xf32, #tpu.memory_space<smem>>
    %c71 = arith.constant 71 : index
    %93 = memref.load %arg1[%c71] : memref<98xf32, #tpu.memory_space<smem>>
    %c72 = arith.constant 72 : index
    %94 = memref.load %arg1[%c72] : memref<98xf32, #tpu.memory_space<smem>>
    %c73 = arith.constant 73 : index
    %95 = memref.load %arg1[%c73] : memref<98xf32, #tpu.memory_space<smem>>
    %c74 = arith.constant 74 : index
    %96 = memref.load %arg1[%c74] : memref<98xf32, #tpu.memory_space<smem>>
    %c75 = arith.constant 75 : index
    %97 = memref.load %arg1[%c75] : memref<98xf32, #tpu.memory_space<smem>>
    %c76 = arith.constant 76 : index
    %98 = memref.load %arg1[%c76] : memref<98xf32, #tpu.memory_space<smem>>
    %c77 = arith.constant 77 : index
    %99 = memref.load %arg1[%c77] : memref<98xf32, #tpu.memory_space<smem>>
    %c78 = arith.constant 78 : index
    %100 = memref.load %arg1[%c78] : memref<98xf32, #tpu.memory_space<smem>>
    %c79 = arith.constant 79 : index
    %101 = memref.load %arg1[%c79] : memref<98xf32, #tpu.memory_space<smem>>
    %c80 = arith.constant 80 : index
    %102 = memref.load %arg1[%c80] : memref<98xf32, #tpu.memory_space<smem>>
    %c81 = arith.constant 81 : index
    %103 = memref.load %arg1[%c81] : memref<98xf32, #tpu.memory_space<smem>>
    %c82 = arith.constant 82 : index
    %104 = memref.load %arg1[%c82] : memref<98xf32, #tpu.memory_space<smem>>
    %c83 = arith.constant 83 : index
    %105 = memref.load %arg1[%c83] : memref<98xf32, #tpu.memory_space<smem>>
    %c84 = arith.constant 84 : index
    %106 = memref.load %arg1[%c84] : memref<98xf32, #tpu.memory_space<smem>>
    %c85 = arith.constant 85 : index
    %107 = memref.load %arg1[%c85] : memref<98xf32, #tpu.memory_space<smem>>
    %c86 = arith.constant 86 : index
    %108 = memref.load %arg1[%c86] : memref<98xf32, #tpu.memory_space<smem>>
    %c87 = arith.constant 87 : index
    %109 = memref.load %arg1[%c87] : memref<98xf32, #tpu.memory_space<smem>>
    %c88 = arith.constant 88 : index
    %110 = memref.load %arg1[%c88] : memref<98xf32, #tpu.memory_space<smem>>
    %c89 = arith.constant 89 : index
    %111 = memref.load %arg1[%c89] : memref<98xf32, #tpu.memory_space<smem>>
    %c90 = arith.constant 90 : index
    %112 = memref.load %arg1[%c90] : memref<98xf32, #tpu.memory_space<smem>>
    %c91 = arith.constant 91 : index
    %113 = memref.load %arg1[%c91] : memref<98xf32, #tpu.memory_space<smem>>
    %c92 = arith.constant 92 : index
    %114 = memref.load %arg1[%c92] : memref<98xf32, #tpu.memory_space<smem>>
    %c93 = arith.constant 93 : index
    %115 = memref.load %arg1[%c93] : memref<98xf32, #tpu.memory_space<smem>>
    %c94 = arith.constant 94 : index
    %116 = memref.load %arg1[%c94] : memref<98xf32, #tpu.memory_space<smem>>
    %c95 = arith.constant 95 : index
    %117 = memref.load %arg1[%c95] : memref<98xf32, #tpu.memory_space<smem>>
    %c96 = arith.constant 96 : index
    %118 = memref.load %arg1[%c96] : memref<98xf32, #tpu.memory_space<smem>>
    %c97 = arith.constant 97 : index
    %119 = memref.load %arg1[%c97] : memref<98xf32, #tpu.memory_space<smem>>
    %120 = tpu.iota {dimensions = array<i32: 0>} : vector<4x256xi32>
    %c2_i32 = arith.constant 2 : i32
    %121 = vector.broadcast %c2_i32 : i32 to vector<4x256xi32>
    %122 = arith.cmpi slt, %120, %121 : vector<4x256xi32>
    %cst_20 = arith.constant 0.000000e+00 : f32
    %123 = vector.broadcast %cst_20 : f32 to vector<4x256xf32>
    %c0_21 = arith.constant 0 : index
    %c0_22 = arith.constant 0 : index
    %124 = vector.load %arg2[%c0_21, %c0_22] : memref<7x256xf32, #tpu.memory_space<vmem>>, vector<1x256xf32>
    %125 = vector.shape_cast %124 : vector<1x256xf32> to vector<256xf32>
    %c0_23 = arith.constant 0 : index
    %c0_24 = arith.constant 0 : index
    %126 = vector.load %arg5[%c0_23, %c0_24] : memref<4x384xf32, #tpu.memory_space<vmem>>, vector<4x256xf32>
    %127 = vector.broadcast %22 : f32 to vector<4x256xf32>
    %128 = vector.broadcast %71 : f32 to vector<4x256xf32>
    %129 = arith.select %122, %127, %128 : vector<4x256xi1>, vector<4x256xf32>
    %130 = vector.shape_cast %125 : vector<256xf32> to vector<1x256xf32>
    %131 = vector.broadcast %130 : vector<1x256xf32> to vector<4x256xf32>
    %132 = arith.mulf %126, %131 : vector<4x256xf32>
    %133 = arith.mulf %132, %129 : vector<4x256xf32>
    %134 = arith.addf %123, %133 : vector<4x256xf32>
    %c0_25 = arith.constant 0 : index
    %c16_26 = arith.constant 16 : index
    %135 = vector.load %arg5[%c0_25, %c16_26] : memref<4x384xf32, #tpu.memory_space<vmem>>, vector<4x256xf32>
    %136 = vector.broadcast %29 : f32 to vector<4x256xf32>
    %137 = vector.broadcast %78 : f32 to vector<4x256xf32>
    %138 = arith.select %122, %136, %137 : vector<4x256xi1>, vector<4x256xf32>
    %139 = vector.shape_cast %125 : vector<256xf32> to vector<1x256xf32>
    %140 = vector.broadcast %139 : vector<1x256xf32> to vector<4x256xf32>
    %141 = arith.mulf %135, %140 : vector<4x256xf32>
    %142 = arith.mulf %141, %138 : vector<4x256xf32>
    %143 = arith.addf %134, %142 : vector<4x256xf32>
    %c0_27 = arith.constant 0 : index
    %c32_28 = arith.constant 32 : index
    %144 = vector.load %arg5[%c0_27, %c32_28] : memref<4x384xf32, #tpu.memory_space<vmem>>, vector<4x256xf32>
    %145 = vector.broadcast %36 : f32 to vector<4x256xf32>
    %146 = vector.broadcast %85 : f32 to vector<4x256xf32>
    %147 = arith.select %122, %145, %146 : vector<4x256xi1>, vector<4x256xf32>
    %148 = vector.shape_cast %125 : vector<256xf32> to vector<1x256xf32>
    %149 = vector.broadcast %148 : vector<1x256xf32> to vector<4x256xf32>
    %150 = arith.mulf %144, %149 : vector<4x256xf32>
    %151 = arith.mulf %150, %147 : vector<4x256xf32>
    %152 = arith.addf %143, %151 : vector<4x256xf32>
    %c0_29 = arith.constant 0 : index
    %c48_30 = arith.constant 48 : index
    %153 = vector.load %arg5[%c0_29, %c48_30] : memref<4x384xf32, #tpu.memory_space<vmem>>, vector<4x256xf32>
    %154 = vector.broadcast %43 : f32 to vector<4x256xf32>
    %155 = vector.broadcast %92 : f32 to vector<4x256xf32>
    %156 = arith.select %122, %154, %155 : vector<4x256xi1>, vector<4x256xf32>
    %157 = vector.shape_cast %125 : vector<256xf32> to vector<1x256xf32>
    %158 = vector.broadcast %157 : vector<1x256xf32> to vector<4x256xf32>
    %159 = arith.mulf %153, %158 : vector<4x256xf32>
    %160 = arith.mulf %159, %156 : vector<4x256xf32>
    %161 = arith.addf %152, %160 : vector<4x256xf32>
    %c0_31 = arith.constant 0 : index
    %c64_32 = arith.constant 64 : index
    %162 = vector.load %arg5[%c0_31, %c64_32] : memref<4x384xf32, #tpu.memory_space<vmem>>, vector<4x256xf32>
    %163 = vector.broadcast %50 : f32 to vector<4x256xf32>
    %164 = vector.broadcast %99 : f32 to vector<4x256xf32>
    %165 = arith.select %122, %163, %164 : vector<4x256xi1>, vector<4x256xf32>
    %166 = vector.shape_cast %125 : vector<256xf32> to vector<1x256xf32>
    %167 = vector.broadcast %166 : vector<1x256xf32> to vector<4x256xf32>
    %168 = arith.mulf %162, %167 : vector<4x256xf32>
    %169 = arith.mulf %168, %165 : vector<4x256xf32>
    %170 = arith.addf %161, %169 : vector<4x256xf32>
    %c0_33 = arith.constant 0 : index
    %c80_34 = arith.constant 80 : index
    %171 = vector.load %arg5[%c0_33, %c80_34] : memref<4x384xf32, #tpu.memory_space<vmem>>, vector<4x256xf32>
    %172 = vector.broadcast %57 : f32 to vector<4x256xf32>
    %173 = vector.broadcast %106 : f32 to vector<4x256xf32>
    %174 = arith.select %122, %172, %173 : vector<4x256xi1>, vector<4x256xf32>
    %175 = vector.shape_cast %125 : vector<256xf32> to vector<1x256xf32>
    %176 = vector.broadcast %175 : vector<1x256xf32> to vector<4x256xf32>
    %177 = arith.mulf %171, %176 : vector<4x256xf32>
    %178 = arith.mulf %177, %174 : vector<4x256xf32>
    %179 = arith.addf %170, %178 : vector<4x256xf32>
    %c0_35 = arith.constant 0 : index
    %c96_36 = arith.constant 96 : index
    %180 = vector.load %arg5[%c0_35, %c96_36] : memref<4x384xf32, #tpu.memory_space<vmem>>, vector<4x256xf32>
    %181 = vector.broadcast %64 : f32 to vector<4x256xf32>
    %182 = vector.broadcast %113 : f32 to vector<4x256xf32>
    %183 = arith.select %122, %181, %182 : vector<4x256xi1>, vector<4x256xf32>
    %184 = vector.shape_cast %125 : vector<256xf32> to vector<1x256xf32>
    %185 = vector.broadcast %184 : vector<1x256xf32> to vector<4x256xf32>
    %186 = arith.mulf %180, %185 : vector<4x256xf32>
    %187 = arith.mulf %186, %183 : vector<4x256xf32>
    %188 = arith.addf %179, %187 : vector<4x256xf32>
    %c1_37 = arith.constant 1 : index
    %c0_38 = arith.constant 0 : index
    %189 = vector.load %arg2[%c1_37, %c0_38] : memref<7x256xf32, #tpu.memory_space<vmem>>, vector<1x256xf32>
    %190 = vector.shape_cast %189 : vector<1x256xf32> to vector<256xf32>
    %c0_39 = arith.constant 0 : index
    %c1_40 = arith.constant 1 : index
    %191 = vector.load %arg5[%c0_39, %c1_40] : memref<4x384xf32, #tpu.memory_space<vmem>>, vector<4x256xf32>
    %192 = vector.broadcast %23 : f32 to vector<4x256xf32>
    %193 = vector.broadcast %72 : f32 to vector<4x256xf32>
    %194 = arith.select %122, %192, %193 : vector<4x256xi1>, vector<4x256xf32>
    %195 = vector.shape_cast %190 : vector<256xf32> to vector<1x256xf32>
    %196 = vector.broadcast %195 : vector<1x256xf32> to vector<4x256xf32>
    %197 = arith.mulf %191, %196 : vector<4x256xf32>
    %198 = arith.mulf %197, %194 : vector<4x256xf32>
    %199 = arith.addf %188, %198 : vector<4x256xf32>
    %c0_41 = arith.constant 0 : index
    %c17_42 = arith.constant 17 : index
    %200 = vector.load %arg5[%c0_41, %c17_42] : memref<4x384xf32, #tpu.memory_space<vmem>>, vector<4x256xf32>
    %201 = vector.broadcast %30 : f32 to vector<4x256xf32>
    %202 = vector.broadcast %79 : f32 to vector<4x256xf32>
    %203 = arith.select %122, %201, %202 : vector<4x256xi1>, vector<4x256xf32>
    %204 = vector.shape_cast %190 : vector<256xf32> to vector<1x256xf32>
    %205 = vector.broadcast %204 : vector<1x256xf32> to vector<4x256xf32>
    %206 = arith.mulf %200, %205 : vector<4x256xf32>
    %207 = arith.mulf %206, %203 : vector<4x256xf32>
    %208 = arith.addf %199, %207 : vector<4x256xf32>
    %c0_43 = arith.constant 0 : index
    %c33_44 = arith.constant 33 : index
    %209 = vector.load %arg5[%c0_43, %c33_44] : memref<4x384xf32, #tpu.memory_space<vmem>>, vector<4x256xf32>
    %210 = vector.broadcast %37 : f32 to vector<4x256xf32>
    %211 = vector.broadcast %86 : f32 to vector<4x256xf32>
    %212 = arith.select %122, %210, %211 : vector<4x256xi1>, vector<4x256xf32>
    %213 = vector.shape_cast %190 : vector<256xf32> to vector<1x256xf32>
    %214 = vector.broadcast %213 : vector<1x256xf32> to vector<4x256xf32>
    %215 = arith.mulf %209, %214 : vector<4x256xf32>
    %216 = arith.mulf %215, %212 : vector<4x256xf32>
    %217 = arith.addf %208, %216 : vector<4x256xf32>
    %c0_45 = arith.constant 0 : index
    %c49_46 = arith.constant 49 : index
    %218 = vector.load %arg5[%c0_45, %c49_46] : memref<4x384xf32, #tpu.memory_space<vmem>>, vector<4x256xf32>
    %219 = vector.broadcast %44 : f32 to vector<4x256xf32>
    %220 = vector.broadcast %93 : f32 to vector<4x256xf32>
    %221 = arith.select %122, %219, %220 : vector<4x256xi1>, vector<4x256xf32>
    %222 = vector.shape_cast %190 : vector<256xf32> to vector<1x256xf32>
    %223 = vector.broadcast %222 : vector<1x256xf32> to vector<4x256xf32>
    %224 = arith.mulf %218, %223 : vector<4x256xf32>
    %225 = arith.mulf %224, %221 : vector<4x256xf32>
    %226 = arith.addf %217, %225 : vector<4x256xf32>
    %c0_47 = arith.constant 0 : index
    %c65_48 = arith.constant 65 : index
    %227 = vector.load %arg5[%c0_47, %c65_48] : memref<4x384xf32, #tpu.memory_space<vmem>>, vector<4x256xf32>
    %228 = vector.broadcast %51 : f32 to vector<4x256xf32>
    %229 = vector.broadcast %100 : f32 to vector<4x256xf32>
    %230 = arith.select %122, %228, %229 : vector<4x256xi1>, vector<4x256xf32>
    %231 = vector.shape_cast %190 : vector<256xf32> to vector<1x256xf32>
    %232 = vector.broadcast %231 : vector<1x256xf32> to vector<4x256xf32>
    %233 = arith.mulf %227, %232 : vector<4x256xf32>
    %234 = arith.mulf %233, %230 : vector<4x256xf32>
    %235 = arith.addf %226, %234 : vector<4x256xf32>
    %c0_49 = arith.constant 0 : index
    %c81_50 = arith.constant 81 : index
    %236 = vector.load %arg5[%c0_49, %c81_50] : memref<4x384xf32, #tpu.memory_space<vmem>>, vector<4x256xf32>
    %237 = vector.broadcast %58 : f32 to vector<4x256xf32>
    %238 = vector.broadcast %107 : f32 to vector<4x256xf32>
    %239 = arith.select %122, %237, %238 : vector<4x256xi1>, vector<4x256xf32>
    %240 = vector.shape_cast %190 : vector<256xf32> to vector<1x256xf32>
    %241 = vector.broadcast %240 : vector<1x256xf32> to vector<4x256xf32>
    %242 = arith.mulf %236, %241 : vector<4x256xf32>
    %243 = arith.mulf %242, %239 : vector<4x256xf32>
    %244 = arith.addf %235, %243 : vector<4x256xf32>
    %c0_51 = arith.constant 0 : index
    %c97_52 = arith.constant 97 : index
    %245 = vector.load %arg5[%c0_51, %c97_52] : memref<4x384xf32, #tpu.memory_space<vmem>>, vector<4x256xf32>
    %246 = vector.broadcast %65 : f32 to vector<4x256xf32>
    %247 = vector.broadcast %114 : f32 to vector<4x256xf32>
    %248 = arith.select %122, %246, %247 : vector<4x256xi1>, vector<4x256xf32>
    %249 = vector.shape_cast %190 : vector<256xf32> to vector<1x256xf32>
    %250 = vector.broadcast %249 : vector<1x256xf32> to vector<4x256xf32>
    %251 = arith.mulf %245, %250 : vector<4x256xf32>
    %252 = arith.mulf %251, %248 : vector<4x256xf32>
    %253 = arith.addf %244, %252 : vector<4x256xf32>
    %c2_53 = arith.constant 2 : index
    %c0_54 = arith.constant 0 : index
    %254 = vector.load %arg2[%c2_53, %c0_54] : memref<7x256xf32, #tpu.memory_space<vmem>>, vector<1x256xf32>
    %255 = vector.shape_cast %254 : vector<1x256xf32> to vector<256xf32>
    %c0_55 = arith.constant 0 : index
    %c2_56 = arith.constant 2 : index
    %256 = vector.load %arg5[%c0_55, %c2_56] : memref<4x384xf32, #tpu.memory_space<vmem>>, vector<4x256xf32>
    %257 = vector.broadcast %24 : f32 to vector<4x256xf32>
    %258 = vector.broadcast %73 : f32 to vector<4x256xf32>
    %259 = arith.select %122, %257, %258 : vector<4x256xi1>, vector<4x256xf32>
    %260 = vector.shape_cast %255 : vector<256xf32> to vector<1x256xf32>
    %261 = vector.broadcast %260 : vector<1x256xf32> to vector<4x256xf32>
    %262 = arith.mulf %256, %261 : vector<4x256xf32>
    %263 = arith.mulf %262, %259 : vector<4x256xf32>
    %264 = arith.addf %253, %263 : vector<4x256xf32>
    %c0_57 = arith.constant 0 : index
    %c18_58 = arith.constant 18 : index
    %265 = vector.load %arg5[%c0_57, %c18_58] : memref<4x384xf32, #tpu.memory_space<vmem>>, vector<4x256xf32>
    %266 = vector.broadcast %31 : f32 to vector<4x256xf32>
    %267 = vector.broadcast %80 : f32 to vector<4x256xf32>
    %268 = arith.select %122, %266, %267 : vector<4x256xi1>, vector<4x256xf32>
    %269 = vector.shape_cast %255 : vector<256xf32> to vector<1x256xf32>
    %270 = vector.broadcast %269 : vector<1x256xf32> to vector<4x256xf32>
    %271 = arith.mulf %265, %270 : vector<4x256xf32>
    %272 = arith.mulf %271, %268 : vector<4x256xf32>
    %273 = arith.addf %264, %272 : vector<4x256xf32>
    %c0_59 = arith.constant 0 : index
    %c34_60 = arith.constant 34 : index
    %274 = vector.load %arg5[%c0_59, %c34_60] : memref<4x384xf32, #tpu.memory_space<vmem>>, vector<4x256xf32>
    %275 = vector.broadcast %38 : f32 to vector<4x256xf32>
    %276 = vector.broadcast %87 : f32 to vector<4x256xf32>
    %277 = arith.select %122, %275, %276 : vector<4x256xi1>, vector<4x256xf32>
    %278 = vector.shape_cast %255 : vector<256xf32> to vector<1x256xf32>
    %279 = vector.broadcast %278 : vector<1x256xf32> to vector<4x256xf32>
    %280 = arith.mulf %274, %279 : vector<4x256xf32>
    %281 = arith.mulf %280, %277 : vector<4x256xf32>
    %282 = arith.addf %273, %281 : vector<4x256xf32>
    %c0_61 = arith.constant 0 : index
    %c50_62 = arith.constant 50 : index
    %283 = vector.load %arg5[%c0_61, %c50_62] : memref<4x384xf32, #tpu.memory_space<vmem>>, vector<4x256xf32>
    %284 = vector.broadcast %45 : f32 to vector<4x256xf32>
    %285 = vector.broadcast %94 : f32 to vector<4x256xf32>
    %286 = arith.select %122, %284, %285 : vector<4x256xi1>, vector<4x256xf32>
    %287 = vector.shape_cast %255 : vector<256xf32> to vector<1x256xf32>
    %288 = vector.broadcast %287 : vector<1x256xf32> to vector<4x256xf32>
    %289 = arith.mulf %283, %288 : vector<4x256xf32>
    %290 = arith.mulf %289, %286 : vector<4x256xf32>
    %291 = arith.addf %282, %290 : vector<4x256xf32>
    %c0_63 = arith.constant 0 : index
    %c66_64 = arith.constant 66 : index
    %292 = vector.load %arg5[%c0_63, %c66_64] : memref<4x384xf32, #tpu.memory_space<vmem>>, vector<4x256xf32>
    %293 = vector.broadcast %52 : f32 to vector<4x256xf32>
    %294 = vector.broadcast %101 : f32 to vector<4x256xf32>
    %295 = arith.select %122, %293, %294 : vector<4x256xi1>, vector<4x256xf32>
    %296 = vector.shape_cast %255 : vector<256xf32> to vector<1x256xf32>
    %297 = vector.broadcast %296 : vector<1x256xf32> to vector<4x256xf32>
    %298 = arith.mulf %292, %297 : vector<4x256xf32>
    %299 = arith.mulf %298, %295 : vector<4x256xf32>
    %300 = arith.addf %291, %299 : vector<4x256xf32>
    %c0_65 = arith.constant 0 : index
    %c82_66 = arith.constant 82 : index
    %301 = vector.load %arg5[%c0_65, %c82_66] : memref<4x384xf32, #tpu.memory_space<vmem>>, vector<4x256xf32>
    %302 = vector.broadcast %59 : f32 to vector<4x256xf32>
    %303 = vector.broadcast %108 : f32 to vector<4x256xf32>
    %304 = arith.select %122, %302, %303 : vector<4x256xi1>, vector<4x256xf32>
    %305 = vector.shape_cast %255 : vector<256xf32> to vector<1x256xf32>
    %306 = vector.broadcast %305 : vector<1x256xf32> to vector<4x256xf32>
    %307 = arith.mulf %301, %306 : vector<4x256xf32>
    %308 = arith.mulf %307, %304 : vector<4x256xf32>
    %309 = arith.addf %300, %308 : vector<4x256xf32>
    %c0_67 = arith.constant 0 : index
    %c98 = arith.constant 98 : index
    %310 = vector.load %arg5[%c0_67, %c98] : memref<4x384xf32, #tpu.memory_space<vmem>>, vector<4x256xf32>
    %311 = vector.broadcast %66 : f32 to vector<4x256xf32>
    %312 = vector.broadcast %115 : f32 to vector<4x256xf32>
    %313 = arith.select %122, %311, %312 : vector<4x256xi1>, vector<4x256xf32>
    %314 = vector.shape_cast %255 : vector<256xf32> to vector<1x256xf32>
    %315 = vector.broadcast %314 : vector<1x256xf32> to vector<4x256xf32>
    %316 = arith.mulf %310, %315 : vector<4x256xf32>
    %317 = arith.mulf %316, %313 : vector<4x256xf32>
    %318 = arith.addf %309, %317 : vector<4x256xf32>
    %c3_68 = arith.constant 3 : index
    %c0_69 = arith.constant 0 : index
    %319 = vector.load %arg2[%c3_68, %c0_69] : memref<7x256xf32, #tpu.memory_space<vmem>>, vector<1x256xf32>
    %320 = vector.shape_cast %319 : vector<1x256xf32> to vector<256xf32>
    %c0_70 = arith.constant 0 : index
    %c3_71 = arith.constant 3 : index
    %321 = vector.load %arg5[%c0_70, %c3_71] : memref<4x384xf32, #tpu.memory_space<vmem>>, vector<4x256xf32>
    %322 = vector.broadcast %25 : f32 to vector<4x256xf32>
    %323 = vector.broadcast %74 : f32 to vector<4x256xf32>
    %324 = arith.select %122, %322, %323 : vector<4x256xi1>, vector<4x256xf32>
    %325 = vector.shape_cast %320 : vector<256xf32> to vector<1x256xf32>
    %326 = vector.broadcast %325 : vector<1x256xf32> to vector<4x256xf32>
    %327 = arith.mulf %321, %326 : vector<4x256xf32>
    %328 = arith.mulf %327, %324 : vector<4x256xf32>
    %329 = arith.addf %318, %328 : vector<4x256xf32>
    %c0_72 = arith.constant 0 : index
    %c19_73 = arith.constant 19 : index
    %330 = vector.load %arg5[%c0_72, %c19_73] : memref<4x384xf32, #tpu.memory_space<vmem>>, vector<4x256xf32>
    %331 = vector.broadcast %32 : f32 to vector<4x256xf32>
    %332 = vector.broadcast %81 : f32 to vector<4x256xf32>
    %333 = arith.select %122, %331, %332 : vector<4x256xi1>, vector<4x256xf32>
    %334 = vector.shape_cast %320 : vector<256xf32> to vector<1x256xf32>
    %335 = vector.broadcast %334 : vector<1x256xf32> to vector<4x256xf32>
    %336 = arith.mulf %330, %335 : vector<4x256xf32>
    %337 = arith.mulf %336, %333 : vector<4x256xf32>
    %338 = arith.addf %329, %337 : vector<4x256xf32>
    %c0_74 = arith.constant 0 : index
    %c35_75 = arith.constant 35 : index
    %339 = vector.load %arg5[%c0_74, %c35_75] : memref<4x384xf32, #tpu.memory_space<vmem>>, vector<4x256xf32>
    %340 = vector.broadcast %39 : f32 to vector<4x256xf32>
    %341 = vector.broadcast %88 : f32 to vector<4x256xf32>
    %342 = arith.select %122, %340, %341 : vector<4x256xi1>, vector<4x256xf32>
    %343 = vector.shape_cast %320 : vector<256xf32> to vector<1x256xf32>
    %344 = vector.broadcast %343 : vector<1x256xf32> to vector<4x256xf32>
    %345 = arith.mulf %339, %344 : vector<4x256xf32>
    %346 = arith.mulf %345, %342 : vector<4x256xf32>
    %347 = arith.addf %338, %346 : vector<4x256xf32>
    %c0_76 = arith.constant 0 : index
    %c51_77 = arith.constant 51 : index
    %348 = vector.load %arg5[%c0_76, %c51_77] : memref<4x384xf32, #tpu.memory_space<vmem>>, vector<4x256xf32>
    %349 = vector.broadcast %46 : f32 to vector<4x256xf32>
    %350 = vector.broadcast %95 : f32 to vector<4x256xf32>
    %351 = arith.select %122, %349, %350 : vector<4x256xi1>, vector<4x256xf32>
    %352 = vector.shape_cast %320 : vector<256xf32> to vector<1x256xf32>
    %353 = vector.broadcast %352 : vector<1x256xf32> to vector<4x256xf32>
    %354 = arith.mulf %348, %353 : vector<4x256xf32>
    %355 = arith.mulf %354, %351 : vector<4x256xf32>
    %356 = arith.addf %347, %355 : vector<4x256xf32>
    %c0_78 = arith.constant 0 : index
    %c67_79 = arith.constant 67 : index
    %357 = vector.load %arg5[%c0_78, %c67_79] : memref<4x384xf32, #tpu.memory_space<vmem>>, vector<4x256xf32>
    %358 = vector.broadcast %53 : f32 to vector<4x256xf32>
    %359 = vector.broadcast %102 : f32 to vector<4x256xf32>
    %360 = arith.select %122, %358, %359 : vector<4x256xi1>, vector<4x256xf32>
    %361 = vector.shape_cast %320 : vector<256xf32> to vector<1x256xf32>
    %362 = vector.broadcast %361 : vector<1x256xf32> to vector<4x256xf32>
    %363 = arith.mulf %357, %362 : vector<4x256xf32>
    %364 = arith.mulf %363, %360 : vector<4x256xf32>
    %365 = arith.addf %356, %364 : vector<4x256xf32>
    %c0_80 = arith.constant 0 : index
    %c83_81 = arith.constant 83 : index
    %366 = vector.load %arg5[%c0_80, %c83_81] : memref<4x384xf32, #tpu.memory_space<vmem>>, vector<4x256xf32>
    %367 = vector.broadcast %60 : f32 to vector<4x256xf32>
    %368 = vector.broadcast %109 : f32 to vector<4x256xf32>
    %369 = arith.select %122, %367, %368 : vector<4x256xi1>, vector<4x256xf32>
    %370 = vector.shape_cast %320 : vector<256xf32> to vector<1x256xf32>
    %371 = vector.broadcast %370 : vector<1x256xf32> to vector<4x256xf32>
    %372 = arith.mulf %366, %371 : vector<4x256xf32>
    %373 = arith.mulf %372, %369 : vector<4x256xf32>
    %374 = arith.addf %365, %373 : vector<4x256xf32>
    %c0_82 = arith.constant 0 : index
    %c99 = arith.constant 99 : index
    %375 = vector.load %arg5[%c0_82, %c99] : memref<4x384xf32, #tpu.memory_space<vmem>>, vector<4x256xf32>
    %376 = vector.broadcast %67 : f32 to vector<4x256xf32>
    %377 = vector.broadcast %116 : f32 to vector<4x256xf32>
    %378 = arith.select %122, %376, %377 : vector<4x256xi1>, vector<4x256xf32>
    %379 = vector.shape_cast %320 : vector<256xf32> to vector<1x256xf32>
    %380 = vector.broadcast %379 : vector<1x256xf32> to vector<4x256xf32>
    %381 = arith.mulf %375, %380 : vector<4x256xf32>
    %382 = arith.mulf %381, %378 : vector<4x256xf32>
    %383 = arith.addf %374, %382 : vector<4x256xf32>
    %c4_83 = arith.constant 4 : index
    %c0_84 = arith.constant 0 : index
    %384 = vector.load %arg2[%c4_83, %c0_84] : memref<7x256xf32, #tpu.memory_space<vmem>>, vector<1x256xf32>
    %385 = vector.shape_cast %384 : vector<1x256xf32> to vector<256xf32>
    %c0_85 = arith.constant 0 : index
    %c4_86 = arith.constant 4 : index
    %386 = vector.load %arg5[%c0_85, %c4_86] : memref<4x384xf32, #tpu.memory_space<vmem>>, vector<4x256xf32>
    %387 = vector.broadcast %26 : f32 to vector<4x256xf32>
    %388 = vector.broadcast %75 : f32 to vector<4x256xf32>
    %389 = arith.select %122, %387, %388 : vector<4x256xi1>, vector<4x256xf32>
    %390 = vector.shape_cast %385 : vector<256xf32> to vector<1x256xf32>
    %391 = vector.broadcast %390 : vector<1x256xf32> to vector<4x256xf32>
    %392 = arith.mulf %386, %391 : vector<4x256xf32>
    %393 = arith.mulf %392, %389 : vector<4x256xf32>
    %394 = arith.addf %383, %393 : vector<4x256xf32>
    %c0_87 = arith.constant 0 : index
    %c20_88 = arith.constant 20 : index
    %395 = vector.load %arg5[%c0_87, %c20_88] : memref<4x384xf32, #tpu.memory_space<vmem>>, vector<4x256xf32>
    %396 = vector.broadcast %33 : f32 to vector<4x256xf32>
    %397 = vector.broadcast %82 : f32 to vector<4x256xf32>
    %398 = arith.select %122, %396, %397 : vector<4x256xi1>, vector<4x256xf32>
    %399 = vector.shape_cast %385 : vector<256xf32> to vector<1x256xf32>
    %400 = vector.broadcast %399 : vector<1x256xf32> to vector<4x256xf32>
    %401 = arith.mulf %395, %400 : vector<4x256xf32>
    %402 = arith.mulf %401, %398 : vector<4x256xf32>
    %403 = arith.addf %394, %402 : vector<4x256xf32>
    %c0_89 = arith.constant 0 : index
    %c36_90 = arith.constant 36 : index
    %404 = vector.load %arg5[%c0_89, %c36_90] : memref<4x384xf32, #tpu.memory_space<vmem>>, vector<4x256xf32>
    %405 = vector.broadcast %40 : f32 to vector<4x256xf32>
    %406 = vector.broadcast %89 : f32 to vector<4x256xf32>
    %407 = arith.select %122, %405, %406 : vector<4x256xi1>, vector<4x256xf32>
    %408 = vector.shape_cast %385 : vector<256xf32> to vector<1x256xf32>
    %409 = vector.broadcast %408 : vector<1x256xf32> to vector<4x256xf32>
    %410 = arith.mulf %404, %409 : vector<4x256xf32>
    %411 = arith.mulf %410, %407 : vector<4x256xf32>
    %412 = arith.addf %403, %411 : vector<4x256xf32>
    %c0_91 = arith.constant 0 : index
    %c52_92 = arith.constant 52 : index
    %413 = vector.load %arg5[%c0_91, %c52_92] : memref<4x384xf32, #tpu.memory_space<vmem>>, vector<4x256xf32>
    %414 = vector.broadcast %47 : f32 to vector<4x256xf32>
    %415 = vector.broadcast %96 : f32 to vector<4x256xf32>
    %416 = arith.select %122, %414, %415 : vector<4x256xi1>, vector<4x256xf32>
    %417 = vector.shape_cast %385 : vector<256xf32> to vector<1x256xf32>
    %418 = vector.broadcast %417 : vector<1x256xf32> to vector<4x256xf32>
    %419 = arith.mulf %413, %418 : vector<4x256xf32>
    %420 = arith.mulf %419, %416 : vector<4x256xf32>
    %421 = arith.addf %412, %420 : vector<4x256xf32>
    %c0_93 = arith.constant 0 : index
    %c68_94 = arith.constant 68 : index
    %422 = vector.load %arg5[%c0_93, %c68_94] : memref<4x384xf32, #tpu.memory_space<vmem>>, vector<4x256xf32>
    %423 = vector.broadcast %54 : f32 to vector<4x256xf32>
    %424 = vector.broadcast %103 : f32 to vector<4x256xf32>
    %425 = arith.select %122, %423, %424 : vector<4x256xi1>, vector<4x256xf32>
    %426 = vector.shape_cast %385 : vector<256xf32> to vector<1x256xf32>
    %427 = vector.broadcast %426 : vector<1x256xf32> to vector<4x256xf32>
    %428 = arith.mulf %422, %427 : vector<4x256xf32>
    %429 = arith.mulf %428, %425 : vector<4x256xf32>
    %430 = arith.addf %421, %429 : vector<4x256xf32>
    %c0_95 = arith.constant 0 : index
    %c84_96 = arith.constant 84 : index
    %431 = vector.load %arg5[%c0_95, %c84_96] : memref<4x384xf32, #tpu.memory_space<vmem>>, vector<4x256xf32>
    %432 = vector.broadcast %61 : f32 to vector<4x256xf32>
    %433 = vector.broadcast %110 : f32 to vector<4x256xf32>
    %434 = arith.select %122, %432, %433 : vector<4x256xi1>, vector<4x256xf32>
    %435 = vector.shape_cast %385 : vector<256xf32> to vector<1x256xf32>
    %436 = vector.broadcast %435 : vector<1x256xf32> to vector<4x256xf32>
    %437 = arith.mulf %431, %436 : vector<4x256xf32>
    %438 = arith.mulf %437, %434 : vector<4x256xf32>
    %439 = arith.addf %430, %438 : vector<4x256xf32>
    %c0_97 = arith.constant 0 : index
    %c100 = arith.constant 100 : index
    %440 = vector.load %arg5[%c0_97, %c100] : memref<4x384xf32, #tpu.memory_space<vmem>>, vector<4x256xf32>
    %441 = vector.broadcast %68 : f32 to vector<4x256xf32>
    %442 = vector.broadcast %117 : f32 to vector<4x256xf32>
    %443 = arith.select %122, %441, %442 : vector<4x256xi1>, vector<4x256xf32>
    %444 = vector.shape_cast %385 : vector<256xf32> to vector<1x256xf32>
    %445 = vector.broadcast %444 : vector<1x256xf32> to vector<4x256xf32>
    %446 = arith.mulf %440, %445 : vector<4x256xf32>
    %447 = arith.mulf %446, %443 : vector<4x256xf32>
    %448 = arith.addf %439, %447 : vector<4x256xf32>
    %c5_98 = arith.constant 5 : index
    %c0_99 = arith.constant 0 : index
    %449 = vector.load %arg2[%c5_98, %c0_99] : memref<7x256xf32, #tpu.memory_space<vmem>>, vector<1x256xf32>
    %450 = vector.shape_cast %449 : vector<1x256xf32> to vector<256xf32>
    %c0_100 = arith.constant 0 : index
    %c5_101 = arith.constant 5 : index
    %451 = vector.load %arg5[%c0_100, %c5_101] : memref<4x384xf32, #tpu.memory_space<vmem>>, vector<4x256xf32>
    %452 = vector.broadcast %27 : f32 to vector<4x256xf32>
    %453 = vector.broadcast %76 : f32 to vector<4x256xf32>
    %454 = arith.select %122, %452, %453 : vector<4x256xi1>, vector<4x256xf32>
    %455 = vector.shape_cast %450 : vector<256xf32> to vector<1x256xf32>
    %456 = vector.broadcast %455 : vector<1x256xf32> to vector<4x256xf32>
    %457 = arith.mulf %451, %456 : vector<4x256xf32>
    %458 = arith.mulf %457, %454 : vector<4x256xf32>
    %459 = arith.addf %448, %458 : vector<4x256xf32>
    %c0_102 = arith.constant 0 : index
    %c21_103 = arith.constant 21 : index
    %460 = vector.load %arg5[%c0_102, %c21_103] : memref<4x384xf32, #tpu.memory_space<vmem>>, vector<4x256xf32>
    %461 = vector.broadcast %34 : f32 to vector<4x256xf32>
    %462 = vector.broadcast %83 : f32 to vector<4x256xf32>
    %463 = arith.select %122, %461, %462 : vector<4x256xi1>, vector<4x256xf32>
    %464 = vector.shape_cast %450 : vector<256xf32> to vector<1x256xf32>
    %465 = vector.broadcast %464 : vector<1x256xf32> to vector<4x256xf32>
    %466 = arith.mulf %460, %465 : vector<4x256xf32>
    %467 = arith.mulf %466, %463 : vector<4x256xf32>
    %468 = arith.addf %459, %467 : vector<4x256xf32>
    %c0_104 = arith.constant 0 : index
    %c37_105 = arith.constant 37 : index
    %469 = vector.load %arg5[%c0_104, %c37_105] : memref<4x384xf32, #tpu.memory_space<vmem>>, vector<4x256xf32>
    %470 = vector.broadcast %41 : f32 to vector<4x256xf32>
    %471 = vector.broadcast %90 : f32 to vector<4x256xf32>
    %472 = arith.select %122, %470, %471 : vector<4x256xi1>, vector<4x256xf32>
    %473 = vector.shape_cast %450 : vector<256xf32> to vector<1x256xf32>
    %474 = vector.broadcast %473 : vector<1x256xf32> to vector<4x256xf32>
    %475 = arith.mulf %469, %474 : vector<4x256xf32>
    %476 = arith.mulf %475, %472 : vector<4x256xf32>
    %477 = arith.addf %468, %476 : vector<4x256xf32>
    %c0_106 = arith.constant 0 : index
    %c53_107 = arith.constant 53 : index
    %478 = vector.load %arg5[%c0_106, %c53_107] : memref<4x384xf32, #tpu.memory_space<vmem>>, vector<4x256xf32>
    %479 = vector.broadcast %48 : f32 to vector<4x256xf32>
    %480 = vector.broadcast %97 : f32 to vector<4x256xf32>
    %481 = arith.select %122, %479, %480 : vector<4x256xi1>, vector<4x256xf32>
    %482 = vector.shape_cast %450 : vector<256xf32> to vector<1x256xf32>
    %483 = vector.broadcast %482 : vector<1x256xf32> to vector<4x256xf32>
    %484 = arith.mulf %478, %483 : vector<4x256xf32>
    %485 = arith.mulf %484, %481 : vector<4x256xf32>
    %486 = arith.addf %477, %485 : vector<4x256xf32>
    %c0_108 = arith.constant 0 : index
    %c69_109 = arith.constant 69 : index
    %487 = vector.load %arg5[%c0_108, %c69_109] : memref<4x384xf32, #tpu.memory_space<vmem>>, vector<4x256xf32>
    %488 = vector.broadcast %55 : f32 to vector<4x256xf32>
    %489 = vector.broadcast %104 : f32 to vector<4x256xf32>
    %490 = arith.select %122, %488, %489 : vector<4x256xi1>, vector<4x256xf32>
    %491 = vector.shape_cast %450 : vector<256xf32> to vector<1x256xf32>
    %492 = vector.broadcast %491 : vector<1x256xf32> to vector<4x256xf32>
    %493 = arith.mulf %487, %492 : vector<4x256xf32>
    %494 = arith.mulf %493, %490 : vector<4x256xf32>
    %495 = arith.addf %486, %494 : vector<4x256xf32>
    %c0_110 = arith.constant 0 : index
    %c85_111 = arith.constant 85 : index
    %496 = vector.load %arg5[%c0_110, %c85_111] : memref<4x384xf32, #tpu.memory_space<vmem>>, vector<4x256xf32>
    %497 = vector.broadcast %62 : f32 to vector<4x256xf32>
    %498 = vector.broadcast %111 : f32 to vector<4x256xf32>
    %499 = arith.select %122, %497, %498 : vector<4x256xi1>, vector<4x256xf32>
    %500 = vector.shape_cast %450 : vector<256xf32> to vector<1x256xf32>
    %501 = vector.broadcast %500 : vector<1x256xf32> to vector<4x256xf32>
    %502 = arith.mulf %496, %501 : vector<4x256xf32>
    %503 = arith.mulf %502, %499 : vector<4x256xf32>
    %504 = arith.addf %495, %503 : vector<4x256xf32>
    %c0_112 = arith.constant 0 : index
    %c101 = arith.constant 101 : index
    %505 = vector.load %arg5[%c0_112, %c101] : memref<4x384xf32, #tpu.memory_space<vmem>>, vector<4x256xf32>
    %506 = vector.broadcast %69 : f32 to vector<4x256xf32>
    %507 = vector.broadcast %118 : f32 to vector<4x256xf32>
    %508 = arith.select %122, %506, %507 : vector<4x256xi1>, vector<4x256xf32>
    %509 = vector.shape_cast %450 : vector<256xf32> to vector<1x256xf32>
    %510 = vector.broadcast %509 : vector<1x256xf32> to vector<4x256xf32>
    %511 = arith.mulf %505, %510 : vector<4x256xf32>
    %512 = arith.mulf %511, %508 : vector<4x256xf32>
    %513 = arith.addf %504, %512 : vector<4x256xf32>
    %c6_113 = arith.constant 6 : index
    %c0_114 = arith.constant 0 : index
    %514 = vector.load %arg2[%c6_113, %c0_114] : memref<7x256xf32, #tpu.memory_space<vmem>>, vector<1x256xf32>
    %515 = vector.shape_cast %514 : vector<1x256xf32> to vector<256xf32>
    %c0_115 = arith.constant 0 : index
    %c6_116 = arith.constant 6 : index
    %516 = vector.load %arg5[%c0_115, %c6_116] : memref<4x384xf32, #tpu.memory_space<vmem>>, vector<4x256xf32>
    %517 = vector.broadcast %28 : f32 to vector<4x256xf32>
    %518 = vector.broadcast %77 : f32 to vector<4x256xf32>
    %519 = arith.select %122, %517, %518 : vector<4x256xi1>, vector<4x256xf32>
    %520 = vector.shape_cast %515 : vector<256xf32> to vector<1x256xf32>
    %521 = vector.broadcast %520 : vector<1x256xf32> to vector<4x256xf32>
    %522 = arith.mulf %516, %521 : vector<4x256xf32>
    %523 = arith.mulf %522, %519 : vector<4x256xf32>
    %524 = arith.addf %513, %523 : vector<4x256xf32>
    %c0_117 = arith.constant 0 : index
    %c22_118 = arith.constant 22 : index
    %525 = vector.load %arg5[%c0_117, %c22_118] : memref<4x384xf32, #tpu.memory_space<vmem>>, vector<4x256xf32>
    %526 = vector.broadcast %35 : f32 to vector<4x256xf32>
    %527 = vector.broadcast %84 : f32 to vector<4x256xf32>
    %528 = arith.select %122, %526, %527 : vector<4x256xi1>, vector<4x256xf32>
    %529 = vector.shape_cast %515 : vector<256xf32> to vector<1x256xf32>
    %530 = vector.broadcast %529 : vector<1x256xf32> to vector<4x256xf32>
    %531 = arith.mulf %525, %530 : vector<4x256xf32>
    %532 = arith.mulf %531, %528 : vector<4x256xf32>
    %533 = arith.addf %524, %532 : vector<4x256xf32>
    %c0_119 = arith.constant 0 : index
    %c38_120 = arith.constant 38 : index
    %534 = vector.load %arg5[%c0_119, %c38_120] : memref<4x384xf32, #tpu.memory_space<vmem>>, vector<4x256xf32>
    %535 = vector.broadcast %42 : f32 to vector<4x256xf32>
    %536 = vector.broadcast %91 : f32 to vector<4x256xf32>
    %537 = arith.select %122, %535, %536 : vector<4x256xi1>, vector<4x256xf32>
    %538 = vector.shape_cast %515 : vector<256xf32> to vector<1x256xf32>
    %539 = vector.broadcast %538 : vector<1x256xf32> to vector<4x256xf32>
    %540 = arith.mulf %534, %539 : vector<4x256xf32>
    %541 = arith.mulf %540, %537 : vector<4x256xf32>
    %542 = arith.addf %533, %541 : vector<4x256xf32>
    %c0_121 = arith.constant 0 : index
    %c54_122 = arith.constant 54 : index
    %543 = vector.load %arg5[%c0_121, %c54_122] : memref<4x384xf32, #tpu.memory_space<vmem>>, vector<4x256xf32>
    %544 = vector.broadcast %49 : f32 to vector<4x256xf32>
    %545 = vector.broadcast %98 : f32 to vector<4x256xf32>
    %546 = arith.select %122, %544, %545 : vector<4x256xi1>, vector<4x256xf32>
    %547 = vector.shape_cast %515 : vector<256xf32> to vector<1x256xf32>
    %548 = vector.broadcast %547 : vector<1x256xf32> to vector<4x256xf32>
    %549 = arith.mulf %543, %548 : vector<4x256xf32>
    %550 = arith.mulf %549, %546 : vector<4x256xf32>
    %551 = arith.addf %542, %550 : vector<4x256xf32>
    %c0_123 = arith.constant 0 : index
    %c70_124 = arith.constant 70 : index
    %552 = vector.load %arg5[%c0_123, %c70_124] : memref<4x384xf32, #tpu.memory_space<vmem>>, vector<4x256xf32>
    %553 = vector.broadcast %56 : f32 to vector<4x256xf32>
    %554 = vector.broadcast %105 : f32 to vector<4x256xf32>
    %555 = arith.select %122, %553, %554 : vector<4x256xi1>, vector<4x256xf32>
    %556 = vector.shape_cast %515 : vector<256xf32> to vector<1x256xf32>
    %557 = vector.broadcast %556 : vector<1x256xf32> to vector<4x256xf32>
    %558 = arith.mulf %552, %557 : vector<4x256xf32>
    %559 = arith.mulf %558, %555 : vector<4x256xf32>
    %560 = arith.addf %551, %559 : vector<4x256xf32>
    %c0_125 = arith.constant 0 : index
    %c86_126 = arith.constant 86 : index
    %561 = vector.load %arg5[%c0_125, %c86_126] : memref<4x384xf32, #tpu.memory_space<vmem>>, vector<4x256xf32>
    %562 = vector.broadcast %63 : f32 to vector<4x256xf32>
    %563 = vector.broadcast %112 : f32 to vector<4x256xf32>
    %564 = arith.select %122, %562, %563 : vector<4x256xi1>, vector<4x256xf32>
    %565 = vector.shape_cast %515 : vector<256xf32> to vector<1x256xf32>
    %566 = vector.broadcast %565 : vector<1x256xf32> to vector<4x256xf32>
    %567 = arith.mulf %561, %566 : vector<4x256xf32>
    %568 = arith.mulf %567, %564 : vector<4x256xf32>
    %569 = arith.addf %560, %568 : vector<4x256xf32>
    %c0_127 = arith.constant 0 : index
    %c102 = arith.constant 102 : index
    %570 = vector.load %arg5[%c0_127, %c102] : memref<4x384xf32, #tpu.memory_space<vmem>>, vector<4x256xf32>
    %571 = vector.broadcast %70 : f32 to vector<4x256xf32>
    %572 = vector.broadcast %119 : f32 to vector<4x256xf32>
    %573 = arith.select %122, %571, %572 : vector<4x256xi1>, vector<4x256xf32>
    %574 = vector.shape_cast %515 : vector<256xf32> to vector<1x256xf32>
    %575 = vector.broadcast %574 : vector<1x256xf32> to vector<4x256xf32>
    %576 = arith.mulf %570, %575 : vector<4x256xf32>
    %577 = arith.mulf %576, %573 : vector<4x256xf32>
    %578 = arith.addf %569, %577 : vector<4x256xf32>
    %c0_128 = arith.constant 0 : index
    %c0_129 = arith.constant 0 : index
    %579 = vector.load %arg5[%c0_128, %c0_129] : memref<4x384xf32, #tpu.memory_space<vmem>>, vector<4x256xf32>
    tpu.vector_store %arg5[%c0_128, %c0_129], %578 {strides = array<i32>} : memref<4x384xf32, #tpu.memory_space<vmem>>, vector<4x256xf32>,
    %c0_130 = arith.constant 0 : index
    %c0_131 = arith.constant 0 : index
    %580 = vector.load %arg5[%c0_130, %c0_131] : memref<4x384xf32, #tpu.memory_space<vmem>>, vector<2x256xf32>
    %c2_132 = arith.constant 2 : index
    %c0_133 = arith.constant 0 : index
    %581 = vector.load %arg5[%c2_132, %c0_133] : memref<4x384xf32, #tpu.memory_space<vmem>>, vector<2x256xf32>
    %582 = arith.addf %580, %581 : vector<2x256xf32>
    %cst_134 = arith.constant 0.000000e+00 : f32
    %583 = vector.broadcast %cst_134 : f32 to vector<2x256xf32>
    %584 = arith.subf %583, %582 : vector<2x256xf32>
    %585 = math.exp %584 : vector<2x256xf32>
    %cst_135 = arith.constant 1.000000e+00 : f32
    %586 = vector.broadcast %cst_135 : f32 to vector<2x256xf32>
    %587 = arith.addf %586, %585 : vector<2x256xf32>
    %588 = tpu.reciprocal %587 {approx = true} : vector<2x256xf32> -> vector<2x256xf32>
    %c0_136 = arith.constant 0 : index
    %c0_137 = arith.constant 0 : index
    %589 = vector.load %arg5[%c0_136, %c0_137] : memref<4x384xf32, #tpu.memory_space<vmem>>, vector<2x256xf32>
    tpu.vector_store %arg5[%c0_136, %c0_137], %588 {strides = array<i32>} : memref<4x384xf32, #tpu.memory_space<vmem>>, vector<2x256xf32>,
    %c0_138 = arith.constant 0 : index
    %c0_139 = arith.constant 0 : index
    %590 = vector.load %arg5[%c0_138, %c0_139] : memref<4x384xf32, #tpu.memory_space<vmem>>, vector<1x256xf32>
    %591 = vector.shape_cast %590 : vector<1x256xf32> to vector<256xf32>
    %c0_140 = arith.constant 0 : index
    %c0_141 = arith.constant 0 : index
    %c0_142 = arith.constant 0 : index
    %592 = vector.load %arg4[%c0_140, %c0_141, %c0_142] : memref<2x1x256xf32, #tpu.memory_space<vmem>>, vector<1x1x256xf32>
    %593 = vector.shape_cast %592 : vector<1x1x256xf32> to vector<256xf32>
    %594 = vector.shape_cast %591 : vector<256xf32> to vector<1x1x256xf32>
    tpu.vector_store %arg4[%c0_140, %c0_141, %c0_142], %594 {strides = array<i32>} : memref<2x1x256xf32, #tpu.memory_space<vmem>>, vector<1x1x256xf32>,
    %c1_143 = arith.constant 1 : index
    %c0_144 = arith.constant 0 : index
    %595 = vector.load %arg5[%c1_143, %c0_144] : memref<4x384xf32, #tpu.memory_space<vmem>>, vector<1x256xf32>
    %596 = vector.shape_cast %595 : vector<1x256xf32> to vector<256xf32>
    %c1_145 = arith.constant 1 : index
    %c0_146 = arith.constant 0 : index
    %c0_147 = arith.constant 0 : index
    %597 = vector.load %arg4[%c1_145, %c0_146, %c0_147] : memref<2x1x256xf32, #tpu.memory_space<vmem>>, vector<1x1x256xf32>
    %598 = vector.shape_cast %597 : vector<1x1x256xf32> to vector<256xf32>
    %599 = vector.shape_cast %596 : vector<256xf32> to vector<1x1x256xf32>
    tpu.vector_store %arg4[%c1_145, %c0_146, %c0_147], %599 {strides = array<i32>} : memref<2x1x256xf32, #tpu.memory_space<vmem>>, vector<1x1x256xf32>,
    return
  }
  func.func @transform_0(%arg0: i32) -> i32 {
    %c0_i32 = arith.constant 0 : i32
    %c0_i32_0 = arith.constant 0 : i32
    return %c0_i32 : i32
  }
  func.func @transform_1(%arg0: i32) -> (i32, i32) {
    %c0_i32 = arith.constant 0 : i32
    %c0_i32_0 = arith.constant 0 : i32
    %c0_i32_1 = arith.constant 0 : i32
    return %c0_i32, %c0_i32_0 : i32, i32
  }
  func.func @transform_2(%arg0: i32) -> (i32, i32, i32) {
    %c0_i32 = arith.constant 0 : i32
    %c0_i32_0 = arith.constant 0 : i32
    %c0_i32_1 = arith.constant 0 : i32
    return %arg0, %c0_i32, %c0_i32_0 : i32, i32, i32
  }
  func.func @transform_3(%arg0: i32) -> (i32, i32, i32) {
    %c0_i32 = arith.constant 0 : i32
    %c0_i32_0 = arith.constant 0 : i32
    %c0_i32_1 = arith.constant 0 : i32
    return %arg0, %c0_i32, %c0_i32_0 : i32, i32, i32
  }
}

</mosaic_0001>

<bundles_post_ra>
// kernel: tpu_custom_call.1
= control target key start
LH: loop header
LB: loop body
LE: loop exit
PB: predicated region body
PF: predicated region fallthrough
CT: control target
= control target key end

     0   :  { %8 = vsyncpa [#allocation6], 0  ;;  %s3696_s0 = inlined_call_operand.hbm [shape: f32[98], index: 0, kind: input, shape index: {}]   ;;  %s3697_s1 = inlined_call_operand.hbm [shape: f32[7,256], index: 1, kind: input, shape index: {}]   ;;  %s3698_s2 = inlined_call_operand.hbm [shape: f32[2,4,256], index: 2, kind: input, shape index: {}]   ;;  %s3699_s3 = inlined_call_operand.hbm [shape: f32[2,1,256], index: 3, kind: output, shape index: {}]  }
   0x1   :  { %9 = vsyncpa [#allocation4], 0 }
   0x2   :  { %10 = vsyncpa [#allocation9], 0 }
   0x3   :  { %11 = vsyncpa [#allocation5], 0  ;;  %s2393_s14 = scalar_lea.hbm %s3696_s0, 16 }
   0x4   :  { %p2394_p0 = scmp.ne.s32.totalorder %s3696_s0, %s2393_s14  ;;  %p2397_p1 = scmp.lt.u32.totalorder %s2393_s14, %s3696_s0 }
   0x6   :  { %p2399_p2 = pnand %p2397_p1, %p2394_p0 }
   0x8   :  { %2402 = shalt.err (!%p2399_p2)
}
   0x9   :  { %s2477_s19 = smov [#allocation3]   ;;  %s2478_s22 = smov [#allocation7]  }
   0xa   :  { %19 = dma.hbm_to_smem %s3696_s0, 16, %s2477_s19, [#allocation6]  }
   0xb   :  { %s26_s23 = sshll.u32 %s2478_s22, 4  ;;  %s2479_s24 = smov [#allocation8]   ;;  %s27_s23 = int_to_ptr.vmem [resolvable:$true] %s26_s23 }
   0xc   :  { %s35_s25 = sshll.u32 %s2479_s24, 4  ;;  %s2403_s28 = scalar_lea.hbm %s3697_s1, 256  ;;  %s36_s25 = int_to_ptr.vmem [resolvable:$true] %s35_s25 }
   0xd   :  { %p2404_p3 = scmp.ne.s32.totalorder %s3697_s1, %s2403_s28  ;;  %p2407_p4 = scmp.lt.u32.totalorder %s2403_s28, %s3697_s1 }
   0xf   :  { %p2409_p5 = pnand %p2407_p4, %p2404_p3 }
  0x11   :  { %2412 = shalt.err (!%p2409_p5)
}
  0x12   :  { %s2413_s0 = scalar_lea.vmem %s27_s23, 256  ;;  %p2418_p7 = scmp.lt.s32.totalorder %s27_s23, %s27_s23 }
  0x13   :  { %p2414_p6 = scmp.ne.s32.totalorder %s27_s23, %s2413_s0  ;;  %p2419_p8 = scmp.lt.s32.totalorder %s2413_s0, %s2413_s0 }
  0x15   :  { %p2420_p9 = por %p2419_p8, %p2418_p7 }
  0x17   :  { %p2421_p10 = pnand %p2420_p9, %p2414_p6 }
  0x19   :  { %2424 = shalt.err (!%p2421_p10)
}
  0x1a   :  { %29 = dma.hbm_to_vmem [thread:$0]  %s3697_s1, 256, %s27_s23, [#allocation4]  }
  0x1b   :  { %s2425_s10 = scalar_lea.hbm %s3698_s2, 256 }
  0x1c   :  { %p2426_p11 = scmp.ne.s32.totalorder %s3698_s2, %s2425_s10  ;;  %p2429_p12 = scmp.lt.u32.totalorder %s2425_s10, %s3698_s2 }
  0x1e   :  { %p2431_p13 = pnand %p2429_p12, %p2426_p11 }
  0x20   :  { %2434 = shalt.err (!%p2431_p13)
}
  0x21   :  { %s2435_s15 = scalar_lea.vmem %s36_s25, 256  ;;  %p2440_p1 = scmp.lt.s32.totalorder %s36_s25, %s36_s25 }
  0x22   :  { %p2436_p0 = scmp.ne.s32.totalorder %s36_s25, %s2435_s15  ;;  %p2441_p2 = scmp.lt.s32.totalorder %s2435_s15, %s2435_s15 }
  0x24   :  { %p2442_p3 = por %p2441_p2, %p2440_p1 }
  0x26   :  { %p2443_p4 = pnand %p2442_p3, %p2436_p0 }
  0x28   :  { %2446 = shalt.err (!%p2443_p4)
}
  0x29   :  { %s2480_s1 = smov 128   ;;  %s2481_s16 = smov 8  }
  0x2a   :  { %41 = dma.hbm_to_vmem [thread:$0]  %s3698_s2, 256, %s36_s25, [#allocation9], %s2480_s1, %s2480_s1, %s2481_s16  }
  0x2b   :  { %2469 = dma.done.wait [#allocation6], 16  }
  0x2c   :  { %2470 = vsyncadd [#allocation6], 4294967280 }
  0x2d   :  { %2471 = dma.done.wait [#allocation4], 256  }
  0x2e   :  { %2472 = vsyncadd [#allocation4], 4294967040 }
  0x2f   :  { %2473 = dma.done.wait [#allocation9], 256  }
  0x30   :  { %2474 = vsyncadd [#allocation9], 4294967040 }
  0x31   :  { %51 = sfence }
  0x32   :  { %v79_v0 = vlaneseq  ;;  %v321_v1 = vld [vmem:[#allocation7] ss:$8 sm:$0x3]  ;;  %vm58_vm0 = vcmask 1043456   ;;  %v140_v3 = vld [vmem:[#allocation8 + $0x8] sm:$0xff]  ;;  %v54_v9 = vld [vmem:[#allocation8] sm:$0xff] }
  0x33   :  { %v2636_v4 = vld [vmem:[#allocation7 + $0x1] ss:$8 sm:$0x3]  ;;  %v2482_v5 = vmov 1966171168   ;;  %v142_v7 = vcombine.high %v140_v3, %v140_v3  ;;  %v144_v8 = vsel %vm58_vm0, %v140_v3, 0.0  ;;  %v56_v15 = vcombine.high %v54_v9, %v54_v9 }
  0x34   :  { %v2634_v2 = vshrl.u32 %v79_v0, 7  ;;  %v77_v6 = vunpack.c.l.s4 %v2482_v5  ;;  %v145_v12 = vrot.slane %v144_v8, 4  ;;  %v59_v22 = vsel %vm58_vm0, %v54_v9, 0.0  ;;  %s2483_s2 = smov 32   ;;  %s2484_s19 = smov 16  }
  0x35   :  { %v151_v14 = vsel %vm58_vm0, %v142_v7, 0.0  ;;  %v60_v25 = vrot.slane %v59_v22, 4  ;;  %v66_v26 = vsel %vm58_vm0, %v56_v15, 0.0  ;;  %v182_v30 = vsel %vm58_vm0, %v140_v3, -inf  ;;  %s2485_s20 = smov 64   ;;  %s2486_s21 = smov 48  }
  0x36   :  { %v2640_v10 = vsub.s32 0, %v2634_v2  ;;  %v2643_v11 = vsub.s32 1, %v2634_v2  ;;  %v78_v13 = vunpack.c.0.s8 %v77_v6  ;;  %v146_v20 = vadd.f32 %v145_v12, %v144_v8  ;;  %s2487_s22 = smov 96   ;;  %s2488_s23 = smov 80  }
  0x37   :  { %v152_v21 = vrot.slane %v151_v14, 4  ;;  %v67_v29 = vrot.slane %v66_v26, 4  ;;  %v61_v31 = vadd.f32 %v60_v25, %v59_v22  ;;  %v183_v32 = vrot.slane %v182_v30, 4  ;;  %s2489_s24 = smov 17   ;;  %s2490_s25 = smov 1  }
  0x38   :  { %v330_v16 = vrot.slane %v321_v1, %v2640_v10  ;;  %v334_v17 = vrot.slane %v321_v1, %v2643_v11  ;;  %v571_v18 = vrot.slane %v2636_v4, %v2640_v10  ;;  %v575_v19 = vrot.slane %v2636_v4, %v2643_v11  ;;  %s2491_s26 = smov 51   ;;  %s2493_s27 = smov 49  }
  0x39   :  { %v2656_v24 = vsub.s32 %v78_v13, %v2634_v2  ;;  %v147_v27 = vrot.slane %v146_v20, 2  ;;  %v153_v28 = vadd.f32 %v152_v21, %v151_v14  ;;  %v189_v33 = vsel %vm58_vm0, %v142_v7, -inf  ;;  %s2494_s28 = smov 33   ;;  %s2495_s29 = smov 81  }
  0x3a   :  { %v2653_v23 = vcombine.low %v330_v16, %v334_v17  ;;  %v101_v34 = vsel %vm58_vm0, %v54_v9, -inf  ;;  %v68_v37 = vadd.f32 %v67_v29, %v66_v26  ;;  %v190_v38 = vrot.slane %v189_v33, 4  ;;  %v1618_v16 = vld [vmem:[#allocation7 + $0x5] ss:$8 sm:$0x3]  ;;  %s2496_s30 = smov 65  }
  0x3b   :  { %v148_v35 = vadd.f32 %v147_v27, %v146_v20  ;;  %v154_v36 = vrot.slane %v153_v28, 2  ;;  %v62_v39 = vrot.slane %v61_v31, 2  ;;  %v184_v40 = vmax.f32 %v182_v30, %v183_v32  ;;  %s2497_s4 = smov 2   ;;  %s2498_s5 = smov 97  }
  0x3c   :  { %390 = vrot.lane.b32.xlu1 %v2653_v23, %s2483_s2  ;;  %354 = vrot.lane.b32.xlu0 %v2653_v23, %s2484_s19  ;;  %v102_v41 = vrot.slane %v101_v34, 4  ;;  %v108_v42 = vsel %vm58_vm0, %v56_v15, -inf  ;;  %v69_v45 = vrot.slane %v68_v37, 2  ;;  %v191_v46 = vmax.f32 %v189_v33, %v190_v38  ;;  %v827_v38 = vld [vmem:[#allocation7 + $0x2] ss:$8 sm:$0x3] }
  0x3d   :  { %v149_v43 = vrot.slane %v148_v35, 1  ;;  %v155_v44 = vadd.f32 %v154_v36, %v153_v28  ;;  %v63_v47 = vadd.f32 %v62_v39, %v61_v31  ;;  %v185_v48 = vrot.slane %v184_v40, 2  ;;  %s2499_s0 = smov 34   ;;  %s2500_s6 = smov 18  }
  0x3e   :  { %v103_v49 = vmax.f32 %v101_v34, %v102_v41  ;;  %v109_v50 = vrot.slane %v108_v42, 4  ;;  %v70_v53 = vadd.f32 %v69_v45, %v68_v37  ;;  %v192_v54 = vrot.slane %v191_v46, 2  ;;  %s2501_s7 = smov 66   ;;  %s2502_s8 = smov 50  }
  0x3f   :  { %v150_v51 = vadd.f32 %v149_v43, %v148_v35  ;;  %v156_v52 = vrot.slane %v155_v44, 1  ;;  %v64_v55 = vrot.slane %v63_v47, 1  ;;  %v186_v56 = vmax.f32 %v184_v40, %v185_v48  ;;  %s2503_s9 = smov 98   ;;  %s2504_s10 = smov 82  }
  0x40   :  { %462 = vrot.lane.b32.xlu1 %v2653_v23, %s2485_s20  ;;  %426 = vrot.lane.b32.xlu0 %v2653_v23, %s2486_s21  ;;  %v104_v57 = vrot.slane %v103_v49, 2  ;;  %v110_v58 = vmax.f32 %v108_v42, %v109_v50  ;;  %v2670_v59 = vcombine.low %v571_v18, %v575_v19  ;;  %v71_v61 = vrot.slane %v70_v53, 1  ;;  %v1882_v19 = vld [vmem:[#allocation7 + $0x6] ss:$8 sm:$0x3]  ;;  %s2505_s11 = smov 19  }
  0x41   :  { %v157_v60 = vadd.f32 %v156_v52, %v155_v44  ;;  %v193_v62 = vmax.f32 %v191_v46, %v192_v54  ;;  %v65_v63 = vadd.f32 %v64_v55, %v63_v47  ;;  %v187_v1 = vrot.slane %v186_v56, 1  ;;  %v1091_v42 = vld [vmem:[#allocation7 + $0x3] ss:$8 sm:$0x3]  ;;  %s2506_s12 = smov 3   ;;  %s2507_s13 = smov 35  }
  0x42   :  { %v105_v3 = vmax.f32 %v103_v49, %v104_v57  ;;  %v111_v4 = vrot.slane %v110_v58, 2  ;;  %v72_v6 = vadd.f32 %v71_v61, %v70_v53  ;;  %v1626_v26 = vrot.slane %v1618_v16, %v2640_v10  ;;  %v1354_v46 = vld [vmem:[#allocation7 + $0x4] ss:$8 sm:$0x3]  ;;  %s2508_s14 = smov 83   ;;  %s2509_s15 = smov 67  }
  0x43   :  { %v160_v5 = vcombine.low %v150_v51, %v157_v60  ;;  %v194_v7 = vrot.slane %v193_v62, 1  ;;  %v188_v8 = vmax.f32 %v186_v56, %v187_v1  ;;  %v1630_v27 = vrot.slane %v1618_v16, %v2643_v11  ;;  %s2510_s1 = smov 4   ;;  %s2511_s16 = smov 99  }
  0x44   :  { %531 = vrot.lane.b32.xlu1 %v2653_v23, %s2487_s22  ;;  %497 = vrot.lane.b32.xlu0 %v2653_v23, %s2488_s23  ;;  %v106_v9 = vrot.slane %v105_v3, 1  ;;  %v112_v12 = vmax.f32 %v110_v58, %v111_v4  ;;  %v75_v14 = vcombine.low %v65_v63, %v72_v6  ;;  %v1890_v30 = vrot.slane %v1882_v19, %v2640_v10  ;;  %s2512_s17 = smov 36   ;;  %s2513_s18 = smov 20  }
  0x45   :  { %v167_v13 = vrot.slane %v160_v5, %v2656_v24  ;;  %v195_v15 = vmax.f32 %v193_v62, %v194_v7  ;;  %v2687_v32 = vcombine.low %v1626_v26, %v1630_v27  ;;  %v1894_v33 = vrot.slane %v1882_v19, %v2643_v11  ;;  %s2514_s19 = smov 68  }
  0x46   :  { %v107_v17 = vmax.f32 %v105_v3, %v106_v9  ;;  %v113_v18 = vrot.slane %v112_v12, 1  ;;  %v82_v21 = vrot.slane %v75_v14, %v2656_v24  ;;  %v2492_v39 = vmov 0.0  }
  0x47   :  { %v174_v20 = vrot.slane %v167_v13, %v2656_v24  ;;  %v198_v22 = vcombine.low %v188_v8, %v195_v15  ;;  %v2693_v36 = vcombine.low %v1890_v30, %v1894_v33  ;;  %52 = vst [vmem:[#allocation2] sm:$0xff] %v2492_v39  ;;  %53 = vst [vmem:[#allocation2 + $0x8] sm:$0xf] %v2492_v39  ;;  %vm97_vm1 = vcmp.ge.s32.totalorder %v79_v0, 51 }
  0x48   :  { %613 = vrot.lane.b32.xlu1 %v2670_v59, %s2489_s24  ;;  %577 = vrot.lane.b32.xlu0 %v2670_v59, %s2490_s25  ;;  %v114_v25 = vmax.f32 %v112_v12, %v113_v18  ;;  %v89_v28 = vrot.slane %v82_v21, %v2656_v24  ;;  %v835_v40 = vrot.slane %v827_v38, %v2640_v10  ;;  %s2515_s24 = smov 52   ;;  %s2516_s25 = smov 100   ;;  %vm98_vm2 = vcmp.lt.s32.totalorder %v79_v0, 307 }
  0x49   :  { %v205_v29 = vrot.slane %v198_v22, %v2656_v24  ;;  %v839_v41 = vrot.slane %v827_v38, %v2643_v11  ;;  %v1099_v43 = vrot.slane %v1091_v42, %v2640_v10  ;;  %v1103_v44 = vrot.slane %v1091_v42, %v2643_v11  ;;  %vm2739_vm4 = vmand %vm97_vm1, %vm98_vm2 }
  0x4a   :  { %v117_v31 = vcombine.low %v107_v17, %v114_v25  ;;  %v1362_v47 = vrot.slane %v1354_v46, %v2640_v10  ;;  %v1366_v48 = vrot.slane %v1354_v46, %v2643_v11  ;;  %vm93_vm3 = vcmask 416768  }
  0x4b   :  { %v212_v34 = vrot.slane %v205_v29, %v2656_v24  ;;  %v1104_v45 = vcombine.low %v1099_v43, %v1103_v44  ;;  %v2530_v6 = vmov 839922192   ;;  %vm320_vm5 = vcmp.lt.s32.totalorder %v2634_v2, 2 }
  0x4c   :  { %175 = vrot.lane.b32.xlu1 %v174_v20, %s2491_s26  ;;  %90 = vrot.lane.b32.xlu0 %v89_v28, %s2491_s26  ;;  %v124_v35 = vrot.slane %v117_v31, %v2656_v24  ;;  %v1367_v49 = vcombine.low %v1362_v47, %v1366_v48  ;;  %v340_v7 = vunpack.c.l.s4 %v2530_v6  ;;  %vm357_vm6 = vcmask 130048  }
  0x4d   :  { %vm393_vm7 = vcmask 261120   ;;  %vm429_vm8 = vcmask 392192   ;;  %vm465_vm9 = vcmask 523264   ;;  %vm455_vm10 = vcmask 654336  }
  0x4e   :  { %v131_v37 = vrot.slane %v124_v35, %v2656_v24  ;;  %v840_v24 = vcombine.low %v835_v40, %v839_v41  ;;  %v341_v9 = vunpack.c.0.s8 %v340_v7  ;;  %vm419_vm11 = vcmask 785408  }
  0x4f   :  { %vm580_vm12 = vcmask 7168   ;;  %vm616_vm13 = vcmask 138240   ;;  %vm652_vm14 = vcmask 269312   ;;  %vm688_vm15 = vcmask 400384  }
  0x50   :  { %213 = vrot.lane.b32.xlu1 %v212_v34, %s2491_s26  ;;  %132 = vrot.lane.b32.xlu0 %v131_v37, %s2491_s26  ;;  %v2759_v15 = vsub.s32 %v341_v9, %v2634_v2  ;;  %vm724_vm1 = vcmask 531456   ;;  %vm760_vm2 = vcmask 662528  }
  0x54   :  { %685 = vrot.lane.b32.xlu1 %v2670_v59, %s2493_s27  ;;  %649 = vrot.lane.b32.xlu0 %v2670_v59, %s2494_s28  ;;  %s2518_s27 = smov 21   ;;  %s2519_s28 = smov 5  }
  0x58   :  { %757 = vrot.lane.b32.xlu1 %v2670_v59, %s2495_s29  ;;  %721 = vrot.lane.b32.xlu0 %v2670_v59, %s2496_s30  ;;  %s2520_s29 = smov 53   ;;  %s2521_s30 = smov 37  }
  0x5c   :  { %841 = vrot.lane.b32.xlu1 %v840_v24, %s2497_s4  ;;  %793 = vrot.lane.b32.xlu0 %v2670_v59, %s2498_s5  ;;  %s2522_s5 = smov 85  }
  0x60   :  { %913 = vrot.lane.b32.xlu1 %v840_v24, %s2499_s0  ;;  %877 = vrot.lane.b32.xlu0 %v840_v24, %s2500_s6  ;;  %s2523_s0 = smov 69   ;;  %s2524_s6 = smov 6  }
  0x64   :  { %985 = vrot.lane.b32.xlu1 %v840_v24, %s2501_s7  ;;  %949 = vrot.lane.b32.xlu0 %v840_v24, %s2502_s8  ;;  %s2525_s7 = smov 101   ;;  %s2526_s8 = smov 38  }
  0x68   :  { %1057 = vrot.lane.b32.xlu1 %v840_v24, %s2503_s9  ;;  %1021 = vrot.lane.b32.xlu0 %v840_v24, %s2504_s10  ;;  %s2527_s9 = smov 22   ;;  %s2528_s10 = smov 70  }
  0x6c   :  { %1141 = vrot.lane.b32.xlu1 %v1104_v45, %s2505_s11  ;;  %1105 = vrot.lane.b32.xlu0 %v1104_v45, %s2506_s12  ;;  %s2529_s11 = smov 54   ;;  %s2193_s12 = sld [smem:[#allocation3 + $0x7]] }
  0x70   :  { %1213 = vrot.lane.b32.xlu1 %v1104_v45, %s2491_s26  ;;  %1177 = vrot.lane.b32.xlu0 %v1104_v45, %s2507_s13  ;;  %s2517_s26 = smov 84   ;;  %s2242_s13 = sld [smem:[#allocation3 + $0x38]] }
  0x72   :  { %v351_v12 = vstv %s2193_s12  ;;  %s2922_s12 = sld [smem:[#allocation3 + $0x5c]] }
  0x74   :  { %1284 = vrot.lane.b32.xlu1 %v1104_v45, %s2508_s14  ;;  %1248 = vrot.lane.b32.xlu0 %v1104_v45, %s2509_s15  ;;  %s2200_s14 = sld [smem:[#allocation3 + $0xe]]  ;;  %s2249_s15 = sld [smem:[#allocation3 + $0x3f]] }
  0x76   :  { %v352_v13 = vstv %s2242_s13  ;;  %s2534_s13 = smov 95  }
  0x77   :  { %v353_v18 = vsel %vm320_vm5, %v351_v12, %v352_v13 }
  0x78   :  { %1368 = vrot.lane.b32.xlu1 %v1367_v49, %s2510_s1  ;;  %1320 = vrot.lane.b32.xlu0 %v1104_v45, %s2511_s16  ;;  %s2756_s1 = sld [smem:[#allocation3 + $0x15]]  ;;  %s2256_s16 = sld [smem:[#allocation3 + $0x46]]  ;;  %v370_v27 = vrot.slane %v353_v18, %v2759_v15 }
  0x7a   :  { %v387_v19 = vstv %s2200_s14  ;;  %v388_v20 = vstv %s2249_s15  ;;  %s2935_s14 = sld [smem:[#allocation3 + $0x2]]  ;;  %s2937_s15 = sld [smem:[#allocation3 + $0x33]] }
  0x7b   :  { %v389_v28 = vsel %vm320_vm5, %v387_v19, %v388_v20 }
  0x7c   :  { %1440 = vrot.lane.b32.xlu1 %v1367_v49, %s2512_s17  ;;  %1404 = vrot.lane.b32.xlu0 %v1367_v49, %s2513_s18  ;;  %s2767_s17 = sld [smem:[#allocation3 + $0x1c]]  ;;  %s2769_s18 = sld [smem:[#allocation3 + $0x4d]] }
  0x7e   :  { %v423_v29 = vstv %s2756_s1  ;;  %v424_v30 = vstv %s2256_s16  ;;  %s2535_s1 = smov 79   ;;  %s2950_s16 = sld [smem:[#allocation3 + $0x9]] }
  0x7f   :  { %v425_v39 = vsel %vm320_vm5, %v423_v29, %v424_v30 }
  0x80   :  { %1512 = vrot.lane.b32.xlu1 %v1367_v49, %s2514_s19  ;;  %1476 = vrot.lane.b32.xlu0 %v1367_v49, %s2515_s24  ;;  %s2778_s19 = sld [smem:[#allocation3 + $0x23]]  ;;  %s2780_s24 = sld [smem:[#allocation3 + $0x54]]  ;;  %v442_v46 = vrot.slane %v425_v39, %v2759_v15 }
  0x82   :  { %v459_v40 = vstv %s2767_s17  ;;  %v460_v41 = vstv %s2769_s18  ;;  %s2952_s17 = sld [smem:[#allocation3 + $0x3a]]  ;;  %s2536_s18 = smov 63  }
  0x84   :  { %1584 = vrot.lane.b32.xlu1 %v1367_v49, %s2516_s25  ;;  %1548 = vrot.lane.b32.xlu0 %v1367_v49, %s2517_s26  ;;  %s2531_s25 = smov 112   ;;  %s2792_s26 = sld [smem:[#allocation3 + $0x2a]] }
  0x88   :  { %1668 = vrot.lane.b32.xlu1 %v2687_v32, %s2518_s27  ;;  %1632 = vrot.lane.b32.xlu0 %v2687_v32, %s2519_s28  ;;  %s2794_s27 = sld [smem:[#allocation3 + $0x5b]]  ;;  %s2811_s28 = sld [smem:[#allocation3 + $0x1]] }
  0x8c   :  { %1740 = vrot.lane.b32.xlu1 %v2687_v32, %s2520_s29  ;;  %1704 = vrot.lane.b32.xlu0 %v2687_v32, %s2521_s30  ;;  %s2813_s29 = sld [smem:[#allocation3 + $0x32]]  ;;  %s2831_s30 = sld [smem:[#allocation3 + $0x39]] }
  0x8e   :  { %v564_v18 = vstv %s2811_s28  ;;  %s2538_s28 = smov 31  }
  0x90   :  { %1812 = vrot.lane.b32.xlu1 %v2687_v32, %s2522_s5  ;;  %1776 = vrot.lane.b32.xlu0 %v2687_v32, %s2523_s0  ;;  %s2849_s5 = sld [smem:[#allocation3 + $0x40]]  ;;  %s2869_s0 = sld [smem:[#allocation3 + $0x47]] }
  0x92   :  { %v565_v19 = vstv %s2813_s29  ;;  %s2998_s29 = sld [smem:[#allocation3 + $0x1e]] }
  0x94   :  { %1896 = vrot.lane.b32.xlu1 %v2693_v36, %s2524_s6  ;;  %1848 = vrot.lane.b32.xlu0 %v2687_v32, %s2525_s7  ;;  %v406_v32 = vrot.slane %v389_v28, %v2759_v15  ;;  %s2887_s6 = sld [smem:[#allocation3 + $0x4e]]  ;;  %s2532_s7 = smov 127  }
  0x98   :  { %1968 = vrot.lane.b32.xlu1 %v2693_v36, %s2526_s8  ;;  %1932 = vrot.lane.b32.xlu0 %v2693_v36, %s2527_s9  ;;  %s2903_s8 = sld [smem:[#allocation3 + $0x24]]  ;;  %s2905_s9 = sld [smem:[#allocation3 + $0x55]] }
  0x9c   :  { %2040 = vrot.lane.b32.xlu1 %v2693_v36, %s2528_s10  ;;  %2004 = vrot.lane.b32.xlu0 %v2693_v36, %s2529_s11  ;;  %s2533_s10 = smov 111   ;;  %s2920_s11 = sld [smem:[#allocation3 + $0x2b]] }
  0xae   :  { %v2723_v10 = vpop.permute.xlu1 %390  ;;  %v355_v11 = vpop.permute.xlu0 %354 }
  0xaf   :  { %v356_v14 = vrot.slane %v355_v11, 4  ;;  %v392_v21 = vrot.slane %v2723_v10, 4 }
  0xb1   :  { %v358_v22 = vsel %vm357_vm6, %v356_v14, %v355_v11  ;;  %v394_v31 = vsel %vm393_vm7, %v392_v21, %v2723_v10  ;;  %v461_v10 = vsel %vm320_vm5, %v459_v40, %v460_v41  ;;  %v494_v11 = vstv %s2778_s19  ;;  %s2969_s19 = sld [smem:[#allocation3 + $0x10]] }
  0xb2   :  { %v2725_v50 = vpop.permute.xlu1 %462  ;;  %v2727_v51 = vpop.permute.xlu0 %426  ;;  %vm844_vm6 = vcmask 15360  }
  0xb3   :  { %v428_v33 = vrot.slane %v2727_v51, 4  ;;  %v464_v24 = vrot.slane %v2725_v50, 4 }
  0xb5   :  { %v430_v42 = vsel %vm429_vm8, %v428_v33, %v2727_v51  ;;  %v495_v51 = vstv %s2780_s24  ;;  %s2971_s24 = sld [smem:[#allocation3 + $0x41]] }
  0xb6   :  { %v2729_v52 = vpop.permute.xlu1 %531  ;;  %v2731_v53 = vpop.permute.xlu0 %497 }
  0xb7   :  { %v499_v57 = vrot.slane %v2731_v53, 4 }
  0xb9   :  { %v500_v6 = vsel %vm455_vm10, %v499_v57, %v2731_v53 }
  0xba   :  { %v2733_v54 = vpop.permute.xlu1 %613  ;;  %v2735_v55 = vpop.permute.xlu0 %577 }
  0xbb   :  { %v579_v20 = vrot.slane %v2735_v55, 4 }
  0xbe   :  { %v176_v56 = vpop.permute.xlu1 %175  ;;  %v91_v59 = vpop.permute.xlu0 %90 }
  0xbf   :  { %v177_v58 = vrot.slane %v176_v56, 7  ;;  %v92_v60 = vrot.slane %v91_v59, 7 }
  0xc1   :  { %v178_v61 = vsel %vm93_vm3, %v177_v58, %v176_v56  ;;  %v94_v62 = vsel %vm93_vm3, %v92_v60, %v91_v59  ;;  %v466_v56 = vsel %vm465_vm9, %v464_v24, %v2725_v50  ;;  %v478_v60 = vrot.slane %v461_v10, %v2759_v15 }
  0xc2   :  { %181 = vst.msk [vmem:[#allocation2 + $0x1] ss:$4 sm:$0x7] %vm2739_vm4, %v178_v61  ;;  %v214_v63 = vpop.permute.xlu1 %213  ;;  %100 = vst.msk [vmem:[#allocation2] ss:$4 sm:$0x7] %vm2739_vm4, %v94_v62  ;;  %v133_v3 = vpop.permute.xlu0 %132  ;;  %v528_v50 = vstv %s2792_s26 }
  0xc3   :  { %v215_v1 = vrot.slane %v214_v63, 7  ;;  %v134_v5 = vrot.slane %v133_v3, 7  ;;  %s2986_s26 = sld [smem:[#allocation3 + $0x17]] }
  0xc5   :  { %v216_v4 = vsel %vm93_vm3, %v215_v1, %v214_v63  ;;  %v135_v8 = vsel %vm93_vm3, %v134_v5, %v133_v3  ;;  %v496_v63 = vsel %vm320_vm5, %v494_v11, %v495_v51  ;;  %v529_v3 = vstv %s2794_s27  ;;  %s2988_s27 = sld [smem:[#allocation3 + $0x48]] }
  0xc6   :  { %219 = vst.msk [vmem:[#allocation2 + $0x3] ss:$4 sm:$0x7] %vm2739_vm4, %v216_v4  ;;  %138 = vst.msk [vmem:[#allocation2 + $0x2] ss:$4 sm:$0x7] %vm2739_vm4, %v135_v8  ;;  %v2800_v44 = vpop.permute.xlu0 %649  ;;  %v2804_v48 = vpop.permute.xlu1 %685  ;;  %v512_v9 = vrot.slane %v496_v63, %v2759_v15 }
  0xc7   :  { %v533_v4 = vrot.slane %v2729_v52, 4  ;;  %v651_v41 = vrot.slane %v2800_v44, 4  ;;  %v687_v11 = vrot.slane %v2804_v48, 4  ;;  %vm796_vm4 = vcmask 793600  }
  0xc9   :  { %v534_v53 = vsel %vm419_vm11, %v533_v4, %v2729_v52  ;;  %v566_v52 = vsel %vm320_vm5, %v564_v18, %v565_v19 }
  0xca   :  { %v2824_v1 = vpop.permute.xlu0 %721  ;;  %v2834_v5 = vpop.permute.xlu1 %757 }
  0xcd   :  { %v2761_v16 = vld [vmem:[#allocation2] sm:$0xff]  ;;  %v2763_v17 = vld [vmem:[#allocation2 + $0x8] sm:$0xf] }
  0xce   :  { %v361_v25 = vmul.f32 %v358_v22, %v2761_v16  ;;  %v362_v26 = vmul.f32 %v356_v14, %v2763_v17  ;;  %v397_v34 = vmul.f32 %v394_v31, %v2761_v16  ;;  %v398_v38 = vmul.f32 %v392_v21, %v2763_v17  ;;  %v2856_v22 = vpop.permute.xlu0 %793  ;;  %v2860_v28 = vpop.permute.xlu1 %841 }
  0xcf   :  { %v434_v43 = vmul.f32 %v428_v33, %v2763_v17  ;;  %v433_v47 = vmul.f32 %v430_v42, %v2761_v16  ;;  %v469_v58 = vmul.f32 %v466_v56, %v2761_v16  ;;  %v470_v61 = vmul.f32 %v464_v24, %v2763_v17 }
  0xd0   :  { %v373_v35 = vmul.f32 %v370_v27, %v362_v26  ;;  %v372_v37 = vmul.f32 %v370_v27, %v361_v25  ;;  %v408_v45 = vmul.f32 %v406_v32, %v397_v34  ;;  %v409_v49 = vmul.f32 %v406_v32, %v398_v38 }
  0xd1   :  { %v445_v59 = vmul.f32 %v442_v46, %v434_v43  ;;  %v444_v62 = vmul.f32 %v442_v46, %v433_v47  ;;  %v504_v7 = vmul.f32 %v499_v57, %v2763_v17  ;;  %v480_v8 = vmul.f32 %v478_v60, %v469_v58 }
  0xd2   :  { %378 = vrot.lane.b32.xlu0 %v373_v35, %s2531_s25  ;;  %376 = vrot.lane.b32.xlu1 %v372_v37, %s2531_s25  ;;  %v503_v12 = vmul.f32 %v500_v6, %v2761_v16  ;;  %v481_v13 = vmul.f32 %v478_v60, %v470_v61  ;;  %v530_v14 = vsel %vm320_vm5, %v528_v50, %v529_v3  ;;  %v611_v31 = vstv %s2831_s30  ;;  %v2880_v24 = vpop.permute.xlu0 %877  ;;  %s2537_s25 = smov 47   ;;  %s2539_s30 = smov 126  }
  0xd3   :  { %v537_v21 = vmul.f32 %v534_v53, %v2761_v16  ;;  %v515_v25 = vmul.f32 %v512_v9, %v504_v7  ;;  %v546_v26 = vrot.slane %v530_v14, %v2759_v15  ;;  %v538_v27 = vmul.f32 %v533_v4, %v2763_v17 }
  0xd4   :  { %v514_v29 = vmul.f32 %v512_v9, %v503_v12  ;;  %v615_v32 = vrot.slane %v2733_v54, 4  ;;  %v581_v33 = vsel %vm580_vm12, %v579_v20, %v2735_v55  ;;  %v585_v34 = vmul.f32 %v579_v20, %v2763_v17 }
  0xd5   :  { %v548_v35 = vmul.f32 %v546_v26, %v537_v21  ;;  %v593_v37 = vrot.slane %v566_v52, %v2759_v15  ;;  %v584_v38 = vmul.f32 %v581_v33, %v2761_v16  ;;  %v549_v39 = vmul.f32 %v546_v26, %v538_v27 }
  0xd6   :  { %412 = vrot.lane.b32.xlu0 %v408_v45, %s2487_s22  ;;  %414 = vrot.lane.b32.xlu1 %v409_v49, %s2487_s22  ;;  %s2829_s22 = sld [smem:[#allocation3 + $0x8]]  ;;  %v647_v43 = vstv %s2849_s5  ;;  %v617_v55 = vsel %vm616_vm13, %v615_v32, %v2733_v54  ;;  %v2891_v45 = vpop.permute.xlu1 %913  ;;  %v621_v10 = vmul.f32 %v615_v32, %v2763_v17  ;;  %v653_v54 = vsel %vm652_vm14, %v651_v41, %v2800_v44  ;;  %v2908_v60 = vpop.permute.xlu0 %949  ;;  %s3014_s5 = sld [smem:[#allocation3 + $0x56]] }
  0xd7   :  { %v620_v46 = vmul.f32 %v617_v55, %v2761_v16  ;;  %v596_v47 = vmul.f32 %v593_v37, %v585_v34  ;;  %v595_v51 = vmul.f32 %v593_v37, %v584_v38  ;;  %v683_v58 = vstv %s2869_s0  ;;  %s2541_s0 = smov 110  }
  0xd8   :  { %v689_v44 = vsel %vm688_vm15, %v687_v11, %v2804_v48  ;;  %v656_v63 = vmul.f32 %v653_v54, %v2761_v16  ;;  %v723_v6 = vrot.slane %v2824_v1, 4  ;;  %v759_v14 = vrot.slane %v2834_v5, 4 }
  0xd9   :  { %v692_v48 = vmul.f32 %v689_v44, %v2761_v16  ;;  %v754_v21 = vstv %s2903_s8  ;;  %v795_v33 = vrot.slane %v2856_v22, 4  ;;  %v790_v34 = vstv %s2920_s11  ;;  %s3046_s8 = sld [smem:[#allocation3 + $0x3]]  ;;  %s3058_s11 = sld [smem:[#allocation3 + $0xa]] }
  0xda   :  { %450 = vrot.lane.b32.xlu0 %v445_v59, %s2488_s23  ;;  %448 = vrot.lane.b32.xlu1 %v444_v62, %s2488_s23  ;;  %s2847_s23 = sld [smem:[#allocation3 + $0xf]]  ;;  %v657_v59 = vmul.f32 %v651_v41, %v2763_v17  ;;  %v2913_v50 = vpop.permute.xlu1 %985  ;;  %v725_v53 = vsel %vm724_vm1, %v723_v6, %v2824_v1  ;;  %v2931_v20 = vpop.permute.xlu0 %1021  ;;  %v729_v27 = vmul.f32 %v723_v6, %v2763_v17  ;;  %v843_v41 = vrot.slane %v2860_v28, 4 }
  0xdb   :  { %v761_v52 = vsel %vm760_vm2, %v759_v14, %v2834_v5  ;;  %vm880_vm12 = vcmask 146432   ;;  %v875_v44 = vstv %s2952_s17  ;;  %vm916_vm13 = vcmask 277504   ;;  %s3087_s17 = sld [smem:[#allocation3 + $0x49]] }
  0xdc   :  { %v610_v30 = vstv %s2829_s22  ;;  %v764_v5 = vmul.f32 %v761_v52, %v2761_v16  ;;  %s3000_s22 = sld [smem:[#allocation3 + $0x4f]]  ;;  %v951_v52 = vrot.slane %v2908_v60, 4  ;;  %vm952_vm14 = vcmask 408576  }
  0xdd   :  { %v612_v40 = vsel %vm320_vm5, %v610_v30, %v611_v31  ;;  %v728_v30 = vmul.f32 %v725_v53, %v2761_v16  ;;  %vm988_vm15 = vcmask 539648   ;;  %vm1024_vm1 = vcmask 670720  }
  0xde   :  { %484 = vrot.lane.b32.xlu0 %v480_v8, %s2485_s20  ;;  %486 = vrot.lane.b32.xlu1 %v481_v13, %s2485_s20  ;;  %s2867_s20 = sld [smem:[#allocation3 + $0x16]]  ;;  %v629_v49 = vrot.slane %v612_v40, %v2759_v15  ;;  %v719_v8 = vstv %s2887_s6  ;;  %v693_v13 = vmul.f32 %v687_v11, %v2763_v17  ;;  %v2939_v26 = vpop.permute.xlu1 %1057  ;;  %v2955_v37 = vpop.permute.xlu0 %1105  ;;  %v765_v40 = vmul.f32 %v759_v14, %v2763_v17  ;;  %s3031_s6 = sld [smem:[#allocation3 + $0x5d]] }
  0xdf   :  { %v915_v14 = vrot.slane %v2891_v45, 4  ;;  %vm1060_vm2 = vcmask 801792  }
  0xe0   :  { %v646_v42 = vstv %s2847_s23  ;;  %v631_v61 = vmul.f32 %v629_v49, %v620_v46  ;;  %v632_v3 = vmul.f32 %v629_v49, %v621_v10  ;;  %v797_v46 = vsel %vm796_vm4, %v795_v33, %v2856_v22  ;;  %s3007_s23 = sld [smem:[#allocation3 + $0x25]] }
  0xe1   :  { %v648_v56 = vsel %vm320_vm5, %v646_v42, %v647_v43  ;;  %v829_v49 = vstv %s2937_s15  ;;  %v801_v10 = vmul.f32 %v795_v33, %v2763_v17  ;;  %v800_v22 = vmul.f32 %v797_v46, %v2761_v16  ;;  %s3080_s15 = sld [smem:[#allocation3 + $0x42]] }
  0xe2   :  { %520 = vrot.lane.b32.xlu0 %v515_v25, %s2486_s21  ;;  %518 = vrot.lane.b32.xlu1 %v514_v29, %s2486_s21  ;;  %s2885_s21 = sld [smem:[#allocation3 + $0x1d]]  ;;  %v665_v62 = vrot.slane %v648_v56, %v2759_v15  ;;  %v755_v25 = vstv %s2905_s9  ;;  %v2960_v42 = vpop.permute.xlu1 %1141  ;;  %v845_v56 = vsel %vm844_vm6, %v843_v41, %v2860_v28  ;;  %s3048_s9 = sld [smem:[#allocation3 + $0x34]]  ;;  %vm1108_vm4 = vcmask 23552  }
  0xe3   :  { %v756_v32 = vsel %vm320_vm5, %v754_v21, %v755_v25  ;;  %v848_v28 = vmul.f32 %v845_v56, %v2761_v16  ;;  %vm1144_vm6 = vcmask 154624  }
  0xe4   :  { %v682_v57 = vstv %s2867_s20  ;;  %v668_v9 = vmul.f32 %v665_v62, %v657_v59  ;;  %v667_v18 = vmul.f32 %v665_v62, %v656_v63  ;;  %v2978_v59 = vpop.permute.xlu0 %1177  ;;  %v874_v62 = vstv %s2950_s16  ;;  %s2540_s20 = smov 86   ;;  %s2545_s16 = smov 62  }
  0xe5   :  { %v684_v4 = vsel %vm320_vm5, %v682_v57, %v683_v58  ;;  %v879_v58 = vrot.slane %v2880_v24, 4 }
  0xe6   :  { %552 = vrot.lane.b32.xlu0 %v548_v35, %s2483_s2  ;;  %554 = vrot.lane.b32.xlu1 %v549_v39, %s2483_s2  ;;  %v701_v12 = vrot.slane %v684_v4, %v2759_v15  ;;  %v791_v35 = vstv %s2922_s12  ;;  %v773_v39 = vrot.slane %v756_v32, %v2759_v15  ;;  %v849_v4 = vmul.f32 %v843_v41, %v2763_v17  ;;  %s3063_s12 = sld [smem:[#allocation3 + $0x3b]] }
  0xe7   :  { %v792_v55 = vsel %vm320_vm5, %v790_v34, %v791_v35  ;;  %v885_v21 = vmul.f32 %v879_v58, %v2763_v17  ;;  %v953_v41 = vsel %vm952_vm14, %v951_v52, %v2908_v60  ;;  %v957_v60 = vmul.f32 %v951_v52, %v2763_v17 }
  0xe8   :  { %v718_v7 = vstv %s2885_s21  ;;  %v703_v29 = vmul.f32 %v701_v12, %v692_v48  ;;  %v704_v31 = vmul.f32 %v701_v12, %v693_v13  ;;  %v775_v11 = vmul.f32 %v773_v39, %v764_v5  ;;  %v2994_v48 = vpop.permute.xlu0 %1248  ;;  %s3026_s21 = sld [smem:[#allocation3 + $0x2c]] }
  0xe9   :  { %v720_v19 = vsel %vm320_vm5, %v718_v7, %v719_v8  ;;  %v776_v54 = vmul.f32 %v773_v39, %v765_v40  ;;  %v881_v7 = vsel %vm880_vm12, %v879_v58, %v2880_v24  ;;  %v876_v8 = vsel %vm320_vm5, %v874_v62, %v875_v44 }
  0xea   :  { %601 = vrot.lane.b32.xlu0 %v596_v47, %s2532_s7  ;;  %599 = vrot.lane.b32.xlu1 %v595_v51, %s2532_s7  ;;  %v737_v1 = vrot.slane %v720_v19, %v2759_v15  ;;  %v828_v47 = vstv %s2935_s14  ;;  %v809_v51 = vrot.slane %v792_v55, %v2759_v15  ;;  %v910_v12 = vstv %s2969_s19  ;;  %s2542_s7 = smov 102   ;;  %s3075_s14 = sld [smem:[#allocation3 + $0x11]] }
  0xeb   :  { %v830_v57 = vsel %vm320_vm5, %v828_v47, %v829_v49  ;;  %v911_v13 = vstv %s2971_s24  ;;  %v884_v24 = vmul.f32 %v881_v7, %v2761_v16  ;;  %v893_v53 = vrot.slane %v876_v8, %v2759_v15  ;;  %s3102_s19 = sld [smem:[#allocation3 + $0x1f]]  ;;  %s3107_s24 = sld [smem:[#allocation3 + $0x50]] }
  0xec   :  { %v740_v38 = vmul.f32 %v737_v1, %v729_v27  ;;  %v739_v43 = vmul.f32 %v737_v1, %v728_v30  ;;  %v812_v63 = vmul.f32 %v809_v51, %v801_v10  ;;  %v811_v6 = vmul.f32 %v809_v51, %v800_v22 }
  0xed   :  { %v912_v25 = vsel %vm320_vm5, %v910_v12, %v911_v13  ;;  %v946_v27 = vstv %s2986_s26  ;;  %v917_v1 = vsel %vm916_vm13, %v915_v14, %v2891_v45  ;;  %v895_v30 = vmul.f32 %v893_v53, %v884_v24  ;;  %s3119_s26 = sld [smem:[#allocation3 + $0x26]] }
  0xee   :  { %635 = vrot.lane.b32.xlu0 %v631_v61, %s2533_s10  ;;  %637 = vrot.lane.b32.xlu1 %v632_v3, %s2533_s10  ;;  %v2980_v61 = vpop.permute.xlu1 %1213  ;;  %v857_v3 = vrot.slane %v830_v57, %v2759_v15  ;;  %v929_v33 = vrot.slane %v912_v25, %v2759_v15  ;;  %v920_v45 = vmul.f32 %v917_v1, %v2761_v16  ;;  %v982_v5 = vstv %s2998_s29  ;;  %s2543_s10 = smov 94   ;;  %s3138_s29 = sld [smem:[#allocation3 + $0x2d]] }
  0xef   :  { %v896_v35 = vmul.f32 %v893_v53, %v885_v21  ;;  %v921_v39 = vmul.f32 %v915_v14, %v2763_v17  ;;  %v987_v40 = vrot.slane %v2913_v50, 4  ;;  %v956_v46 = vmul.f32 %v953_v41, %v2761_v16 }
  0xf0   :  { %v860_v19 = vmul.f32 %v857_v3, %v849_v4  ;;  %v931_v49 = vmul.f32 %v929_v33, %v920_v45  ;;  %v1018_v10 = vstv %s3007_s23  ;;  %v1023_v51 = vrot.slane %v2931_v20, 4  ;;  %s3153_s23 = sld [smem:[#allocation3 + $0x4]] }
  0xf1   :  { %v932_v22 = vmul.f32 %v929_v33, %v921_v39  ;;  %v1054_v62 = vstv %s3026_s21  ;;  %v1055_v44 = vstv %s3031_s6  ;;  %v1092_v13 = vstv %s3046_s8  ;;  %s3176_s21 = sld [smem:[#allocation3 + $0x3c]]  ;;  %s3181_s6 = sld [smem:[#allocation3]] }
  0xf2   :  { %673 = vrot.lane.b32.xlu0 %v668_v9, %s2534_s13  ;;  %671 = vrot.lane.b32.xlu1 %v667_v18, %s2534_s13  ;;  %v859_v9 = vmul.f32 %v857_v3, %v848_v28  ;;  %v3004_v18 = vpop.permute.xlu1 %1284  ;;  %v993_v28 = vmul.f32 %v987_v40, %v2763_v17  ;;  %v1025_v3 = vsel %vm1024_vm1, %v1023_v51, %v2931_v20  ;;  %s2544_s13 = smov 78   ;;  %v1093_v14 = vstv %s3048_s9  ;;  %s2551_s8 = smov 77  }
  0xf3   :  { %v1028_v12 = vmul.f32 %v1025_v3, %v2761_v16  ;;  %v1107_v53 = vrot.slane %v2955_v37, 4  ;;  %v1094_v52 = vsel %vm320_vm5, %v1092_v13, %v1093_v14  ;;  %v1174_v39 = vstv %s3075_s14  ;;  %s3185_s9 = sld [smem:[#allocation3 + $0x31]]  ;;  %s3210_s14 = sld [smem:[#allocation3 + $0x20]] }
  0xf4   :  { %vm1180_vm12 = vcmask 285696   ;;  %v1250_v13 = vrot.slane %v2994_v48, 4  ;;  %vm1251_vm13 = vcmask 547840   ;;  %vm1323_vm14 = vcmask 809984  }
  0xf5   :  { %v1109_v45 = vsel %vm1108_vm4, %v1107_v53, %v2955_v37  ;;  %vm1407_vm1 = vcmask 162816   ;;  %vm1479_vm4 = vcmask 424960  }
  0xf6   :  { %707 = vrot.lane.b32.xlu0 %v703_v29, %s2535_s1  ;;  %709 = vrot.lane.b32.xlu1 %v704_v31, %s2535_s1  ;;  %v947_v29 = vstv %s2988_s27  ;;  %v3018_v31 = vpop.permute.xlu0 %1320  ;;  %v3021_v32 = vpop.permute.xlu1 %1368  ;;  %s3085_s1 = sld [smem:[#allocation3 + $0x18]]  ;;  %s3124_s27 = sld [smem:[#allocation3 + $0x57]] }
  0xf7   :  { %v948_v34 = vsel %vm320_vm5, %v946_v27, %v947_v29  ;;  %v1138_v27 = vstv %s3058_s11  ;;  %s3203_s11 = sld [smem:[#allocation3 + $0x19]] }
  0xfa   :  { %745 = vrot.lane.b32.xlu0 %v740_v38, %s2536_s18  ;;  %743 = vrot.lane.b32.xlu1 %v739_v43, %s2536_s18  ;;  %v983_v38 = vstv %s3000_s22  ;;  %v965_v43 = vrot.slane %v948_v34, %v2759_v15  ;;  %v3042_v47 = vpop.permute.xlu0 %1404  ;;  %v3053_v56 = vpop.permute.xlu1 %1440  ;;  %v1143_v34 = vrot.slane %v2960_v42, 4  ;;  %s2546_s18 = smov 46   ;;  %s3140_s22 = sld [smem:[#allocation3 + $0x5e]] }
  0xfb   :  { %v984_v55 = vsel %vm320_vm5, %v982_v5, %v983_v38  ;;  %v1121_v38 = vrot.slane %v1094_v52, %v2759_v15  ;;  %v1252_v52 = vsel %vm1251_vm13, %v1250_v13, %v2994_v48  ;;  %vm383_vm13 = vcmask 916480  }
  0xfc   :  { %v967_v58 = vmul.f32 %v965_v43, %v956_v46  ;;  %v968_v4 = vmul.f32 %v965_v43, %v957_v60  ;;  %v1175_v43 = vstv %s3080_s15  ;;  %v1113_v46 = vmul.f32 %v1107_v53, %v2763_v17  ;;  %s3215_s15 = sld [smem:[#allocation3 + $0x51]] }
  0xfd   :  { %v1211_v60 = vstv %s3087_s17  ;;  %v1281_v53 = vstv %s3119_s26  ;;  %s3240_s17 = sld [smem:[#allocation3 + $0x5f]]  ;;  %s3279_s26 = sld [smem:[#allocation3 + $0x5]] }
  0xfe   :  { %779 = vrot.lane.b32.xlu0 %v775_v11, %s2537_s25  ;;  %781 = vrot.lane.b32.xlu1 %v776_v54, %s2537_s25  ;;  %v1019_v11 = vstv %s3014_s5  ;;  %v1001_v54 = vrot.slane %v984_v55, %v2759_v15  ;;  %v3070_v7 = vpop.permute.xlu1 %1512  ;;  %v1145_v55 = vsel %vm1144_vm6, %v1143_v34, %v2960_v42  ;;  %s2547_s25 = smov 30   ;;  %s3159_s5 = sld [smem:[#allocation3 + $0x35]]  ;;  %vm1515_vm6 = vcmask 556032  }
  0xff   :  { %v1020_v57 = vsel %vm320_vm5, %v1018_v10, %v1019_v11  ;;  %v1148_v42 = vmul.f32 %v1145_v55, %v2761_v16 }
 0x100   :  { %v1037_v8 = vrot.slane %v1020_v57, %v2759_v15  ;;  %v1004_v21 = vmul.f32 %v1001_v54, %v993_v28  ;;  %v1176_v57 = vsel %vm320_vm5, %v1174_v39, %v1175_v43  ;;  %v1255_v39 = vmul.f32 %v1252_v52, %v2761_v16 }
 0x101   :  { %v1318_v48 = vstv %s3140_s22  ;;  %v1322_v43 = vrot.slane %v3018_v31, 4  ;;  %s3297_s22 = sld [smem:[#allocation3 + $0x3d]] }
 0x102   :  { %817 = vrot.lane.b32.xlu0 %v812_v63, %s2538_s28  ;;  %815 = vrot.lane.b32.xlu1 %v811_v6, %s2538_s28  ;;  %v1059_v63 = vrot.slane %v2939_v26, 4  ;;  %v3068_v6 = vpop.permute.xlu0 %1476  ;;  %v1039_v1 = vmul.f32 %v1037_v8, %v1028_v12  ;;  %s2548_s28 = smov 125  }
 0x104   :  { %v1061_v24 = vsel %vm1060_vm2, %v1059_v63, %v2939_v26  ;;  %v1065_v33 = vmul.f32 %v1059_v63, %v2763_v17  ;;  %v1245_v63 = vstv %s3102_s19  ;;  %vm1443_vm2 = vcmask 293888   ;;  %s2554_s19 = smov 29  }
 0x105   :  { %v1064_v29 = vmul.f32 %v1061_v24, %v2761_v16 }
 0x106   :  { %863 = vrot.lane.b32.xlu0 %v859_v9, %s2539_s30  ;;  %865 = vrot.lane.b32.xlu1 %v860_v19, %s2539_s30  ;;  %v1056_v9 = vsel %vm320_vm5, %v1054_v62, %v1055_v44  ;;  %v1029_v19 = vmul.f32 %v1023_v51, %v2763_v17  ;;  %v3092_v26 = vpop.permute.xlu0 %1548  ;;  %v1124_v44 = vmul.f32 %v1121_v38, %v1113_v46  ;;  %s2549_s30 = smov 109  }
 0x107   :  { %v1073_v25 = vrot.slane %v1056_v9, %v2759_v15  ;;  %v1193_v9 = vrot.slane %v1176_v57, %v2759_v15  ;;  %v1324_v57 = vsel %vm1323_vm14, %v1322_v43, %v3018_v31  ;;  %vm1671_vm14 = vcmask 171008  }
 0x108   :  { %v1040_v5 = vmul.f32 %v1037_v8, %v1029_v19 }
 0x109   :  { %v1075_v41 = vmul.f32 %v1073_v25, %v1064_v29  ;;  %v1076_v10 = vmul.f32 %v1073_v25, %v1065_v33  ;;  %v1282_v25 = vstv %s3124_s27  ;;  %s2556_s27 = smov 108  }
 0x10a   :  { %2076 = vrot.lane.b32.xlu0 %v2693_v36, %s2540_s20  ;;  %899 = vrot.lane.b32.xlu1 %v895_v30, %s2541_s0  ;;  %v1139_v30 = vstv %s3063_s12  ;;  %v3115_v11 = vpop.permute.xlu0 %1632  ;;  %s2550_s20 = smov 93   ;;  %s3205_s12 = sld [smem:[#allocation3 + $0x4a]] }
 0x10b   :  { %v1140_v37 = vsel %vm320_vm5, %v1138_v27, %v1139_v30 }
 0x10e   :  { %901 = vrot.lane.b32.xlu0 %v896_v35, %s2541_s0  ;;  %2112 = vrot.lane.b32.xlu1 %v2693_v36, %s2542_s7  ;;  %v989_v36 = vsel %vm988_vm15, %v987_v40, %v2913_v50  ;;  %v3100_v35 = vpop.permute.xlu1 %1584  ;;  %v1112_v40 = vmul.f32 %v1109_v45, %v2761_v16  ;;  %v3142_v8 = vpop.permute.xlu0 %1704  ;;  %s3174_s0 = sld [smem:[#allocation3 + $0xb]]  ;;  %s3183_s7 = sld [smem:[#allocation3 + $0x12]]  ;;  %vm1371_vm15 = vcmask 31744  }
 0x10f   :  { %v992_v50 = vmul.f32 %v989_v36, %v2761_v16  ;;  %v1210_v36 = vstv %s3085_s1  ;;  %s2553_s1 = smov 45  }
 0x110   :  { %v1212_v28 = vsel %vm320_vm5, %v1210_v36, %v1211_v60  ;;  %v1356_v36 = vstv %s3159_s5  ;;  %s3307_s5 = sld [smem:[#allocation3 + $0x44]] }
 0x111   :  { %v1003_v20 = vmul.f32 %v1001_v54, %v992_v50  ;;  %v1157_v54 = vrot.slane %v1140_v37, %v2759_v15  ;;  %v1149_v50 = vmul.f32 %v1143_v34, %v2763_v17  ;;  %v1228_v19 = vrot.slane %v1212_v28, %v2759_v15 }
 0x112   :  { %935 = vrot.lane.b32.xlu0 %v931_v49, %s2543_s10  ;;  %937 = vrot.lane.b32.xlu1 %v932_v22, %s2543_s10  ;;  %v1179_v49 = vrot.slane %v2978_v59, 4  ;;  %v3121_v51 = vpop.permute.xlu1 %1668  ;;  %v1123_v22 = vmul.f32 %v1121_v38, %v1112_v40  ;;  %v3164_v33 = vpop.permute.xlu0 %1776  ;;  %v1283_v34 = vsel %vm320_vm5, %v1281_v53, %v1282_v25  ;;  %v1317_v40 = vstv %s3138_s29  ;;  %s3189_s10 = sld [smem:[#allocation3 + $0x43]]  ;;  %s3293_s29 = sld [smem:[#allocation3 + $0xc]] }
 0x113   :  { %v1160_v24 = vmul.f32 %v1157_v54, %v1149_v50  ;;  %v1256_v37 = vmul.f32 %v1250_v13, %v2763_v17  ;;  %v1300_v46 = vrot.slane %v1283_v34, %v2759_v15  ;;  %v1319_v60 = vsel %vm320_vm5, %v1317_v40, %v1318_v48 }
 0x114   :  { %v1181_v62 = vsel %vm1180_vm12, %v1179_v49, %v2978_v59  ;;  %v1159_v59 = vmul.f32 %v1157_v54, %v1148_v42  ;;  %v1370_v54 = vrot.slane %v3021_v32, 4  ;;  %v1327_v28 = vmul.f32 %v1324_v57, %v2761_v16 }
 0x115   :  { %v1184_v3 = vmul.f32 %v1181_v62, %v2761_v16  ;;  %v323_v13 = vstv %s3181_s6  ;;  %v1473_v34 = vstv %s3203_s11  ;;  %v1509_v40 = vstv %s3210_s14  ;;  %s2559_s6 = smov 60   ;;  %s3358_s11 = sld [smem:[#allocation3 + $0x52]] }
 0x116   :  { %971 = vrot.lane.b32.xlu0 %v967_v58, %s2544_s13  ;;  %973 = vrot.lane.b32.xlu1 %v968_v4, %s2544_s13  ;;  %v1215_v58 = vrot.slane %v2980_v61, 4  ;;  %v1246_v4 = vstv %s3107_s24  ;;  %v3149_v14 = vpop.permute.xlu1 %1740  ;;  %v3195_v42 = vpop.permute.xlu0 %1848  ;;  %s2552_s13 = smov 61   ;;  %s3248_s24 = sld [smem:[#allocation3 + $0x58]]  ;;  %vm1587_vm12 = vcmask 818176  }
 0x117   :  { %v1195_v27 = vmul.f32 %v1193_v9, %v1184_v3  ;;  %v1402_v3 = vstv %s3176_s21  ;;  %s3322_s21 = sld [smem:[#allocation3 + $0x4b]]  ;;  %s2562_s14 = smov 123  }
 0x118   :  { %v1216_v12 = vsel %vm93_vm3, %v1215_v58, %v2980_v61  ;;  %v1247_v61 = vsel %vm320_vm5, %v1245_v63, %v1246_v4  ;;  %v1220_v29 = vmul.f32 %v1215_v58, %v2763_v17  ;;  %vm1287_vm3 = vcmask 678912  }
 0x119   :  { %v1264_v45 = vrot.slane %v1247_v61, %v2759_v15  ;;  %v1401_v63 = vstv %s3174_s0  ;;  %v1372_v4 = vsel %vm1371_vm15, %v1370_v54, %v3021_v32  ;;  %v1438_v53 = vstv %s3189_s10  ;;  %s2558_s0 = smov 76   ;;  %s2560_s10 = smov 44  }
 0x11a   :  { %1007 = vrot.lane.b32.xlu0 %v1003_v20, %s2545_s16  ;;  %1009 = vrot.lane.b32.xlu1 %v1004_v21, %s2545_s16  ;;  %v1185_v20 = vmul.f32 %v1179_v49, %v2763_v17  ;;  %v1219_v21 = vmul.f32 %v1216_v12, %v2761_v16  ;;  %v1231_v55 = vmul.f32 %v1228_v19, %v1220_v29  ;;  %v1355_v49 = vstv %s3153_s23  ;;  %s3236_s16 = sld [smem:[#allocation3 + $0x2e]]  ;;  %s2557_s23 = smov 92  }
 0x11b   :  { %v1267_v58 = vmul.f32 %v1264_v45, %v1256_v37  ;;  %v1357_v62 = vsel %vm320_vm5, %v1355_v49, %v1356_v36  ;;  %v324_v32 = vstv %s3185_s9  ;;  %v1375_v25 = vmul.f32 %v1372_v4, %v2761_v16  ;;  %s3351_s9 = sld [smem:[#allocation3 + $0x21]] }
 0x11c   :  { %v1196_v30 = vmul.f32 %v1193_v9, %v1185_v20  ;;  %v1230_v38 = vmul.f32 %v1228_v19, %v1219_v21  ;;  %v1406_v9 = vrot.slane %v3042_v47, 4  ;;  %v3220_v20 = vpop.permute.xlu0 %1932  ;;  %v1437_v19 = vstv %s3183_s7  ;;  %s3343_s7 = sld [smem:[#allocation3 + $0x28]] }
 0x11d   :  { %v1403_v29 = vsel %vm320_vm5, %v1401_v63, %v1402_v3  ;;  %vm1635_vm15 = vcmask 39936  }
 0x11e   :  { %1043 = vrot.lane.b32.xlu0 %v1039_v1, %s2546_s18  ;;  %1045 = vrot.lane.b32.xlu1 %v1040_v5, %s2546_s18  ;;  %v1286_v1 = vrot.slane %v3004_v18, 4  ;;  %v3169_v5 = vpop.permute.xlu1 %1812  ;;  %v1408_v52 = vsel %vm1407_vm1, %v1406_v9, %v3042_v47  ;;  %s3242_s18 = sld [smem:[#allocation3 + $0x27]]  ;;  %v325_v47 = vsel %vm320_vm5, %v323_v13, %v324_v32  ;;  %v1546_v32 = vstv %s3248_s24  ;;  %s3414_s24 = sld [smem:[#allocation3 + $0x3e]] }
 0x11f   :  { %v1411_v37 = vmul.f32 %v1408_v52, %v2761_v16  ;;  %vm606_vm1 = vcmask 1039360  }
 0x122   :  { %1079 = vrot.lane.b32.xlu0 %v1075_v41, %s2547_s25  ;;  %1081 = vrot.lane.b32.xlu1 %v1076_v10, %s2547_s25  ;;  %v1288_v41 = vsel %vm1287_vm3, %v1286_v1, %v3004_v18  ;;  %v1266_v10 = vmul.f32 %v1264_v45, %v1255_v39  ;;  %v3201_v50 = vpop.permute.xlu1 %1896  ;;  %v1474_v45 = vstv %s3205_s12  ;;  %v1420_v39 = vrot.slane %v1403_v29, %v2759_v15  ;;  %s2555_s25 = smov 124   ;;  %s2561_s12 = smov 28  }
 0x123   :  { %v1291_v18 = vmul.f32 %v1288_v41, %v2761_v16  ;;  %v1475_v49 = vsel %vm320_vm5, %v1473_v34, %v1474_v45  ;;  %v1550_v29 = vrot.slane %v3092_v26, 4  ;;  %vm1551_vm3 = vcmask 687104  }
 0x125   :  { %v1302_v31 = vmul.f32 %v1300_v46, %v1291_v18  ;;  %v1478_v18 = vrot.slane %v3068_v6, 4 }
 0x126   :  { %1127 = vrot.lane.b32.xlu0 %v1123_v22, %s2548_s28  ;;  %1129 = vrot.lane.b32.xlu1 %v1124_v44, %s2548_s28  ;;  %v1292_v22 = vmul.f32 %v1286_v1, %v2763_v17  ;;  %v1336_v44 = vrot.slane %v1319_v60, %v2759_v15  ;;  %v3226_v21 = vpop.permute.xlu1 %1968  ;;  %v1376_v1 = vmul.f32 %v1370_v54, %v2763_v17  ;;  %v3265_v60 = vld [vmem:[#allocation2] sm:$0xff]  ;;  %s3285_s28 = sld [smem:[#allocation3 + $0x36]] }
 0x127   :  { %v1422_v54 = vmul.f32 %v1420_v39, %v1411_v37  ;;  %v1480_v63 = vsel %vm1479_vm4, %v1478_v18, %v3068_v6  ;;  %v1586_v37 = vrot.slane %v3100_v35, 4  ;;  %vm1899_vm4 = vcmask 48128  }
 0x128   :  { %v1303_v12 = vmul.f32 %v1300_v46, %v1292_v22  ;;  %v1338_v61 = vmul.f32 %v1336_v44, %v1327_v28  ;;  %v1412_v46 = vmul.f32 %v1406_v9, %v2763_v17  ;;  %v322_v22 = vld [vmem:[#allocation2] sm:$0xff]  ;;  %v1581_v9 = vstv %s3236_s16  ;;  %s2563_s16 = smov 107  }
 0x12a   :  { %1163 = vrot.lane.b32.xlu0 %v1159_v59, %s2549_s30  ;;  %1165 = vrot.lane.b32.xlu1 %v1160_v24, %s2549_s30  ;;  %v1328_v59 = vmul.f32 %v1322_v43, %v2763_v17  ;;  %v1384_v24 = vrot.slane %v1357_v62, %v2759_v15  ;;  %v1510_v43 = vstv %s3215_s15  ;;  %v345_v17 = vrot.slane %v325_v47, %v2759_v15  ;;  %s3299_s30 = sld [smem:[#allocation3 + $0x13]]  ;;  %s3384_s15 = sld [smem:[#allocation3 + $0x60]] }
 0x12b   :  { %v1511_v57 = vsel %vm320_vm5, %v1509_v40, %v1510_v43  ;;  %v1492_v62 = vrot.slane %v1475_v49, %v2759_v15 }
 0x12c   :  { %v1386_v48 = vmul.f32 %v1384_v24, %v1375_v25  ;;  %v1387_v36 = vmul.f32 %v1384_v24, %v1376_v1  ;;  %v1483_v25 = vmul.f32 %v3265_v60, %v1480_v63  ;;  %v1528_v45 = vrot.slane %v1511_v57, %v2759_v15 }
 0x12e   :  { %1199 = vrot.lane.b32.xlu0 %v1195_v27, %s2550_s20  ;;  %1201 = vrot.lane.b32.xlu1 %v1196_v30, %s2550_s20  ;;  %v1442_v27 = vrot.slane %v3053_v56, 4  ;;  %v1339_v30 = vmul.f32 %v1336_v44, %v1328_v59  ;;  %v1423_v59 = vmul.f32 %v1420_v39, %v1412_v46  ;;  %s3317_s20 = sld [smem:[#allocation3 + $0x1a]] }
 0x130   :  { %v1444_v41 = vsel %vm1443_vm2, %v1442_v27, %v3053_v56  ;;  %vm1851_vm2 = vcmask 826368  }
 0x131   :  { %v1447_v16 = vmul.f32 %v3265_v60, %v1444_v41  ;;  %v1494_v41 = vmul.f32 %v1492_v62, %v1483_v25 }
 0x132   :  { %1234 = vrot.lane.b32.xlu0 %v1230_v38, %s2551_s8  ;;  %1236 = vrot.lane.b32.xlu1 %v1231_v55, %s2551_s8  ;;  %v1439_v38 = vsel %vm320_vm5, %v1437_v19, %v1438_v53  ;;  %v3256_v55 = vpop.permute.xlu0 %2004  ;;  %v1582_v19 = vstv %s3240_s17  ;;  %v1545_v53 = vstv %s3242_s18  ;;  %s3349_s8 = sld [smem:[#allocation3 + $0x59]]  ;;  %s3401_s17 = sld [smem:[#allocation3 + $0x37]] }
 0x133   :  { %v1456_v56 = vrot.slane %v1439_v38, %v2759_v15  ;;  %v1583_v47 = vsel %vm320_vm5, %v1581_v9, %v1582_v19  ;;  %v1634_v9 = vrot.slane %v3115_v11, 4  ;;  %s3409_s18 = sld [smem:[#allocation3 + $0xd]] }
 0x135   :  { %v1458_v24 = vmul.f32 %v1456_v56, %v1447_v16 }
 0x136   :  { %1270 = vrot.lane.b32.xlu0 %v1266_v10, %s2552_s13  ;;  %1272 = vrot.lane.b32.xlu1 %v1267_v58, %s2552_s13  ;;  %v3262_v10 = vpop.permute.xlu1 %2040  ;;  %v1514_v58 = vrot.slane %v3070_v7, 4  ;;  %s3379_s13 = sld [smem:[#allocation3 + $0x2f]] }
 0x138   :  { %v1516_v6 = vsel %vm1515_vm6, %v1514_v58, %v3070_v7  ;;  %vm678_vm6 = vcmask 777216  }
 0x139   :  { %v1519_v39 = vmul.f32 %v3265_v60, %v1516_v6 }
 0x13a   :  { %1306 = vrot.lane.b32.xlu0 %v1302_v31, %s2553_s1  ;;  %1308 = vrot.lane.b32.xlu1 %v1303_v12, %s2553_s1  ;;  %v3273_v31 = vld [vmem:[#allocation2 + $0x8] sm:$0xf]  ;;  %v337_v12 = vmul.f32 %v2653_v23, %v322_v22  ;;  %v3315_v22 = vrot.slane %v1583_v47, %v2759_v15  ;;  %s3394_s1 = sld [smem:[#allocation3 + $0x6]] }
 0x13b   :  { %v1448_v28 = vmul.f32 %v3273_v31, %v1442_v27  ;;  %v1520_v40 = vmul.f32 %v3273_v31, %v1514_v58  ;;  %v1530_v58 = vmul.f32 %v1528_v45, %v1519_v39 }
 0x13c   :  { %v347_v7 = vmul.f32 %v345_v17, %v337_v12 }
 0x13d   :  { %v1459_v34 = vmul.f32 %v1456_v56, %v1448_v28  ;;  %v1620_v28 = vstv %s3285_s28  ;;  %v1531_v19 = vmul.f32 %v1528_v45, %v1520_v40  ;;  %v1636_v45 = vsel %vm1635_vm15, %v1634_v9, %v3115_v11  ;;  %s3439_s28 = sld [smem:[#allocation3 + $0x1b]] }
 0x13e   :  { %1342 = vrot.lane.b32.xlu0 %v1338_v61, %s2554_s19  ;;  %1344 = vrot.lane.b32.xlu1 %v1339_v30, %s2554_s19  ;;  %v1484_v61 = vmul.f32 %v3273_v31, %v1478_v18  ;;  %v1552_v18 = vsel %vm1551_vm3, %v1550_v29, %v3092_v26  ;;  %s2564_s19 = smov 91   ;;  %vm1971_vm3 = vcmask 310272   ;;  %vm786_vm15 = vcmask 384000  }
 0x13f   :  { %v1555_v63 = vmul.f32 %v3265_v60, %v1552_v18 }
 0x140   :  { %v1495_v17 = vmul.f32 %v1492_v62, %v1484_v61  ;;  %v1588_v62 = vsel %vm1587_vm12, %v1586_v37, %v3100_v35  ;;  %vm714_vm12 = vcmask 646144  }
 0x141   :  { %v1591_v25 = vmul.f32 %v3265_v60, %v1588_v62 }
 0x142   :  { %1390 = vrot.lane.b32.xlu0 %v1386_v48, %s2555_s25  ;;  %1392 = vrot.lane.b32.xlu1 %v1387_v36, %s2555_s25  ;;  %v1547_v48 = vsel %vm320_vm5, %v1545_v53, %v1546_v32  ;;  %v1665_v53 = vstv %s3293_s29  ;;  %v1666_v32 = vstv %s3297_s22  ;;  %s3424_s25 = sld [smem:[#allocation3 + $0x14]]  ;;  %s2566_s29 = smov 59  }
 0x143   :  { %v1564_v26 = vrot.slane %v1547_v48, %v2759_v15  ;;  %v1667_v47 = vsel %vm320_vm5, %v1665_v53, %v1666_v32  ;;  %s3444_s22 = sld [smem:[#allocation3 + $0x4c]] }
 0x144   :  { %v379_v44 = vpop.permute.xlu0 %378  ;;  %v377_v4 = vpop.permute.xlu1 %376 }
 0x145   :  { %v381_v3 = vrot.slane %v379_v44, 4  ;;  %v380_v13 = vrot.slane %v377_v4, 4  ;;  %v1619_v44 = vstv %s3279_s26  ;;  %s2565_s26 = smov 75  }
 0x146   :  { %1426 = vrot.lane.b32.xlu0 %v1422_v54, %s2556_s27  ;;  %1428 = vrot.lane.b32.xlu1 %v1423_v59, %s2556_s27  ;;  %v1621_v61 = vsel %vm320_vm5, %v1619_v44, %v1620_v28  ;;  %v1684_v28 = vrot.slane %v1667_v47, %v2759_v15  ;;  %s3430_s27 = sld [smem:[#allocation3 + $0x45]] }
 0x147   :  { %v382_v27 = vsel %vm58_vm0, %v380_v13, %v381_v3  ;;  %v1556_v3 = vmul.f32 %v3273_v31, %v1550_v29  ;;  %v1592_v29 = vmul.f32 %v3273_v31, %v1586_v37  ;;  %v1648_v48 = vrot.slane %v1621_v61, %v2759_v15 }
 0x148   :  { %v413_v23 = vpop.permute.xlu0 %412  ;;  %v384_v1 = vsel %vm383_vm13, %v377_v4, %v382_v27  ;;  %v415_v30 = vpop.permute.xlu1 %414  ;;  %v1701_v27 = vstv %s3299_s30  ;;  %v1602_v37 = vmul.f32 %v3315_v22, %v1591_v25  ;;  %vm1935_vm13 = vcmask 179200   ;;  %s3454_s30 = sld [smem:[#allocation3 + $0x22]] }
 0x149   :  { %v416_v52 = vrot.slane %v413_v23, 4  ;;  %v417_v38 = vrot.slane %v415_v30, 4  ;;  %v386_v43 = vadd.f32 %v384_v1, %v347_v7  ;;  %v1566_v1 = vmul.f32 %v1564_v26, %v1555_v63 }
 0x14a   :  { %1462 = vrot.lane.b32.xlu0 %v1458_v24, %s2557_s23  ;;  %1464 = vrot.lane.b32.xlu1 %v1459_v34, %s2557_s23  ;;  %v1567_v40 = vmul.f32 %v1564_v26, %v1556_v3  ;;  %s2567_s23 = smov 43  }
 0x14b   :  { %v418_v46 = vsel %vm58_vm0, %v416_v52, %v417_v38  ;;  %v1670_v52 = vrot.slane %v3121_v51, 4 }
 0x14c   :  { %v451_v49 = vpop.permute.xlu0 %450  ;;  %v420_v56 = vsel %vm419_vm11, %v413_v23, %v418_v46  ;;  %v449_v16 = vpop.permute.xlu1 %448  ;;  %v1702_v23 = vstv %s3307_s5  ;;  %v1738_v46 = vstv %s3322_s21  ;;  %vm1779_vm11 = vcmask 564224   ;;  %s3461_s5 = sld [smem:[#allocation3 + $0x53]]  ;;  %s3475_s21 = sld [smem:[#allocation3 + $0x5a]] }
 0x14d   :  { %v453_v36 = vrot.slane %v451_v49, 4  ;;  %v422_v54 = vadd.f32 %v420_v56, %v386_v43  ;;  %v452_v57 = vrot.slane %v449_v16, 4  ;;  %v1737_v43 = vstv %s3317_s20  ;;  %s2568_s20 = smov 27  }
 0x14e   :  { %1498 = vrot.lane.b32.xlu0 %v1494_v41, %s2558_s0  ;;  %1500 = vrot.lane.b32.xlu1 %v1495_v17, %s2558_s0  ;;  %v1703_v49 = vsel %vm320_vm5, %v1701_v27, %v1702_v23  ;;  %v1672_v18 = vsel %vm1671_vm14, %v1670_v52, %v3121_v51  ;;  %v1603_v17 = vmul.f32 %v3315_v22, %v1592_v29  ;;  %v1810_v27 = vstv %s3349_s8  ;;  %s3473_s0 = sld [smem:[#allocation3 + $0x29]] }
 0x14f   :  { %v454_v4 = vsel %vm58_vm0, %v452_v57, %v453_v36  ;;  %v1639_v36 = vmul.f32 %v3265_v60, %v1636_v45  ;;  %v1706_v57 = vrot.slane %v3142_v8, 4  ;;  %v1676_v63 = vmul.f32 %v3273_v31, %v1670_v52  ;;  %s3494_s8 = sld [smem:[#allocation3 + $0x61]] }
 0x150   :  { %v485_v59 = vpop.permute.xlu0 %484  ;;  %v456_v12 = vsel %vm455_vm10, %v449_v16, %v454_v4  ;;  %v487_v24 = vpop.permute.xlu1 %486  ;;  %vm1743_vm10 = vcmask 433152   ;;  %v1739_v22 = vsel %vm320_vm5, %v1737_v43, %v1738_v46  ;;  %v1720_v3 = vrot.slane %v1703_v49, %v2759_v15 }
 0x151   :  { %v488_v13 = vrot.slane %v485_v59, 4  ;;  %v458_v6 = vadd.f32 %v456_v12, %v422_v54  ;;  %v489_v35 = vrot.slane %v487_v24, 4  ;;  %v1640_v54 = vmul.f32 %v3273_v31, %v1634_v9 }
 0x152   :  { %1534 = vrot.lane.b32.xlu0 %v1530_v58, %s2559_s6  ;;  %1536 = vrot.lane.b32.xlu1 %v1531_v19, %s2559_s6  ;;  %v1675_v4 = vmul.f32 %v3265_v60, %v1672_v18  ;;  %v1742_v9 = vrot.slane %v3149_v14, 4  ;;  %v1773_v23 = vstv %s3351_s9  ;;  %v1774_v29 = vstv %s3358_s11  ;;  %s2569_s6 = smov 122   ;;  %s2570_s9 = smov 106  }
 0x153   :  { %v490_v30 = vsel %vm58_vm0, %v488_v13, %v489_v35  ;;  %v1809_v35 = vstv %s3343_s7  ;;  %v1775_v43 = vsel %vm320_vm5, %v1773_v23, %v1774_v29  ;;  %v1814_v18 = vrot.slane %v3169_v5, 4  ;;  %s3489_s7 = sld [smem:[#allocation3 + $0x30]]  ;;  %s2572_s11 = smov 74  }
 0x154   :  { %v521_v34 = vpop.permute.xlu0 %520  ;;  %v491_v38 = vsel %vm465_vm9, %v485_v59, %v490_v30  ;;  %v519_v39 = vpop.permute.xlu1 %518  ;;  %vm1707_vm9 = vcmask 302080   ;;  %v1650_v59 = vmul.f32 %v1648_v48, %v1639_v36  ;;  %v1744_v52 = vsel %vm1743_vm10, %v1742_v9, %v3149_v14 }
 0x155   :  { %v523_v7 = vrot.slane %v521_v34, 4  ;;  %v493_v11 = vadd.f32 %v491_v38, %v458_v6  ;;  %v522_v41 = vrot.slane %v519_v39, 4  ;;  %v1708_v24 = vsel %vm1707_vm9, %v1706_v57, %v3142_v8 }
 0x156   :  { %1570 = vrot.lane.b32.xlu0 %v1566_v1, %s2560_s10  ;;  %1572 = vrot.lane.b32.xlu1 %v1567_v40, %s2560_s10  ;;  %v1651_v6 = vmul.f32 %v1648_v48, %v1640_v54  ;;  %v1687_v8 = vmul.f32 %v1684_v28, %v1676_v63  ;;  %v1686_v1 = vmul.f32 %v1684_v28, %v1675_v4  ;;  %v1778_v38 = vrot.slane %v3164_v33, 4  ;;  %s2571_s10 = smov 90  }
 0x157   :  { %v524_v56 = vsel %vm58_vm0, %v522_v41, %v523_v7  ;;  %v1711_v30 = vmul.f32 %v3265_v60, %v1708_v24  ;;  %v1712_v7 = vmul.f32 %v3273_v31, %v1706_v57  ;;  %v1756_v48 = vrot.slane %v1739_v22, %v2759_v15 }
 0x158   :  { %v553_v16 = vpop.permute.xlu0 %552  ;;  %v525_v58 = vsel %vm429_vm8, %v519_v39, %v524_v56  ;;  %v555_v44 = vpop.permute.xlu1 %554  ;;  %vm1815_vm8 = vcmask 695296   ;;  %v1748_v14 = vmul.f32 %v3273_v31, %v1742_v9  ;;  %v1747_v46 = vmul.f32 %v3265_v60, %v1744_v52 }
 0x159   :  { %v556_v26 = vrot.slane %v553_v16, 4  ;;  %v527_v62 = vadd.f32 %v525_v58, %v493_v11  ;;  %v557_v51 = vrot.slane %v555_v44, 4  ;;  %v1722_v49 = vmul.f32 %v1720_v3, %v1711_v30 }
 0x15a   :  { %1606 = vrot.lane.b32.xlu0 %v1602_v37, %s2561_s12  ;;  %1608 = vrot.lane.b32.xlu1 %v1603_v17, %s2561_s12  ;;  %v1811_v37 = vsel %vm320_vm5, %v1809_v35, %v1810_v27  ;;  %v1723_v58 = vmul.f32 %v1720_v3, %v1712_v7  ;;  %v1846_v63 = vstv %s3384_s15  ;;  %v1758_v22 = vmul.f32 %v1756_v48, %v1747_v46  ;;  %s2573_s12 = smov 58   ;;  %s2576_s15 = smov [#allocation10]  }
 0x15b   :  { %v558_v12 = vsel %vm58_vm0, %v556_v26, %v557_v51  ;;  %v1828_v26 = vrot.slane %v1811_v37, %v2759_v15  ;;  %v1845_v51 = vstv %s3379_s13  ;;  %v1816_v3 = vsel %vm1815_vm8, %v1814_v18, %v3169_v5  ;;  %s2574_s13 = smov 42  }
 0x15c   :  { %v602_v13 = vpop.permute.xlu0 %601  ;;  %v559_v53 = vsel %vm393_vm7, %v553_v16, %v558_v12  ;;  %v600_v32 = vpop.permute.xlu1 %599  ;;  %vm642_vm7 = vcmask 908288   ;;  %v1780_v16 = vsel %vm1779_vm11, %v1778_v38, %v3164_v33  ;;  %v1759_v33 = vmul.f32 %v1756_v48, %v1748_v14 }
 0x15d   :  { %v604_v19 = vrot.slane %v602_v13, 4  ;;  %v561_v25 = vadd.f32 %v559_v53, %v527_v62  ;;  %v603_v61 = vrot.slane %v600_v32, 4  ;;  %v1792_v62 = vrot.slane %v1775_v43, %v2759_v15 }
 0x15e   :  { %1654 = vrot.lane.b32.xlu0 %v1650_v59, %s2562_s14  ;;  %1656 = vrot.lane.b32.xlu1 %v1651_v6, %s2562_s14  ;;  %v1783_v4 = vmul.f32 %v3265_v60, %v1780_v16  ;;  %v1784_v12 = vmul.f32 %v3273_v31, %v1778_v38  ;;  %v1850_v13 = vrot.slane %v3195_v42, 4  ;;  %v1820_v5 = vmul.f32 %v3273_v31, %v1814_v18  ;;  %s2575_s14 = smov 26  }
 0x15f   :  { %v605_v34 = vsel %vm58_vm0, %v603_v61, %v604_v19  ;;  %v1847_v61 = vsel %vm320_vm5, %v1845_v51, %v1846_v63  ;;  %v1819_v27 = vmul.f32 %v3265_v60, %v1816_v3  ;;  %v1898_v29 = vrot.slane %v3201_v50, 4 }
 0x160   :  { %v636_v45 = vpop.permute.xlu0 %635  ;;  %v607_v39 = vsel %vm606_vm1, %v600_v32, %v605_v34  ;;  %v638_v47 = vpop.permute.xlu1 %637  ;;  %v1883_v32 = vstv %s3394_s1  ;;  %v1794_v23 = vmul.f32 %v1792_v62, %v1783_v4  ;;  %v1852_v52 = vsel %vm1851_vm2, %v1850_v13, %v3195_v42  ;;  %s2173_s1 = sshll.u32 %s2576_s15, 4  ;;  %s2174_s1 = int_to_ptr.vmem [resolvable:$true] %s2173_s1 }
 0x161   :  { %v639_v40 = vrot.slane %v636_v45, 4  ;;  %v609_v11 = vadd.f32 %v607_v39, %v561_v25  ;;  %v640_v41 = vrot.slane %v638_v47, 4  ;;  %v1884_v25 = vstv %s3401_s17  ;;  %p2452_p6 = scmp.lt.s32.totalorder %s2174_s1, %s2174_s1 }
 0x162   :  { %1690 = vrot.lane.b32.xlu0 %v1686_v1, %s2563_s16  ;;  %1692 = vrot.lane.b32.xlu1 %v1687_v8, %s2563_s16  ;;  %v1795_v7 = vmul.f32 %v1792_v62, %v1784_v12  ;;  %v1885_v38 = vsel %vm320_vm5, %v1883_v32, %v1884_v25  ;;  %vm750_vm14 = vcmask 515072   ;;  %v1864_v47 = vrot.slane %v1847_v61, %v2759_v15  ;;  %s2447_s16 = scalar_lea.vmem %s2174_s1, 64 }
 0x163   :  { %v641_v36 = vsel %vm58_vm0, %v639_v40, %v640_v41  ;;  %v1929_v48 = vstv %s3409_s18  ;;  %v1831_v42 = vmul.f32 %v1828_v26, %v1820_v5  ;;  %v1830_v41 = vmul.f32 %v1828_v26, %v1819_v27  ;;  %p2448_p5 = scmp.ne.s32.totalorder %s2174_s1, %s2447_s16  ;;  %p2453_p7 = scmp.lt.s32.totalorder %s2447_s16, %s2447_s16 }
 0x164   :  { %v674_v56 = vpop.permute.xlu0 %673  ;;  %v643_v54 = vsel %vm642_vm7, %v636_v45, %v641_v36  ;;  %v672_v57 = vpop.permute.xlu1 %671  ;;  %v1900_v14 = vsel %vm1899_vm4, %v1898_v29, %v3201_v50  ;;  %v1855_v37 = vmul.f32 %v3265_v60, %v1852_v52  ;;  %v1934_v18 = vrot.slane %v3220_v20, 4 }
 0x165   :  { %v676_v17 = vrot.slane %v674_v56, 4  ;;  %v645_v44 = vadd.f32 %v643_v54, %v609_v11  ;;  %v675_v28 = vrot.slane %v672_v57, 4  ;;  %v1930_v11 = vstv %s3414_s24  ;;  %p2454_p8 = por %p2453_p7, %p2452_p6 }
 0x166   :  { %1726 = vrot.lane.b32.xlu0 %v1722_v49, %s2564_s19  ;;  %1728 = vrot.lane.b32.xlu1 %v1723_v58, %s2564_s19  ;;  %v1856_v49 = vmul.f32 %v3273_v31, %v1850_v13  ;;  %v1965_v58 = vstv %s3424_s25  ;;  %v1966_v26 = vstv %s3430_s27  ;;  %v1866_v62 = vmul.f32 %v1864_v47, %v1855_v37 }
 0x167   :  { %v677_v59 = vsel %vm58_vm0, %v675_v28, %v676_v17  ;;  %v1912_v17 = vrot.slane %v1885_v38, %v2759_v15  ;;  %v1903_v28 = vmul.f32 %v3265_v60, %v1900_v14  ;;  %v1970_v51 = vrot.slane %v3226_v21, 4  ;;  %p2455_p9 = pnand %p2454_p8, %p2448_p5 }
 0x168   :  { %v708_v9 = vpop.permute.xlu0 %707  ;;  %v679_v24 = vsel %vm678_vm6, %v672_v57, %v677_v59  ;;  %v710_v53 = vpop.permute.xlu1 %709  ;;  %v1904_v57 = vmul.f32 %v3273_v31, %v1898_v29  ;;  %vm2043_vm10 = vcmask 572416   ;;  %v1967_v12 = vsel %vm320_vm5, %v1965_v58, %v1966_v26 }
 0x169   :  { %v711_v19 = vrot.slane %v708_v9, 4  ;;  %v681_v6 = vadd.f32 %v679_v24, %v645_v44  ;;  %v712_v35 = vrot.slane %v710_v53, 4  ;;  %v1931_v44 = vsel %vm320_vm5, %v1929_v48, %v1930_v11 }
 0x16a   :  { %1762 = vrot.lane.b32.xlu0 %v1758_v22, %s2565_s26  ;;  %1764 = vrot.lane.b32.xlu1 %v1759_v33, %s2565_s26  ;;  %v1936_v22 = vsel %vm1935_vm13, %v1934_v18, %v3220_v20  ;;  %vm822_vm9 = vcmask 252928   ;;  %v2001_v53 = vstv %s3439_s28  ;;  %v2002_v32 = vstv %s3444_s22 }
 0x16b   :  { %v713_v8 = vsel %vm58_vm0, %v711_v19, %v712_v35  ;;  %v1948_v19 = vrot.slane %v1931_v44, %v2759_v15  ;;  %v1914_v20 = vmul.f32 %v1912_v17, %v1903_v28  ;;  %v1972_v35 = vsel %vm1971_vm3, %v1970_v51, %v3226_v21 }
 0x16c   :  { %v746_v1 = vpop.permute.xlu0 %745  ;;  %v715_v34 = vsel %vm714_vm12, %v708_v9, %v713_v8  ;;  %v744_v45 = vpop.permute.xlu1 %743  ;;  %v1867_v9 = vmul.f32 %v1864_v47, %v1856_v49  ;;  %v1939_v5 = vmul.f32 %v3265_v60, %v1936_v22  ;;  %v1940_v27 = vmul.f32 %v3273_v31, %v1934_v18 }
 0x16d   :  { %v748_v30 = vrot.slane %v746_v1, 4  ;;  %v717_v39 = vadd.f32 %v715_v34, %v681_v6  ;;  %v747_v40 = vrot.slane %v744_v45, 4  ;;  %v1915_v6 = vmul.f32 %v1912_v17, %v1904_v57 }
 0x16e   :  { %1798 = vrot.lane.b32.xlu0 %v1794_v23, %s2566_s29  ;;  %1800 = vrot.lane.b32.xlu1 %v1795_v7, %s2566_s29  ;;  %v2006_v23 = vrot.slane %v3256_v55, 4  ;;  %vm2007_vm11 = vcmask 441344   ;;  %vm870_vm8 = vcmask 1031168   ;;  %v1984_v21 = vrot.slane %v1967_v12, %v2759_v15 }
 0x16f   :  { %v749_v43 = vsel %vm58_vm0, %v747_v40, %v748_v30  ;;  %v2037_v34 = vstv %s3454_s30  ;;  %v2003_v7 = vsel %vm320_vm5, %v2001_v53, %v2002_v32  ;;  %v1975_v38 = vmul.f32 %v3265_v60, %v1972_v35 }
 0x170   :  { %v780_v46 = vpop.permute.xlu0 %779  ;;  %v751_v36 = vsel %vm750_vm14, %v744_v45, %v749_v43  ;;  %v782_v16 = vpop.permute.xlu1 %781  ;;  %v2038_v45 = vstv %s3461_s5  ;;  %v2042_v40 = vrot.slane %v3262_v10, 4  ;;  %v1976_v11 = vmul.f32 %v3273_v31, %v1970_v51 }
 0x171   :  { %v783_v56 = vrot.slane %v780_v46, 4  ;;  %v753_v50 = vadd.f32 %v751_v36, %v717_v39  ;;  %v784_v54 = vrot.slane %v782_v16, 4  ;;  %v1950_v39 = vmul.f32 %v1948_v19, %v1939_v5 }
 0x172   :  { %1834 = vrot.lane.b32.xlu0 %v1830_v41, %s2567_s23  ;;  %1836 = vrot.lane.b32.xlu1 %v1831_v42, %s2567_s23  ;;  %v2008_v42 = vsel %vm2007_vm11, %v2006_v23, %v3256_v55  ;;  %v1951_v37 = vmul.f32 %v1948_v19, %v1940_v27  ;;  %v2039_v43 = vsel %vm320_vm5, %v2037_v34, %v2038_v45  ;;  %v2073_v18 = vstv %s3473_s0 }
 0x173   :  { %v785_v63 = vsel %vm58_vm0, %v783_v56, %v784_v54  ;;  %v2020_v49 = vrot.slane %v2003_v7, %v2759_v15  ;;  %v2074_v36 = vstv %s3475_s21  ;;  %vm906_vm1 = vcmask 900096  }
 0x174   :  { %v818_v33 = vpop.permute.xlu0 %817  ;;  %v787_v4 = vsel %vm786_vm15, %v780_v46, %v785_v63  ;;  %v816_v59 = vpop.permute.xlu1 %815  ;;  %v1986_v56 = vmul.f32 %v1984_v21, %v1975_v38  ;;  %v2044_v55 = vsel %vm2043_vm10, %v2042_v40, %v3262_v10  ;;  %v2011_v16 = vmul.f32 %v3265_v60, %v2008_v42 }
 0x175   :  { %v820_v3 = vrot.slane %v818_v33, 4  ;;  %v789_v13 = vadd.f32 %v787_v4, %v753_v50  ;;  %v819_v24 = vrot.slane %v816_v59, 4  ;;  %v2012_v17 = vmul.f32 %v3273_v31, %v2006_v23 }
 0x176   :  { %1870 = vrot.lane.b32.xlu0 %v1866_v62, %s2568_s20  ;;  %1872 = vrot.lane.b32.xlu1 %v1867_v9, %s2568_s20  ;;  %v1987_v44 = vmul.f32 %v1984_v21, %v1976_v11  ;;  %v2056_v28 = vrot.slane %v2039_v43, %v2759_v15  ;;  %v2075_v62 = vsel %vm320_vm5, %v2073_v18, %v2074_v36  ;;  %vm2079_vm7 = vcmask 703488  }
 0x177   :  { %v821_v25 = vsel %vm58_vm0, %v819_v24, %v820_v3  ;;  %v2047_v10 = vmul.f32 %v3265_v60, %v2044_v55  ;;  %v2048_v51 = vmul.f32 %v3273_v31, %v2042_v40  ;;  %v2109_v33 = vstv %s3489_s7 }
 0x178   :  { %v864_v61 = vpop.permute.xlu0 %863  ;;  %v823_v29 = vsel %vm822_vm9, %v816_v59, %v821_v25  ;;  %v866_v1 = vpop.permute.xlu1 %865  ;;  %v2022_v22 = vmul.f32 %v2020_v49, %v2011_v16  ;;  %v2110_v4 = vstv %s3494_s8  ;;  %v2023_v9 = vmul.f32 %v2020_v49, %v2012_v17 }
 0x179   :  { %v867_v8 = vrot.slane %v864_v61, 4  ;;  %v825_v52 = vadd.f32 %v823_v29, %v789_v13  ;;  %v868_v30 = vrot.slane %v866_v1, 4  ;;  %vm2115_vm2 = vcmask 834560  }
 0x17a   :  { %1918 = vrot.lane.b32.xlu0 %v1914_v20, %s2569_s6  ;;  %1920 = vrot.lane.b32.xlu1 %v1915_v6, %s2569_s6  ;;  %vm942_vm4 = vcmask 769024   ;;  %v2092_v6 = vrot.slane %v2075_v62, %v2759_v15  ;;  %v2111_v20 = vsel %vm320_vm5, %v2109_v33, %v2110_v4  ;;  %v2058_v35 = vmul.f32 %v2056_v28, %v2047_v10 }
 0x17b   :  { %v869_v47 = vsel %vm58_vm0, %v867_v8, %v868_v30  ;;  %v2059_v27 = vmul.f32 %v2056_v28, %v2048_v51  ;;  %vm978_vm6 = vcmask 637952   ;;  %v2128_v34 = vrot.slane %v2111_v20, %v2759_v15 }
 0x17c   :  { %v2077_v48 = vpop.permute.xlu0 %2076  ;;  %v871_v41 = vsel %vm870_vm8, %v864_v61, %v869_v47  ;;  %v900_v14 = vpop.permute.xlu1 %899  ;;  %vm1014_vm5 = vcmask 506880   ;;  %vm1050_vm12 = vcmask 375808   ;;  %vm1086_vm13 = vcmask 244736  }
 0x17d   :  { %v873_v46 = vadd.f32 %v871_v41, %v825_v52  ;;  %v2078_v54 = vrot.slane %v2077_v48, 4  ;;  %v903_v57 = vrot.slane %v900_v14, 4  ;;  %vm1134_vm3 = vcmask 1022976  }
 0x17e   :  { %1954 = vrot.lane.b32.xlu0 %v1950_v39, %s2570_s9  ;;  %1956 = vrot.lane.b32.xlu1 %v1951_v37, %s2570_s9  ;;  %vm1170_vm14 = vcmask 891904   ;;  %vm1206_vm15 = vcmask 760832   ;;  %vm1241_vm10 = vcmask 629760   ;;  %vm1277_vm9 = vcmask 498688  }
 0x17f   :  { %v2080_v12 = vsel %vm2079_vm7, %v2078_v54, %v2077_v48  ;;  %v2084_v23 = vmul.f32 %v3273_v31, %v2078_v54  ;;  %vm1313_vm11 = vcmask 367616   ;;  %vm1349_vm8 = vcmask 236544  }
 0x180   :  { %v902_v50 = vpop.permute.xlu0 %901  ;;  %v2113_v26 = vpop.permute.xlu1 %2112  ;;  %v2083_v5 = vmul.f32 %v3265_v60, %v2080_v12  ;;  %vm1433_vm7 = vcmask 883712  }
 0x181   :  { %v904_v58 = vrot.slane %v902_v50, 4  ;;  %v2114_v24 = vrot.slane %v2113_v26, 4  ;;  %v2095_v39 = vmul.f32 %v2092_v6, %v2084_v23 }
 0x182   :  { %1990 = vrot.lane.b32.xlu0 %v1986_v56, %s2571_s10  ;;  %1992 = vrot.lane.b32.xlu1 %v1987_v44, %s2571_s10  ;;  %v2094_v2 = vmul.f32 %v2092_v6, %v2083_v5 }
 0x183   :  { %v905_v63 = vsel %vm58_vm0, %v903_v57, %v904_v58  ;;  %v2116_v29 = vsel %vm2115_vm2, %v2114_v24, %v2113_v26  ;;  %v2120_v40 = vmul.f32 %v3273_v31, %v2114_v24  ;;  %vm1469_vm2 = vcmask 752640  }
 0x184   :  { %v907_v3 = vsel %vm906_vm1, %v900_v14, %v905_v63  ;;  %v936_v59 = vpop.permute.xlu0 %935  ;;  %v938_v53 = vpop.permute.xlu1 %937  ;;  %v2119_v45 = vmul.f32 %v3265_v60, %v2116_v29  ;;  %vm1397_vm1 = vcmask 1014784  }
 0x185   :  { %v909_v13 = vadd.f32 %v907_v3, %v873_v46  ;;  %v939_v19 = vrot.slane %v936_v59, 4  ;;  %v940_v32 = vrot.slane %v938_v53, 4  ;;  %v2131_v14 = vmul.f32 %v2128_v34, %v2120_v40 }
 0x186   :  { %2026 = vrot.lane.b32.xlu0 %v2022_v22, %s2572_s11  ;;  %2028 = vrot.lane.b32.xlu1 %v2023_v9, %s2572_s11  ;;  %v2130_v42 = vmul.f32 %v2128_v34, %v2119_v45 }
 0x187   :  { %v941_v25 = vsel %vm58_vm0, %v939_v19, %v940_v32 }
 0x188   :  { %v972_v61 = vpop.permute.xlu0 %971  ;;  %v943_v8 = vsel %vm942_vm4, %v936_v59, %v941_v25  ;;  %v974_v52 = vpop.permute.xlu1 %973  ;;  %vm1505_vm4 = vcmask 621568  }
 0x189   :  { %v975_v1 = vrot.slane %v972_v61, 4  ;;  %v945_v30 = vadd.f32 %v943_v8, %v909_v13  ;;  %v976_v21 = vrot.slane %v974_v52, 4 }
 0x18a   :  { %2062 = vrot.lane.b32.xlu0 %v2058_v35, %s2573_s12  ;;  %2064 = vrot.lane.b32.xlu1 %v2059_v27, %s2573_s12 }
 0x18b   :  { %v977_v7 = vsel %vm58_vm0, %v975_v1, %v976_v21 }
 0x18c   :  { %v1008_v38 = vpop.permute.xlu0 %1007  ;;  %v979_v47 = vsel %vm978_vm6, %v972_v61, %v977_v7  ;;  %v1010_v48 = vpop.permute.xlu1 %1009  ;;  %vm1541_vm6 = vcmask 490496  }
 0x18d   :  { %v981_v11 = vadd.f32 %v979_v47, %v945_v30  ;;  %v1011_v22 = vrot.slane %v1008_v38, 4  ;;  %v1012_v3 = vrot.slane %v1010_v48, 4 }
 0x18e   :  { %2098 = vrot.lane.b32.xlu0 %v2094_v2, %s2574_s13  ;;  %2100 = vrot.lane.b32.xlu1 %v2095_v39, %s2574_s13 }
 0x18f   :  { %v1013_v13 = vsel %vm58_vm0, %v1011_v22, %v1012_v3 }
 0x190   :  { %v1044_v41 = vpop.permute.xlu0 %1043  ;;  %v1046_v37 = vpop.permute.xlu1 %1045  ;;  %v1015_v5 = vsel %vm1014_vm5, %v1008_v38, %v1013_v13  ;;  %vm1577_vm5 = vcmask 359424  }
 0x191   :  { %v1047_v9 = vrot.slane %v1044_v41, 4  ;;  %v1048_v12 = vrot.slane %v1046_v37, 4  ;;  %v1017_v1 = vadd.f32 %v1015_v5, %v981_v11 }
 0x192   :  { %2134 = vrot.lane.b32.xlu0 %v2130_v42, %s2575_s14  ;;  %2136 = vrot.lane.b32.xlu1 %v2131_v14, %s2575_s14 }
 0x193   :  { %v1049_v6 = vsel %vm58_vm0, %v1047_v9, %v1048_v12 }
 0x194   :  { %v1080_v15 = vpop.permute.xlu0 %1079  ;;  %v1082_v60 = vpop.permute.xlu1 %1081  ;;  %v1051_v29 = vsel %vm1050_vm12, %v1044_v41, %v1049_v6  ;;  %vm1613_vm12 = vcmask 228352  }
 0x195   :  { %v1083_v24 = vrot.slane %v1080_v15, 4  ;;  %v1084_v19 = vrot.slane %v1082_v60, 4  ;;  %v1053_v34 = vadd.f32 %v1051_v29, %v1017_v1 }
 0x197   :  { %v1085_v25 = vsel %vm58_vm0, %v1083_v24, %v1084_v19 }
 0x198   :  { %v1128_v43 = vpop.permute.xlu0 %1127  ;;  %v1130_v46 = vpop.permute.xlu1 %1129  ;;  %v1087_v2 = vsel %vm1086_vm13, %v1080_v15, %v1085_v25  ;;  %vm1661_vm13 = vcmask 1006592  }
 0x199   :  { %v1131_v20 = vrot.slane %v1128_v43, 4  ;;  %v1132_v35 = vrot.slane %v1130_v46, 4  ;;  %v1089_v48 = vadd.f32 %v1087_v2, %v1053_v34 }
 0x19b   :  { %v1133_v52 = vsel %vm58_vm0, %v1131_v20, %v1132_v35 }
 0x19c   :  { %v3528_v49 = vpop.permute.xlu0 %1163  ;;  %v1166_v31 = vpop.permute.xlu1 %1165  ;;  %v1135_v40 = vsel %vm1134_vm3, %v1128_v43, %v1133_v52  ;;  %vm1697_vm3 = vcmask 875520  }
 0x19d   :  { %v1167_v61 = vrot.slane %v3528_v49, 4  ;;  %v1168_v27 = vrot.slane %v1166_v31, 4  ;;  %v1137_v37 = vadd.f32 %v1135_v40, %v1089_v48 }
 0x19f   :  { %v1169_v45 = vsel %vm58_vm0, %v1167_v61, %v1168_v27 }
 0x1a0   :  { %v3530_v18 = vpop.permute.xlu0 %1199  ;;  %v1202_v36 = vpop.permute.xlu1 %1201  ;;  %v1171_v14 = vsel %vm1170_vm14, %v3528_v49, %v1169_v45  ;;  %vm1733_vm14 = vcmask 744448  }
 0x1a1   :  { %v1203_v30 = vrot.slane %v3530_v18, 4  ;;  %v1204_v21 = vrot.slane %v1202_v36, 4 }
 0x1a3   :  { %v1205_v11 = vsel %vm58_vm0, %v1203_v30, %v1204_v21 }
 0x1a4   :  { %v3532_v56 = vpop.permute.xlu0 %1234  ;;  %v3534_v55 = vpop.permute.xlu1 %1236  ;;  %v1207_v31 = vsel %vm1206_vm15, %v3530_v18, %v1205_v11  ;;  %vm1769_vm15 = vcmask 613376  }
 0x1a5   :  { %v1238_v7 = vrot.slane %v3532_v56, 4  ;;  %v1239_v38 = vrot.slane %v3534_v55, 4  ;;  %v1173_v55 = vadd.f32 %v1171_v14, %v1137_v37 }
 0x1a7   :  { %v1240_v15 = vsel %vm58_vm0, %v1238_v7, %v1239_v38  ;;  %v1209_v9 = vadd.f32 %v1207_v31, %v1173_v55 }
 0x1a8   :  { %v3536_v16 = vpop.permute.xlu0 %1270  ;;  %v3538_v17 = vpop.permute.xlu1 %1272  ;;  %v1242_v3 = vsel %vm1241_vm10, %v3532_v56, %v1240_v15  ;;  %vm1805_vm10 = vcmask 482304  }
 0x1a9   :  { %v1274_v42 = vrot.slane %v3536_v16, 4  ;;  %v1275_v41 = vrot.slane %v3538_v17, 4  ;;  %v1244_v6 = vadd.f32 %v1242_v3, %v1209_v9 }
 0x1ab   :  { %v1276_v17 = vsel %vm58_vm0, %v1274_v42, %v1275_v41 }
 0x1ac   :  { %v3540_v50 = vpop.permute.xlu0 %1306  ;;  %v3542_v54 = vpop.permute.xlu1 %1308  ;;  %v1278_v24 = vsel %vm1277_vm9, %v3536_v16, %v1276_v17  ;;  %vm1841_vm9 = vcmask 351232  }
 0x1ad   :  { %v1310_v60 = vrot.slane %v3540_v50, 4  ;;  %v1311_v43 = vrot.slane %v3542_v54, 4  ;;  %v1280_v5 = vadd.f32 %v1278_v24, %v1244_v6 }
 0x1af   :  { %v1312_v54 = vsel %vm58_vm0, %v1310_v60, %v1311_v43 }
 0x1b0   :  { %v3544_v57 = vpop.permute.xlu0 %1342  ;;  %v3546_v58 = vpop.permute.xlu1 %1344  ;;  %v1314_v35 = vsel %vm1313_vm11, %v3540_v50, %v1312_v54  ;;  %vm1877_vm11 = vcmask 220160  }
 0x1b1   :  { %v1346_v49 = vrot.slane %v3544_v57, 4  ;;  %v1347_v22 = vrot.slane %v3546_v58, 4  ;;  %v1316_v1 = vadd.f32 %v1314_v35, %v1280_v5 }
 0x1b3   :  { %v1348_v58 = vsel %vm58_vm0, %v1346_v49, %v1347_v22 }
 0x1b4   :  { %v3548_v26 = vpop.permute.xlu0 %1390  ;;  %v3550_v44 = vpop.permute.xlu1 %1392  ;;  %v1350_v27 = vsel %vm1349_vm8, %v3544_v57, %v1348_v58  ;;  %vm1925_vm8 = vcmask 998400  }
 0x1b5   :  { %v1394_v12 = vrot.slane %v3548_v26, 4  ;;  %v1395_v18 = vrot.slane %v3550_v44, 4  ;;  %v1352_v21 = vadd.f32 %v1350_v27, %v1316_v1 }
 0x1b7   :  { %v1396_v44 = vsel %vm58_vm0, %v1394_v12, %v1395_v18 }
 0x1b8   :  { %v3552_v28 = vpop.permute.xlu0 %1426  ;;  %v3554_v62 = vpop.permute.xlu1 %1428  ;;  %v1398_v30 = vsel %vm1397_vm1, %v3548_v26, %v1396_v44  ;;  %vm1961_vm1 = vcmask 867328  }
 0x1b9   :  { %v1430_v56 = vrot.slane %v3552_v28, 4  ;;  %v1431_v20 = vrot.slane %v3554_v62, 4  ;;  %v1400_v38 = vadd.f32 %v1398_v30, %v1352_v21 }
 0x1bb   :  { %v1432_v62 = vsel %vm58_vm0, %v1430_v56, %v1431_v20 }
 0x1bc   :  { %v3556_v10 = vpop.permute.xlu0 %1462  ;;  %v3558_v51 = vpop.permute.xlu1 %1464  ;;  %v1434_v45 = vsel %vm1433_vm7, %v3552_v28, %v1432_v62  ;;  %vm1997_vm7 = vcmask 736256  }
 0x1bd   :  { %v1466_v25 = vrot.slane %v3556_v10, 4  ;;  %v1467_v16 = vrot.slane %v3558_v51, 4  ;;  %v1436_v11 = vadd.f32 %v1434_v45, %v1400_v38 }
 0x1bf   :  { %v1468_v51 = vsel %vm58_vm0, %v1466_v25, %v1467_v16 }
 0x1c0   :  { %v3560_v63 = vpop.permute.xlu0 %1498  ;;  %v3562_v33 = vpop.permute.xlu1 %1500  ;;  %v1470_v48 = vsel %vm1469_vm2, %v3556_v10, %v1468_v51  ;;  %vm2033_vm2 = vcmask 605184  }
 0x1c1   :  { %v1502_v50 = vrot.slane %v3560_v63, 4  ;;  %v1503_v52 = vrot.slane %v3562_v33, 4  ;;  %v1472_v15 = vadd.f32 %v1470_v48, %v1436_v11 }
 0x1c3   :  { %v1504_v40 = vsel %vm58_vm0, %v1502_v50, %v1503_v52 }
 0x1c4   :  { %v3564_v4 = vpop.permute.xlu0 %1534  ;;  %v3566_v59 = vpop.permute.xlu1 %1536  ;;  %v1506_v14 = vsel %vm1505_vm4, %v3560_v63, %v1504_v40  ;;  %vm2069_vm4 = vcmask 474112  }
 0x1c5   :  { %v1538_v2 = vrot.slane %v3564_v4, 4  ;;  %v1539_v57 = vrot.slane %v3566_v59, 4  ;;  %v1508_v31 = vadd.f32 %v1506_v14, %v1472_v15 }
 0x1c7   :  { %v1540_v42 = vsel %vm58_vm0, %v1538_v2, %v1539_v57 }
 0x1c8   :  { %v3569_v53 = vpop.permute.xlu0 %1570  ;;  %v3571_v32 = vpop.permute.xlu1 %1572  ;;  %v1542_v43 = vsel %vm1541_vm6, %v3564_v4, %v1540_v42  ;;  %vm2105_vm6 = vcmask 343040  }
 0x1c9   :  { %v1574_v33 = vrot.slane %v3569_v53, 4  ;;  %v1575_v26 = vrot.slane %v3571_v32, 4  ;;  %v1544_v3 = vadd.f32 %v1542_v43, %v1508_v31 }
 0x1cb   :  { %v1576_v60 = vsel %vm58_vm0, %v1574_v33, %v1575_v26 }
 0x1cc   :  { %v3576_v23 = vpop.permute.xlu0 %1606  ;;  %v3578_v8 = vpop.permute.xlu1 %1608  ;;  %v1578_v49 = vsel %vm1577_vm5, %v3569_v53, %v1576_v60  ;;  %vm2141_vm5 = vcmask 211968  }
 0x1cd   :  { %v1610_v59 = vrot.slane %v3576_v23, 4  ;;  %v1611_v41 = vrot.slane %v3578_v8, 4  ;;  %v1580_v12 = vadd.f32 %v1578_v49, %v1544_v3 }
 0x1cf   :  { %v1612_v55 = vsel %vm58_vm0, %v1610_v59, %v1611_v41 }
 0x1d0   :  { %v3585_v39 = vpop.permute.xlu0 %1654  ;;  %v3587_v47 = vpop.permute.xlu1 %1656  ;;  %v1614_v54 = vsel %vm1613_vm12, %v3576_v23, %v1612_v55  ;;  %vm2161_vm12 = vcmp.lt.s32.totalorder %v79_v0, 256 }
 0x1d1   :  { %v1658_v32 = vrot.slane %v3585_v39, 4  ;;  %v1659_v10 = vrot.slane %v3587_v47, 4  ;;  %v1616_v56 = vadd.f32 %v1614_v54, %v1580_v12 }
 0x1d3   :  { %v1660_v9 = vsel %vm58_vm0, %v1658_v32, %v1659_v10 }
 0x1d4   :  { %v3596_v46 = vpop.permute.xlu0 %1690  ;;  %v3599_v36 = vpop.permute.xlu1 %1692  ;;  %v1662_v6 = vsel %vm1661_vm13, %v3585_v39, %v1660_v9 }
 0x1d5   :  { %v1694_v8 = vrot.slane %v3596_v46, 4  ;;  %v1695_v17 = vrot.slane %v3599_v36, 4  ;;  %v1664_v5 = vadd.f32 %v1662_v6, %v1616_v56 }
 0x1d7   :  { %v1696_v18 = vsel %vm58_vm0, %v1694_v8, %v1695_v17 }
 0x1d8   :  { %v3608_v13 = vpop.permute.xlu0 %1726  ;;  %v3611_v19 = vpop.permute.xlu1 %1728  ;;  %v1698_v23 = vsel %vm1697_vm3, %v3596_v46, %v1696_v18 }
 0x1d9   :  { %v1730_v47 = vrot.slane %v3608_v13, 4  ;;  %v1731_v4 = vrot.slane %v3611_v19, 4  ;;  %v1700_v1 = vadd.f32 %v1698_v23, %v1664_v5 }
 0x1db   :  { %v1732_v20 = vsel %vm58_vm0, %v1730_v47, %v1731_v4 }
 0x1dc   :  { %v3620_v61 = vpop.permute.xlu0 %1762  ;;  %v3623_v29 = vpop.permute.xlu1 %1764  ;;  %v1734_v39 = vsel %vm1733_vm14, %v3608_v13, %v1732_v20 }
 0x1dd   :  { %v1766_v36 = vrot.slane %v3620_v61, 4  ;;  %v1767_v24 = vrot.slane %v3623_v29, 4  ;;  %v1736_v46 = vadd.f32 %v1734_v39, %v1700_v1 }
 0x1df   :  { %v1768_v44 = vsel %vm58_vm0, %v1766_v36, %v1767_v24 }
 0x1e0   :  { %v3632_v34 = vpop.permute.xlu0 %1798  ;;  %v1801_v7 = vpop.permute.xlu1 %1800  ;;  %v1770_v30 = vsel %vm1769_vm15, %v3620_v61, %v1768_v44 }
 0x1e1   :  { %v1802_v19 = vrot.slane %v3632_v34, 4  ;;  %v1803_v35 = vrot.slane %v1801_v7, 4  ;;  %v1772_v7 = vadd.f32 %v1770_v30, %v1736_v46 }
 0x1e3   :  { %v1804_v62 = vsel %vm58_vm0, %v1802_v19, %v1803_v35 }
 0x1e4   :  { %v3642_v28 = vpop.permute.xlu0 %1834  ;;  %v1837_v37 = vpop.permute.xlu1 %1836  ;;  %v1806_v45 = vsel %vm1805_vm10, %v3632_v34, %v1804_v62 }
 0x1e5   :  { %v1838_v25 = vrot.slane %v3642_v28, 4  ;;  %v1839_v16 = vrot.slane %v1837_v37, 4  ;;  %v1808_v61 = vadd.f32 %v1806_v45, %v1772_v7 }
 0x1e7   :  { %v1840_v21 = vsel %vm58_vm0, %v1838_v25, %v1839_v16 }
 0x1e8   :  { %v1871_v63 = vpop.permute.xlu0 %1870  ;;  %v1873_v22 = vpop.permute.xlu1 %1872  ;;  %v1842_v26 = vsel %vm1841_vm9, %v3642_v28, %v1840_v21 }
 0x1e9   :  { %v1874_v50 = vrot.slane %v1871_v63, 4  ;;  %v1875_v52 = vrot.slane %v1873_v22, 4  ;;  %v1844_v34 = vadd.f32 %v1842_v26, %v1808_v61 }
 0x1eb   :  { %v1876_v38 = vsel %vm58_vm0, %v1874_v50, %v1875_v52 }
 0x1ec   :  { %v1919_v53 = vpop.permute.xlu0 %1918  ;;  %v1921_v58 = vpop.permute.xlu1 %1920  ;;  %v1878_v41 = vsel %vm1877_vm11, %v1871_v63, %v1876_v38 }
 0x1ed   :  { %v1922_v51 = vrot.slane %v1919_v53, 4  ;;  %v1923_v2 = vrot.slane %v1921_v58, 4  ;;  %v1880_v10 = vadd.f32 %v1878_v41, %v1844_v34 }
 0x1ef   :  { %v1924_v48 = vsel %vm58_vm0, %v1922_v51, %v1923_v2 }
 0x1f0   :  { %v1955_v27 = vpop.permute.xlu0 %1954  ;;  %v1957_v29 = vpop.permute.xlu1 %1956  ;;  %v1926_v32 = vsel %vm1925_vm8, %v1919_v53, %v1924_v48 }
 0x1f1   :  { %v1958_v40 = vrot.slane %v1955_v27, 4  ;;  %v1959_v33 = vrot.slane %v1957_v29, 4  ;;  %v1928_v17 = vadd.f32 %v1926_v32, %v1880_v10 }
 0x1f3   :  { %v1960_v37 = vsel %vm58_vm0, %v1958_v40, %v1959_v33 }
 0x1f4   :  { %v1991_v57 = vpop.permute.xlu0 %1990  ;;  %v1993_v13 = vpop.permute.xlu1 %1992  ;;  %v1962_v31 = vsel %vm1961_vm1, %v1955_v27, %v1960_v37 }
 0x1f5   :  { %v1994_v11 = vrot.slane %v1991_v57, 4  ;;  %v1995_v42 = vrot.slane %v1993_v13, 4  ;;  %v1964_v3 = vadd.f32 %v1962_v31, %v1928_v17 }
 0x1f7   :  { %v1996_v28 = vsel %vm58_vm0, %v1994_v11, %v1995_v42 }
 0x1f8   :  { %v2027_v59 = vpop.permute.xlu0 %2026  ;;  %v2029_v14 = vpop.permute.xlu1 %2028  ;;  %v1998_v22 = vsel %vm1997_vm7, %v1991_v57, %v1996_v28 }
 0x1f9   :  { %v2030_v15 = vrot.slane %v2027_v59, 4  ;;  %v2031_v60 = vrot.slane %v2029_v14, 4  ;;  %v2000_v18 = vadd.f32 %v1998_v22, %v1964_v3 }
 0x1fb   :  { %v2032_v63 = vsel %vm58_vm0, %v2030_v15, %v2031_v60 }
 0x1fc   :  { %v2063_v43 = vpop.permute.xlu0 %2062  ;;  %v2065_v8 = vpop.permute.xlu1 %2064  ;;  %v2034_v4 = vsel %vm2033_vm2, %v2027_v59, %v2032_v63 }
 0x1fd   :  { %v2066_v55 = vrot.slane %v2063_v43, 4  ;;  %v2067_v49 = vrot.slane %v2065_v8, 4  ;;  %v2036_v53 = vadd.f32 %v2034_v4, %v2000_v18 }
 0x1ff   :  { %v2068_v9 = vsel %vm58_vm0, %v2066_v55, %v2067_v49 }
 0x200   :  { %v2099_v47 = vpop.permute.xlu0 %2098  ;;  %v2101_v12 = vpop.permute.xlu1 %2100  ;;  %v2070_v24 = vsel %vm2069_vm4, %v2063_v43, %v2068_v9 }
 0x201   :  { %v2102_v54 = vrot.slane %v2099_v47, 4  ;;  %v2103_v36 = vrot.slane %v2101_v12, 4  ;;  %v2072_v35 = vadd.f32 %v2070_v24, %v2036_v53 }
 0x203   :  { %v2104_v6 = vsel %vm58_vm0, %v2102_v54, %v2103_v36 }
 0x204   :  { %v2135_v58 = vpop.permute.xlu0 %2134  ;;  %v2106_v56 = vsel %vm2105_vm6, %v2099_v47, %v2104_v6  ;;  %v2137_v19 = vpop.permute.xlu1 %2136 }
 0x205   :  { %v2138_v20 = vrot.slane %v2135_v58, 4  ;;  %v2139_v23 = vrot.slane %v2137_v19, 4  ;;  %v2108_v5 = vadd.f32 %v2106_v56, %v2072_v35 }
 0x207   :  { %v2140_v44 = vsel %vm58_vm0, %v2138_v20, %v2139_v23 }
 0x208   :  { %v2142_v25 = vsel %vm2141_vm5, %v2135_v58, %v2140_v44 }
 0x209   :  { %v2144_v16 = vadd.f32 %v2142_v25, %v2108_v5 }
 0x20b   :  { %2145 = vst [vmem:[#allocation2] sm:$0xff] %v2144_v16 }
 0x212   :  { %v2147_v27 = vld [vmem:[#allocation2] sm:$0xcc]  ;;  %v2146_v29 = vld [vmem:[#allocation2] sm:$0x33] }
 0x213   :  { %v2284_v39 = vrot.slane %v2147_v27, 10 }
 0x215   :  { %v2152_v1 = vadd.f32 %v2284_v39, %v2146_v29 }
 0x217   :  { %v2153_v62 = vsub.f32 0.0, %v2152_v1 }
 0x219   :  { %v2154_v50 = vmul.f32 1.442695, %v2153_v62 }
 0x21b   :  { %2387 = vpow2.f32 %v2154_v50 }
 0x225   :  { %v2388_v52 = vpop.eup %2387 }
 0x226   :  { %v2156_v30 = vadd.f32 1.0, %v2388_v52 }
 0x228   :  { %2389 = vrcp.f32 %v2156_v30 }
 0x232   :  { %v2390_v46 = vpop.eup %2389 }
 0x233   :  { %2158 = vst [vmem:[#allocation2] sm:$0x33] %v2390_v46 }
 0x23a   :  { %v2159_v21 = vld [vmem:[#allocation2] ss:$4 sm:$0x3]  ;;  %v2165_v51 = vld [vmem:[#allocation2 + $0x1] ss:$4 sm:$0x3] }
 0x23b   :  { %2163 = vst.msk [vmem:[#allocation10] sm:$0x3] %vm2161_vm12, %v2159_v21  ;;  %2167 = vst.msk [vmem:[#allocation10 + $0x2] sm:$0x3] %vm2161_vm12, %v2165_v51 }
 0x23c   :  { %2458 = shalt.err (!%p2455_p9)
}
 0x23d   :  { %s2459_s19 = scalar_lea.hbm %s3699_s3, 64 }
 0x23e   :  { %p2460_p10 = scmp.ne.s32.totalorder %s3699_s3, %s2459_s19  ;;  %p2463_p11 = scmp.lt.u32.totalorder %s2459_s19, %s3699_s3 }
 0x240   :  { %p2465_p12 = pnand %p2463_p11, %p2460_p10 }
 0x242   :  { %2468 = shalt.err (!%p2465_p12)
}
 0x243   :  { %2179 = dma.vmem_to_hbm [thread:$0]  %s2174_s1, 64, %s3699_s3, [#allocation5], %s2483_s2, %s2483_s2, %s2497_s4  }
 0x244   :  { %2475 = dma.done.wait [#allocation5], 64  }
 0x245   :  { %2476 = vsyncadd [#allocation5], 4294967232 }
 0x246   :  { %2183 = vsyncpa [#allocation4], 1 }
 0x247   :  { %2184 = vsyncpa [#allocation9], 1 }
 0x248   :  { %2185 = vsyncpa [#allocation5], 1 }
 0x249   :  { %2186 = vsyncpa [#allocation6], 1 }

</bundles_post_ra>
